<compile_context>
chip_gen: v5e
topology: v5e:2x2
jax: 0.10.0
libtpu: 0.0.40
codegen_flags: <defaults>
</compile_context>

<pallas_src>
import functools

import jax
import jax.numpy as jnp
from jax import lax
from jax.experimental import pallas as pl
from jax.experimental.pallas import tpu as pltpu


# ----------------------------------------------------------------------------
# Fused EncoderBlock kernel (per-sample grid step)
# ----------------------------------------------------------------------------
def _fused_encoder_kernel(xp_ref, g1_ref, b1_ref, w1_ref, g2_ref, b2_ref, w2_ref,
                          o_ref, pad1_ref, col1_ref, pad2_ref, col2_ref,
                          *, D, H, W, C1, C2, C3, G1, G2, eps):
    # D, H, W are the *pooled* spatial dims.  Activations are kept as
    # (rows=(d,h), lanes=(w,c)) matrices of shape (R, W*C) throughout.
    R = D * H
    f32 = jnp.float32

    def group_fold(v, G, C):
        # v: (1, C) per-channel sums -> per-channel sums over each channel's group.
        if G == 1:
            return jnp.broadcast_to(jnp.sum(v, axis=1, keepdims=True), (1, C))
        if G == C:
            return v
        # general 1 < G < C case (not exercised by the default config sizes)
        return jnp.broadcast_to(
            jnp.sum(v.reshape(G, C // G), axis=1, keepdims=True),
            (G, C // G)).reshape(1, C)

    def lane_channel_sums(a2, C):
        # a2: (R, W*C), lanes ordered (w, c) -> (1, C) summed over rows and w.
        s = jnp.zeros((1, C), f32)
        for w in range(W):          # W is small & static here; lane-contiguous slices
            s = s + jnp.sum(a2[:, w * C:(w + 1) * C], axis=0, keepdims=True)
        return s

    def gn_scale_shift(a2, gamma, beta, G, C):
        # GroupNorm with the affine folded into per-channel scale/shift.
        # Centered two-pass variance (robust vs. E[x^2]-E[x]^2 cancellation).
        cnt = float((C // G) * R * W)
        mean = group_fold(lane_channel_sums(a2, C), G, C) / cnt        # (1, C)
        sq = jnp.zeros((1, C), f32)
        for w in range(W):
            d = a2[:, w * C:(w + 1) * C] - mean
            sq = sq + jnp.sum(d * d, axis=0, keepdims=True)
        var = group_fold(sq, G, C) / cnt
        scale = gamma * lax.rsqrt(var + eps)
        shift = beta - mean * scale
        return scale, shift

    def zero_halo(pad_ref, C):
        # pad_ref: (D+2, H+2, (W+2)*C).  Zero only the 6 halo faces; the interior
        # is fully overwritten every grid step (no full-volume memset).
        WC = (W + 2) * C
        pad_ref[0:1, :, :] = jnp.zeros((1, H + 2, WC), f32)
        pad_ref[D + 1:D + 2, :, :] = jnp.zeros((1, H + 2, WC), f32)
        pad_ref[:, 0:1, :] = jnp.zeros((D + 2, 1, WC), f32)
        pad_ref[:, H + 1:H + 2, :] = jnp.zeros((D + 2, 1, WC), f32)
        pad_ref[:, :, 0:C] = jnp.zeros((D + 2, H + 2, C), f32)
        pad_ref[:, :, (W + 1) * C:WC] = jnp.zeros((D + 2, H + 2, C), f32)

    def normalize_into_pad(a2, scale, shift, pad_ref, C):
        # Write normalized activations into the padded-scratch interior, one
        # lane-contiguous w-slice at a time (only leading-dim reshapes needed).
        for w in range(W):
            xn_w = a2[:, w * C:(w + 1) * C] * scale + shift            # (R, C)
            pad_ref[1:D + 1, 1:H + 1, (w + 1) * C:(w + 2) * C] = (
                xn_w.reshape(D, H, C))

    def im2col_rows(pad_ref, col_ref, C):
        # Width-banded im2col: column block j=(kd,kh) holds the full padded-width
        # row slab -> (R, (W+2)*C), cast to bf16 for the MXU.
        WC = (W + 2) * C
        for kd in range(3):
            for kh in range(3):
                j = kd * 3 + kh
                blk = pad_ref[kd:kd + D, kh:kh + H, :]                 # (D, H, (W+2)*C)
                col_ref[:, j * WC:(j + 1) * WC] = (
                    blk.reshape(R, WC).astype(col_ref.dtype))

    # ---- fused MaxPool3d(kernel=2): input arrives pooling-window-major ----
    pooled = xp_ref[0, 0].astype(f32)                                  # (D, H, W*C1)
    for i in range(1, 8):
        pooled = jnp.maximum(pooled, xp_ref[0, i].astype(f32))
    a1 = pooled.reshape(R, W * C1)                                     # rows=(d,h), lanes=(w,c)

    # ---- layer 1: GroupNorm -> Conv3d(3x3x3, pad=1, no bias) -> ReLU ----
    zero_halo(pad1_ref, C1)
    s1, t1 = gn_scale_shift(a1, g1_ref[...], b1_ref[...], G1, C1)
    normalize_into_pad(a1, s1, t1, pad1_ref, C1)
    im2col_rows(pad1_ref, col1_ref, C1)
    h1 = jnp.maximum(
        jnp.dot(col1_ref[...], w1_ref[...], preferred_element_type=f32), 0.0)
    # h1: (R, W*C2), lanes=(w, c); stays entirely on-chip.

    # ---- layer 2: GroupNorm -> Conv3d(3x3x3, pad=1, no bias) -> ReLU ----
    zero_halo(pad2_ref, C2)
    s2, t2 = gn_scale_shift(h1, g2_ref[...], b2_ref[...], G2, C2)
    normalize_into_pad(h1, s2, t2, pad2_ref, C2)
    im2col_rows(pad2_ref, col2_ref, C2)
    out = jnp.maximum(
        jnp.dot(col2_ref[...], w2_ref[...], preferred_element_type=f32), 0.0)

    # lane-dense store: (D*H, W*C3); W*C3 == 128 for the reference config.
    o_ref[0] = out.astype(o_ref.dtype)


# ----------------------------------------------------------------------------
# Host-side helpers (weight banding is static layout glue)
# ----------------------------------------------------------------------------
def _banded_conv_weight(w_oidhw, W):
    """(O, I, 3, 3, 3) weight -> (9*(W+2)*I, W*O) width-banded im2col weight.

    K-axis order = (kd, kh, w_in_padded, ci); N-axis order = (w_out, co), so a
    (D*H, 9*(W+2)*I) patch matrix built from padded-width row slabs times this
    matrix yields the 3x3x3 conv output laid out as (D*H, W*O).
    NOTE: weight size scales with (W+2)/3; for large W switch back to the
    canonical (DHW, 27*I) im2col.  # TODO(synk): large-W / v7x D-tiled variant.
    """
    O, I = w_oidhw.shape[:2]
    w = jnp.transpose(w_oidhw, (2, 3, 4, 1, 0))          # (kd, kh, kw, I, O)
    wb = jnp.zeros((3, 3, W + 2, I, W, O), w_oidhw.dtype)
    for kw in range(3):
        for wo in range(W):
            wb = wb.at[:, :, wo + kw, :, wo, :].set(w[:, :, kw, :, :])
    return wb.reshape(9 * (W + 2) * I, W * O)


def encoder_block_forward(x_ncdhw, params):
    """x: (N, Cin, D, H, W) float32 with even D/H/W. Returns (N, Cout, D/2, H/2, W/2)."""
    N, Cin, D, H, W = x_ncdhw.shape
    D2, H2, W2 = D // 2, H // 2, W // 2
    Cmid = params["w1"].shape[0]
    Cout = params["w2"].shape[0]

    # layout glue: NCDHW -> pooling-window-major (N, 8, D2, H2, W2*Cin).
    xp = x_ncdhw.reshape(N, Cin, D2, 2, H2, 2, W2, 2)
    xp = jnp.transpose(xp, (0, 3, 5, 7, 2, 4, 6, 1))      # (N, dp, hp, wp, D2, H2, W2, C)
    xp = xp.reshape(N, 8, D2, H2, W2 * Cin)

    # banded bf16 conv weights (precompute / jit once in a real pipeline).
    w1b = _banded_conv_weight(params["w1"], W2).astype(jnp.bfloat16)
    w2b = _banded_conv_weight(params["w2"], W2).astype(jnp.bfloat16)
    K1, N1 = w1b.shape
    K2, N2 = w2b.shape

    kernel = functools.partial(
        _fused_encoder_kernel, D=D2, H=H2, W=W2, C1=Cin, C2=Cmid, C3=Cout,
        G1=params["groups1"], G2=params["groups2"], eps=1e-5)

    # TODO(synk): for large volumes (v7x 64 MiB VMEM) tile the grid over D with a
    # 1-voxel halo and carry/two-pass the GroupNorm stats instead of one-sample blocks.
    out = pl.pallas_call(
        kernel,
        out_shape=jax.ShapeDtypeStruct((N, D2 * H2, W2 * Cout), x_ncdhw.dtype),
        grid_spec=pltpu.PrefetchScalarGridSpec(
            num_scalar_prefetch=0,
            grid=(N,),
            in_specs=[
                pl.BlockSpec((1, 8, D2, H2, W2 * Cin), lambda n: (n, 0, 0, 0, 0)),
                pl.BlockSpec((1, Cin), lambda n: (0, 0)),
                pl.BlockSpec((1, Cin), lambda n: (0, 0)),
                pl.BlockSpec((K1, N1), lambda n: (0, 0)),
                pl.BlockSpec((1, Cmid), lambda n: (0, 0)),
                pl.BlockSpec((1, Cmid), lambda n: (0, 0)),
                pl.BlockSpec((K2, N2), lambda n: (0, 0)),
            ],
            out_specs=pl.BlockSpec((1, D2 * H2, W2 * Cout), lambda n: (n, 0, 0)),
            scratch_shapes=[
                pltpu.VMEM((D2 + 2, H2 + 2, (W2 + 2) * Cin), jnp.float32),   # pad1
                pltpu.VMEM((D2 * H2, K1), jnp.bfloat16),                     # col1
                pltpu.VMEM((D2 + 2, H2 + 2, (W2 + 2) * Cmid), jnp.float32),  # pad2
                pltpu.VMEM((D2 * H2, K2), jnp.bfloat16),                     # col2
            ],
        ),
        compiler_params=pltpu.CompilerParams(
            dimension_semantics=("parallel",),
            vmem_limit_bytes=32 * 1024 * 1024,
        ),
    )(xp, params["g1"], params["b1"], w1b,
      params["g2"], params["b2"], w2b)

    out = out.reshape(N, D2, H2, W2, Cout)
    return jnp.transpose(out, (0, 4, 1, 2, 3))            # -> NCDHW


# ----------------------------------------------------------------------------
# Pure-JAX reference (for correctness check)
# ----------------------------------------------------------------------------
def _ref_groupnorm(x, gamma, beta, G, eps=1e-5):
    N, C, D, H, W = x.shape
    xg = x.reshape(N, G, -1)
    mean = xg.mean(axis=2, keepdims=True)
    var = xg.var(axis=2, keepdims=True)
    xn = ((xg - mean) / jnp.sqrt(var + eps)).reshape(N, C, D, H, W)
    return xn * gamma.reshape(1, C, 1, 1, 1) + beta.reshape(1, C, 1, 1, 1)


def _ref_conv3d(x, w):
    return lax.conv_general_dilated(
        x, w, window_strides=(1, 1, 1), padding=((1, 1), (1, 1), (1, 1)),
        dimension_numbers=("NCDHW", "OIDHW", "NCDHW"),
        precision=lax.Precision.HIGHEST)


def ref_forward(x, p):
    N, C, D, H, W = x.shape
    x = x.reshape(N, C, D // 2, 2, H // 2, 2, W // 2, 2).max(axis=(3, 5, 7))
    h = jnp.maximum(_ref_conv3d(_ref_groupnorm(x, p["g1"][0], p["b1"][0],
                                               p["groups1"]), p["w1"]), 0.0)
    return jnp.maximum(_ref_conv3d(_ref_groupnorm(h, p["g2"][0], p["b2"][0],
                                                  p["groups2"]), p["w2"]), 0.0)


if __name__ == "__main__":
    # EncoderBlock(in_channels=4, out_channels=16) with default config.
    N, Cin, D, H, W = 2, 4, 8, 16, 16
    Cout = 16
    Cmid = max(Cout // 2, Cin)          # encoder DoubleConv rule -> 8
    groups1 = 1 if Cin < 8 else 8       # create_conv GroupNorm rule -> 1
    groups2 = 1 if Cmid < 8 else 8      # -> 8

    key = jax.random.PRNGKey(0)
    kx, k1, k2, k3, k4, k5, k6 = jax.random.split(key, 7)

    x = jax.random.normal(kx, (N, Cin, D, H, W), jnp.float32)
    w1 = 0.1 * jax.random.normal(k1, (Cmid, Cin, 3, 3, 3), jnp.float32)   # OIDHW
    w2 = 0.1 * jax.random.normal(k2, (Cout, Cmid, 3, 3, 3), jnp.float32)
    g1 = 1.0 + 0.1 * jax.random.normal(k3, (1, Cin), jnp.float32)
    b1 = 0.1 * jax.random.normal(k4, (1, Cin), jnp.float32)
    g2 = 1.0 + 0.1 * jax.random.normal(k5, (1, Cmid), jnp.float32)
    b2 = 0.1 * jax.random.normal(k6, (1, Cmid), jnp.float32)

    params = dict(
        g1=g1, b1=b1, g2=g2, b2=b2, w1=w1, w2=w2,
        groups1=groups1, groups2=groups2,
    )

    out = jax.block_until_ready(encoder_block_forward(x, params))
    ref = jax.block_until_ready(ref_forward(x, params))

    assert out.shape == (N, Cout, D // 2, H // 2, W // 2), out.shape
    # bf16 matmul operands (f32 accumulation) vs. an all-f32 reference.
    err = float(jnp.max(jnp.abs(out - ref)))
    assert jnp.allclose(out, ref, atol=2e-2, rtol=2e-2), err

    print("KERNEL_OK")
</pallas_src>

<mosaic_0001>
module attributes {stable_mosaic.version = 11 : i64} {
  func.func @_fused_encoder_kernel(%arg0: i32, %arg1: memref<1x8x4x8x32xf32, #tpu.memory_space<vmem>>, %arg2: memref<1x4xf32, #tpu.memory_space<vmem>>, %arg3: memref<1x4xf32, #tpu.memory_space<vmem>>, %arg4: memref<360x64xbf16, #tpu.memory_space<vmem>>, %arg5: memref<1x8xf32, #tpu.memory_space<vmem>>, %arg6: memref<1x8xf32, #tpu.memory_space<vmem>>, %arg7: memref<720x128xbf16, #tpu.memory_space<vmem>>, %arg8: memref<1x32x128xf32, #tpu.memory_space<vmem>>, %arg9: memref<6x10x40xf32, #tpu.memory_space<vmem>>, %arg10: memref<32x360xbf16, #tpu.memory_space<vmem>>, %arg11: memref<6x10x80xf32, #tpu.memory_space<vmem>>, %arg12: memref<32x720xbf16, #tpu.memory_space<vmem>>) attributes {dimension_semantics = [#tpu.dimension_semantics<parallel>], iteration_bounds = array<i64: 2>, scalar_prefetch = 0 : i64, scratch_operands = 4 : i64, tpu.core_type = #tpu.core_type<tc>, window_params = [{transform_indices = @transform_0, window_bounds = array<i64: 1, 8, 4, 8, 32>}, {pipeline_mode = #tpu.pipeline_mode<synchronous>, transform_indices = @transform_1, window_bounds = array<i64: 1, 4>}, {pipeline_mode = #tpu.pipeline_mode<synchronous>, transform_indices = @transform_2, window_bounds = array<i64: 1, 4>}, {pipeline_mode = #tpu.pipeline_mode<synchronous>, transform_indices = @transform_3, window_bounds = array<i64: 360, 64>}, {pipeline_mode = #tpu.pipeline_mode<synchronous>, transform_indices = @transform_4, window_bounds = array<i64: 1, 8>}, {pipeline_mode = #tpu.pipeline_mode<synchronous>, transform_indices = @transform_5, window_bounds = array<i64: 1, 8>}, {pipeline_mode = #tpu.pipeline_mode<synchronous>, transform_indices = @transform_6, window_bounds = array<i64: 720, 128>}, {transform_indices = @transform_7, window_bounds = array<i64: 1, 32, 128>}]} {
    %c0 = arith.constant 0 : index
    %c0_0 = arith.constant 0 : index
    %c0_1 = arith.constant 0 : index
    %c0_2 = arith.constant 0 : index
    %c0_3 = arith.constant 0 : index
    %0 = vector.load %arg1[%c0, %c0_0, %c0_1, %c0_2, %c0_3] : memref<1x8x4x8x32xf32, #tpu.memory_space<vmem>>, vector<1x1x4x8x32xf32>
    %1 = vector.shape_cast %0 : vector<1x1x4x8x32xf32> to vector<4x8x32xf32>
    %c0_4 = arith.constant 0 : index
    %c1 = arith.constant 1 : index
    %c0_5 = arith.constant 0 : index
    %c0_6 = arith.constant 0 : index
    %c0_7 = arith.constant 0 : index
    %2 = vector.load %arg1[%c0_4, %c1, %c0_5, %c0_6, %c0_7] : memref<1x8x4x8x32xf32, #tpu.memory_space<vmem>>, vector<1x1x4x8x32xf32>
    %3 = vector.shape_cast %2 : vector<1x1x4x8x32xf32> to vector<4x8x32xf32>
    %4 = arith.maximumf %1, %3 : vector<4x8x32xf32>
    %c0_8 = arith.constant 0 : index
    %c2 = arith.constant 2 : index
    %c0_9 = arith.constant 0 : index
    %c0_10 = arith.constant 0 : index
    %c0_11 = arith.constant 0 : index
    %5 = vector.load %arg1[%c0_8, %c2, %c0_9, %c0_10, %c0_11] : memref<1x8x4x8x32xf32, #tpu.memory_space<vmem>>, vector<1x1x4x8x32xf32>
    %6 = vector.shape_cast %5 : vector<1x1x4x8x32xf32> to vector<4x8x32xf32>
    %7 = arith.maximumf %4, %6 : vector<4x8x32xf32>
    %c0_12 = arith.constant 0 : index
    %c3 = arith.constant 3 : index
    %c0_13 = arith.constant 0 : index
    %c0_14 = arith.constant 0 : index
    %c0_15 = arith.constant 0 : index
    %8 = vector.load %arg1[%c0_12, %c3, %c0_13, %c0_14, %c0_15] : memref<1x8x4x8x32xf32, #tpu.memory_space<vmem>>, vector<1x1x4x8x32xf32>
    %9 = vector.shape_cast %8 : vector<1x1x4x8x32xf32> to vector<4x8x32xf32>
    %10 = arith.maximumf %7, %9 : vector<4x8x32xf32>
    %c0_16 = arith.constant 0 : index
    %c4 = arith.constant 4 : index
    %c0_17 = arith.constant 0 : index
    %c0_18 = arith.constant 0 : index
    %c0_19 = arith.constant 0 : index
    %11 = vector.load %arg1[%c0_16, %c4, %c0_17, %c0_18, %c0_19] : memref<1x8x4x8x32xf32, #tpu.memory_space<vmem>>, vector<1x1x4x8x32xf32>
    %12 = vector.shape_cast %11 : vector<1x1x4x8x32xf32> to vector<4x8x32xf32>
    %13 = arith.maximumf %10, %12 : vector<4x8x32xf32>
    %c0_20 = arith.constant 0 : index
    %c5 = arith.constant 5 : index
    %c0_21 = arith.constant 0 : index
    %c0_22 = arith.constant 0 : index
    %c0_23 = arith.constant 0 : index
    %14 = vector.load %arg1[%c0_20, %c5, %c0_21, %c0_22, %c0_23] : memref<1x8x4x8x32xf32, #tpu.memory_space<vmem>>, vector<1x1x4x8x32xf32>
    %15 = vector.shape_cast %14 : vector<1x1x4x8x32xf32> to vector<4x8x32xf32>
    %16 = arith.maximumf %13, %15 : vector<4x8x32xf32>
    %c0_24 = arith.constant 0 : index
    %c6 = arith.constant 6 : index
    %c0_25 = arith.constant 0 : index
    %c0_26 = arith.constant 0 : index
    %c0_27 = arith.constant 0 : index
    %17 = vector.load %arg1[%c0_24, %c6, %c0_25, %c0_26, %c0_27] : memref<1x8x4x8x32xf32, #tpu.memory_space<vmem>>, vector<1x1x4x8x32xf32>
    %18 = vector.shape_cast %17 : vector<1x1x4x8x32xf32> to vector<4x8x32xf32>
    %19 = arith.maximumf %16, %18 : vector<4x8x32xf32>
    %c0_28 = arith.constant 0 : index
    %c7 = arith.constant 7 : index
    %c0_29 = arith.constant 0 : index
    %c0_30 = arith.constant 0 : index
    %c0_31 = arith.constant 0 : index
    %20 = vector.load %arg1[%c0_28, %c7, %c0_29, %c0_30, %c0_31] : memref<1x8x4x8x32xf32, #tpu.memory_space<vmem>>, vector<1x1x4x8x32xf32>
    %21 = vector.shape_cast %20 : vector<1x1x4x8x32xf32> to vector<4x8x32xf32>
    %22 = arith.maximumf %19, %21 : vector<4x8x32xf32>
    %23 = vector.shape_cast %22 : vector<4x8x32xf32> to vector<32x32xf32>
    %cst = arith.constant 0.000000e+00 : f32
    %24 = vector.broadcast %cst : f32 to vector<1x10x40xf32>
    %c0_32 = arith.constant 0 : index
    %c0_33 = arith.constant 0 : index
    %c0_34 = arith.constant 0 : index
    %25 = vector.load %arg9[%c0_32, %c0_33, %c0_34] : memref<6x10x40xf32, #tpu.memory_space<vmem>>, vector<1x10x40xf32>
    tpu.vector_store %arg9[%c0_32, %c0_33, %c0_34], %24 {strides = array<i32>} : memref<6x10x40xf32, #tpu.memory_space<vmem>>, vector<1x10x40xf32>,
    %cst_35 = arith.constant 0.000000e+00 : f32
    %26 = vector.broadcast %cst_35 : f32 to vector<1x10x40xf32>
    %c5_36 = arith.constant 5 : index
    %c0_37 = arith.constant 0 : index
    %c0_38 = arith.constant 0 : index
    %27 = vector.load %arg9[%c5_36, %c0_37, %c0_38] : memref<6x10x40xf32, #tpu.memory_space<vmem>>, vector<1x10x40xf32>
    tpu.vector_store %arg9[%c5_36, %c0_37, %c0_38], %26 {strides = array<i32>} : memref<6x10x40xf32, #tpu.memory_space<vmem>>, vector<1x10x40xf32>,
    %cst_39 = arith.constant 0.000000e+00 : f32
    %28 = vector.broadcast %cst_39 : f32 to vector<6x1x40xf32>
    %c0_40 = arith.constant 0 : index
    %c0_41 = arith.constant 0 : index
    %c0_42 = arith.constant 0 : index
    %29 = vector.load %arg9[%c0_40, %c0_41, %c0_42] : memref<6x10x40xf32, #tpu.memory_space<vmem>>, vector<6x1x40xf32>
    tpu.vector_store %arg9[%c0_40, %c0_41, %c0_42], %28 {strides = array<i32>} : memref<6x10x40xf32, #tpu.memory_space<vmem>>, vector<6x1x40xf32>,
    %cst_43 = arith.constant 0.000000e+00 : f32
    %30 = vector.broadcast %cst_43 : f32 to vector<6x1x40xf32>
    %c0_44 = arith.constant 0 : index
    %c9 = arith.constant 9 : index
    %c0_45 = arith.constant 0 : index
    %31 = vector.load %arg9[%c0_44, %c9, %c0_45] : memref<6x10x40xf32, #tpu.memory_space<vmem>>, vector<6x1x40xf32>
    tpu.vector_store %arg9[%c0_44, %c9, %c0_45], %30 {strides = array<i32>} : memref<6x10x40xf32, #tpu.memory_space<vmem>>, vector<6x1x40xf32>,
    %cst_46 = arith.constant 0.000000e+00 : f32
    %32 = vector.broadcast %cst_46 : f32 to vector<6x10x4xf32>
    %c0_47 = arith.constant 0 : index
    %c0_48 = arith.constant 0 : index
    %c0_49 = arith.constant 0 : index
    %33 = vector.load %arg9[%c0_47, %c0_48, %c0_49] : memref<6x10x40xf32, #tpu.memory_space<vmem>>, vector<6x10x4xf32>
    tpu.vector_store %arg9[%c0_47, %c0_48, %c0_49], %32 {strides = array<i32>} : memref<6x10x40xf32, #tpu.memory_space<vmem>>, vector<6x10x4xf32>,
    %cst_50 = arith.constant 0.000000e+00 : f32
    %34 = vector.broadcast %cst_50 : f32 to vector<6x10x4xf32>
    %c0_51 = arith.constant 0 : index
    %c0_52 = arith.constant 0 : index
    %c36 = arith.constant 36 : index
    %35 = vector.load %arg9[%c0_51, %c0_52, %c36] : memref<6x10x40xf32, #tpu.memory_space<vmem>>, vector<6x10x4xf32>
    tpu.vector_store %arg9[%c0_51, %c0_52, %c36], %34 {strides = array<i32>} : memref<6x10x40xf32, #tpu.memory_space<vmem>>, vector<6x10x4xf32>,
    %c0_53 = arith.constant 0 : index
    %c0_54 = arith.constant 0 : index
    %36 = vector.load %arg2[%c0_53, %c0_54] : memref<1x4xf32, #tpu.memory_space<vmem>>, vector<1x4xf32>
    %c0_55 = arith.constant 0 : index
    %c0_56 = arith.constant 0 : index
    %37 = vector.load %arg3[%c0_55, %c0_56] : memref<1x4xf32, #tpu.memory_space<vmem>>, vector<1x4xf32>
    %cst_57 = arith.constant 0.000000e+00 : f32
    %38 = vector.broadcast %cst_57 : f32 to vector<1x4xf32>
    %39 = vector.extract_strided_slice %23 {offsets = [0, 0], sizes = [32, 4], strides = [1, 1]} : vector<32x32xf32> to vector<32x4xf32>
    %cst_58 = arith.constant dense<0.000000e+00> : vector<4xf32>
    %40 = vector.multi_reduction <add>, %39, %cst_58 [0] : vector<32x4xf32> to vector<4xf32>
    %41 = vector.shape_cast %40 : vector<4xf32> to vector<1x4xf32>
    %42 = arith.addf %38, %41 : vector<1x4xf32>
    %43 = vector.extract_strided_slice %23 {offsets = [0, 4], sizes = [32, 4], strides = [1, 1]} : vector<32x32xf32> to vector<32x4xf32>
    %cst_59 = arith.constant dense<0.000000e+00> : vector<4xf32>
    %44 = vector.multi_reduction <add>, %43, %cst_59 [0] : vector<32x4xf32> to vector<4xf32>
    %45 = vector.shape_cast %44 : vector<4xf32> to vector<1x4xf32>
    %46 = arith.addf %42, %45 : vector<1x4xf32>
    %47 = vector.extract_strided_slice %23 {offsets = [0, 8], sizes = [32, 4], strides = [1, 1]} : vector<32x32xf32> to vector<32x4xf32>
    %cst_60 = arith.constant dense<0.000000e+00> : vector<4xf32>
    %48 = vector.multi_reduction <add>, %47, %cst_60 [0] : vector<32x4xf32> to vector<4xf32>
    %49 = vector.shape_cast %48 : vector<4xf32> to vector<1x4xf32>
    %50 = arith.addf %46, %49 : vector<1x4xf32>
    %51 = vector.extract_strided_slice %23 {offsets = [0, 12], sizes = [32, 4], strides = [1, 1]} : vector<32x32xf32> to vector<32x4xf32>
    %cst_61 = arith.constant dense<0.000000e+00> : vector<4xf32>
    %52 = vector.multi_reduction <add>, %51, %cst_61 [0] : vector<32x4xf32> to vector<4xf32>
    %53 = vector.shape_cast %52 : vector<4xf32> to vector<1x4xf32>
    %54 = arith.addf %50, %53 : vector<1x4xf32>
    %55 = vector.extract_strided_slice %23 {offsets = [0, 16], sizes = [32, 4], strides = [1, 1]} : vector<32x32xf32> to vector<32x4xf32>
    %cst_62 = arith.constant dense<0.000000e+00> : vector<4xf32>
    %56 = vector.multi_reduction <add>, %55, %cst_62 [0] : vector<32x4xf32> to vector<4xf32>
    %57 = vector.shape_cast %56 : vector<4xf32> to vector<1x4xf32>
    %58 = arith.addf %54, %57 : vector<1x4xf32>
    %59 = vector.extract_strided_slice %23 {offsets = [0, 20], sizes = [32, 4], strides = [1, 1]} : vector<32x32xf32> to vector<32x4xf32>
    %cst_63 = arith.constant dense<0.000000e+00> : vector<4xf32>
    %60 = vector.multi_reduction <add>, %59, %cst_63 [0] : vector<32x4xf32> to vector<4xf32>
    %61 = vector.shape_cast %60 : vector<4xf32> to vector<1x4xf32>
    %62 = arith.addf %58, %61 : vector<1x4xf32>
    %63 = vector.extract_strided_slice %23 {offsets = [0, 24], sizes = [32, 4], strides = [1, 1]} : vector<32x32xf32> to vector<32x4xf32>
    %cst_64 = arith.constant dense<0.000000e+00> : vector<4xf32>
    %64 = vector.multi_reduction <add>, %63, %cst_64 [0] : vector<32x4xf32> to vector<4xf32>
    %65 = vector.shape_cast %64 : vector<4xf32> to vector<1x4xf32>
    %66 = arith.addf %62, %65 : vector<1x4xf32>
    %67 = vector.extract_strided_slice %23 {offsets = [0, 28], sizes = [32, 4], strides = [1, 1]} : vector<32x32xf32> to vector<32x4xf32>
    %cst_65 = arith.constant dense<0.000000e+00> : vector<4xf32>
    %68 = vector.multi_reduction <add>, %67, %cst_65 [0] : vector<32x4xf32> to vector<4xf32>
    %69 = vector.shape_cast %68 : vector<4xf32> to vector<1x4xf32>
    %70 = arith.addf %66, %69 : vector<1x4xf32>
    %cst_66 = arith.constant dense<0.000000e+00> : vector<1xf32>
    %71 = vector.multi_reduction <add>, %70, %cst_66 [1] : vector<1x4xf32> to vector<1xf32>
    %72 = vector.shape_cast %71 : vector<1xf32> to vector<1x1xf32>
    %73 = vector.shape_cast %72 : vector<1x1xf32> to vector<1x1xf32>
    %74 = vector.broadcast %73 : vector<1x1xf32> to vector<1x4xf32>
    %cst_67 = arith.constant 1.024000e+03 : f32
    %75 = vector.broadcast %cst_67 : f32 to vector<1x4xf32>
    %76 = arith.divf %74, %75 : vector<1x4xf32>
    %cst_68 = arith.constant 0.000000e+00 : f32
    %77 = vector.broadcast %cst_68 : f32 to vector<1x4xf32>
    %78 = vector.extract_strided_slice %23 {offsets = [0, 0], sizes = [32, 4], strides = [1, 1]} : vector<32x32xf32> to vector<32x4xf32>
    %79 = vector.broadcast %76 : vector<1x4xf32> to vector<32x4xf32>
    %80 = arith.subf %78, %79 : vector<32x4xf32>
    %81 = arith.mulf %80, %80 : vector<32x4xf32>
    %cst_69 = arith.constant dense<0.000000e+00> : vector<4xf32>
    %82 = vector.multi_reduction <add>, %81, %cst_69 [0] : vector<32x4xf32> to vector<4xf32>
    %83 = vector.shape_cast %82 : vector<4xf32> to vector<1x4xf32>
    %84 = arith.addf %77, %83 : vector<1x4xf32>
    %85 = vector.extract_strided_slice %23 {offsets = [0, 4], sizes = [32, 4], strides = [1, 1]} : vector<32x32xf32> to vector<32x4xf32>
    %86 = vector.broadcast %76 : vector<1x4xf32> to vector<32x4xf32>
    %87 = arith.subf %85, %86 : vector<32x4xf32>
    %88 = arith.mulf %87, %87 : vector<32x4xf32>
    %cst_70 = arith.constant dense<0.000000e+00> : vector<4xf32>
    %89 = vector.multi_reduction <add>, %88, %cst_70 [0] : vector<32x4xf32> to vector<4xf32>
    %90 = vector.shape_cast %89 : vector<4xf32> to vector<1x4xf32>
    %91 = arith.addf %84, %90 : vector<1x4xf32>
    %92 = vector.extract_strided_slice %23 {offsets = [0, 8], sizes = [32, 4], strides = [1, 1]} : vector<32x32xf32> to vector<32x4xf32>
    %93 = vector.broadcast %76 : vector<1x4xf32> to vector<32x4xf32>
    %94 = arith.subf %92, %93 : vector<32x4xf32>
    %95 = arith.mulf %94, %94 : vector<32x4xf32>
    %cst_71 = arith.constant dense<0.000000e+00> : vector<4xf32>
    %96 = vector.multi_reduction <add>, %95, %cst_71 [0] : vector<32x4xf32> to vector<4xf32>
    %97 = vector.shape_cast %96 : vector<4xf32> to vector<1x4xf32>
    %98 = arith.addf %91, %97 : vector<1x4xf32>
    %99 = vector.extract_strided_slice %23 {offsets = [0, 12], sizes = [32, 4], strides = [1, 1]} : vector<32x32xf32> to vector<32x4xf32>
    %100 = vector.broadcast %76 : vector<1x4xf32> to vector<32x4xf32>
    %101 = arith.subf %99, %100 : vector<32x4xf32>
    %102 = arith.mulf %101, %101 : vector<32x4xf32>
    %cst_72 = arith.constant dense<0.000000e+00> : vector<4xf32>
    %103 = vector.multi_reduction <add>, %102, %cst_72 [0] : vector<32x4xf32> to vector<4xf32>
    %104 = vector.shape_cast %103 : vector<4xf32> to vector<1x4xf32>
    %105 = arith.addf %98, %104 : vector<1x4xf32>
    %106 = vector.extract_strided_slice %23 {offsets = [0, 16], sizes = [32, 4], strides = [1, 1]} : vector<32x32xf32> to vector<32x4xf32>
    %107 = vector.broadcast %76 : vector<1x4xf32> to vector<32x4xf32>
    %108 = arith.subf %106, %107 : vector<32x4xf32>
    %109 = arith.mulf %108, %108 : vector<32x4xf32>
    %cst_73 = arith.constant dense<0.000000e+00> : vector<4xf32>
    %110 = vector.multi_reduction <add>, %109, %cst_73 [0] : vector<32x4xf32> to vector<4xf32>
    %111 = vector.shape_cast %110 : vector<4xf32> to vector<1x4xf32>
    %112 = arith.addf %105, %111 : vector<1x4xf32>
    %113 = vector.extract_strided_slice %23 {offsets = [0, 20], sizes = [32, 4], strides = [1, 1]} : vector<32x32xf32> to vector<32x4xf32>
    %114 = vector.broadcast %76 : vector<1x4xf32> to vector<32x4xf32>
    %115 = arith.subf %113, %114 : vector<32x4xf32>
    %116 = arith.mulf %115, %115 : vector<32x4xf32>
    %cst_74 = arith.constant dense<0.000000e+00> : vector<4xf32>
    %117 = vector.multi_reduction <add>, %116, %cst_74 [0] : vector<32x4xf32> to vector<4xf32>
    %118 = vector.shape_cast %117 : vector<4xf32> to vector<1x4xf32>
    %119 = arith.addf %112, %118 : vector<1x4xf32>
    %120 = vector.extract_strided_slice %23 {offsets = [0, 24], sizes = [32, 4], strides = [1, 1]} : vector<32x32xf32> to vector<32x4xf32>
    %121 = vector.broadcast %76 : vector<1x4xf32> to vector<32x4xf32>
    %122 = arith.subf %120, %121 : vector<32x4xf32>
    %123 = arith.mulf %122, %122 : vector<32x4xf32>
    %cst_75 = arith.constant dense<0.000000e+00> : vector<4xf32>
    %124 = vector.multi_reduction <add>, %123, %cst_75 [0] : vector<32x4xf32> to vector<4xf32>
    %125 = vector.shape_cast %124 : vector<4xf32> to vector<1x4xf32>
    %126 = arith.addf %119, %125 : vector<1x4xf32>
    %127 = vector.extract_strided_slice %23 {offsets = [0, 28], sizes = [32, 4], strides = [1, 1]} : vector<32x32xf32> to vector<32x4xf32>
    %128 = vector.broadcast %76 : vector<1x4xf32> to vector<32x4xf32>
    %129 = arith.subf %127, %128 : vector<32x4xf32>
    %130 = arith.mulf %129, %129 : vector<32x4xf32>
    %cst_76 = arith.constant dense<0.000000e+00> : vector<4xf32>
    %131 = vector.multi_reduction <add>, %130, %cst_76 [0] : vector<32x4xf32> to vector<4xf32>
    %132 = vector.shape_cast %131 : vector<4xf32> to vector<1x4xf32>
    %133 = arith.addf %126, %132 : vector<1x4xf32>
    %cst_77 = arith.constant dense<0.000000e+00> : vector<1xf32>
    %134 = vector.multi_reduction <add>, %133, %cst_77 [1] : vector<1x4xf32> to vector<1xf32>
    %135 = vector.shape_cast %134 : vector<1xf32> to vector<1x1xf32>
    %136 = vector.shape_cast %135 : vector<1x1xf32> to vector<1x1xf32>
    %137 = vector.broadcast %136 : vector<1x1xf32> to vector<1x4xf32>
    %cst_78 = arith.constant 1.024000e+03 : f32
    %138 = vector.broadcast %cst_78 : f32 to vector<1x4xf32>
    %139 = arith.divf %137, %138 : vector<1x4xf32>
    %cst_79 = arith.constant 9.99999974E-6 : f32
    %140 = vector.broadcast %cst_79 : f32 to vector<1x4xf32>
    %141 = arith.addf %139, %140 : vector<1x4xf32>
    %142 = math.rsqrt %141 : vector<1x4xf32>
    %143 = arith.mulf %36, %142 : vector<1x4xf32>
    %144 = arith.mulf %76, %143 : vector<1x4xf32>
    %145 = arith.subf %37, %144 : vector<1x4xf32>
    %146 = vector.extract_strided_slice %23 {offsets = [0, 0], sizes = [32, 4], strides = [1, 1]} : vector<32x32xf32> to vector<32x4xf32>
    %147 = vector.broadcast %143 : vector<1x4xf32> to vector<32x4xf32>
    %148 = arith.mulf %146, %147 : vector<32x4xf32>
    %149 = vector.broadcast %145 : vector<1x4xf32> to vector<32x4xf32>
    %150 = arith.addf %148, %149 : vector<32x4xf32>
    %151 = vector.shape_cast %150 : vector<32x4xf32> to vector<4x8x4xf32>
    %c1_80 = arith.constant 1 : index
    %c1_81 = arith.constant 1 : index
    %c4_82 = arith.constant 4 : index
    %152 = vector.load %arg9[%c1_80, %c1_81, %c4_82] : memref<6x10x40xf32, #tpu.memory_space<vmem>>, vector<4x8x4xf32>
    tpu.vector_store %arg9[%c1_80, %c1_81, %c4_82], %151 {strides = array<i32>} : memref<6x10x40xf32, #tpu.memory_space<vmem>>, vector<4x8x4xf32>,
    %153 = vector.extract_strided_slice %23 {offsets = [0, 4], sizes = [32, 4], strides = [1, 1]} : vector<32x32xf32> to vector<32x4xf32>
    %154 = vector.broadcast %143 : vector<1x4xf32> to vector<32x4xf32>
    %155 = arith.mulf %153, %154 : vector<32x4xf32>
    %156 = vector.broadcast %145 : vector<1x4xf32> to vector<32x4xf32>
    %157 = arith.addf %155, %156 : vector<32x4xf32>
    %158 = vector.shape_cast %157 : vector<32x4xf32> to vector<4x8x4xf32>
    %c1_83 = arith.constant 1 : index
    %c1_84 = arith.constant 1 : index
    %c8 = arith.constant 8 : index
    %159 = vector.load %arg9[%c1_83, %c1_84, %c8] : memref<6x10x40xf32, #tpu.memory_space<vmem>>, vector<4x8x4xf32>
    tpu.vector_store %arg9[%c1_83, %c1_84, %c8], %158 {strides = array<i32>} : memref<6x10x40xf32, #tpu.memory_space<vmem>>, vector<4x8x4xf32>,
    %160 = vector.extract_strided_slice %23 {offsets = [0, 8], sizes = [32, 4], strides = [1, 1]} : vector<32x32xf32> to vector<32x4xf32>
    %161 = vector.broadcast %143 : vector<1x4xf32> to vector<32x4xf32>
    %162 = arith.mulf %160, %161 : vector<32x4xf32>
    %163 = vector.broadcast %145 : vector<1x4xf32> to vector<32x4xf32>
    %164 = arith.addf %162, %163 : vector<32x4xf32>
    %165 = vector.shape_cast %164 : vector<32x4xf32> to vector<4x8x4xf32>
    %c1_85 = arith.constant 1 : index
    %c1_86 = arith.constant 1 : index
    %c12 = arith.constant 12 : index
    %166 = vector.load %arg9[%c1_85, %c1_86, %c12] : memref<6x10x40xf32, #tpu.memory_space<vmem>>, vector<4x8x4xf32>
    tpu.vector_store %arg9[%c1_85, %c1_86, %c12], %165 {strides = array<i32>} : memref<6x10x40xf32, #tpu.memory_space<vmem>>, vector<4x8x4xf32>,
    %167 = vector.extract_strided_slice %23 {offsets = [0, 12], sizes = [32, 4], strides = [1, 1]} : vector<32x32xf32> to vector<32x4xf32>
    %168 = vector.broadcast %143 : vector<1x4xf32> to vector<32x4xf32>
    %169 = arith.mulf %167, %168 : vector<32x4xf32>
    %170 = vector.broadcast %145 : vector<1x4xf32> to vector<32x4xf32>
    %171 = arith.addf %169, %170 : vector<32x4xf32>
    %172 = vector.shape_cast %171 : vector<32x4xf32> to vector<4x8x4xf32>
    %c1_87 = arith.constant 1 : index
    %c1_88 = arith.constant 1 : index
    %c16 = arith.constant 16 : index
    %173 = vector.load %arg9[%c1_87, %c1_88, %c16] : memref<6x10x40xf32, #tpu.memory_space<vmem>>, vector<4x8x4xf32>
    tpu.vector_store %arg9[%c1_87, %c1_88, %c16], %172 {strides = array<i32>} : memref<6x10x40xf32, #tpu.memory_space<vmem>>, vector<4x8x4xf32>,
    %174 = vector.extract_strided_slice %23 {offsets = [0, 16], sizes = [32, 4], strides = [1, 1]} : vector<32x32xf32> to vector<32x4xf32>
    %175 = vector.broadcast %143 : vector<1x4xf32> to vector<32x4xf32>
    %176 = arith.mulf %174, %175 : vector<32x4xf32>
    %177 = vector.broadcast %145 : vector<1x4xf32> to vector<32x4xf32>
    %178 = arith.addf %176, %177 : vector<32x4xf32>
    %179 = vector.shape_cast %178 : vector<32x4xf32> to vector<4x8x4xf32>
    %c1_89 = arith.constant 1 : index
    %c1_90 = arith.constant 1 : index
    %c20 = arith.constant 20 : index
    %180 = vector.load %arg9[%c1_89, %c1_90, %c20] : memref<6x10x40xf32, #tpu.memory_space<vmem>>, vector<4x8x4xf32>
    tpu.vector_store %arg9[%c1_89, %c1_90, %c20], %179 {strides = array<i32>} : memref<6x10x40xf32, #tpu.memory_space<vmem>>, vector<4x8x4xf32>,
    %181 = vector.extract_strided_slice %23 {offsets = [0, 20], sizes = [32, 4], strides = [1, 1]} : vector<32x32xf32> to vector<32x4xf32>
    %182 = vector.broadcast %143 : vector<1x4xf32> to vector<32x4xf32>
    %183 = arith.mulf %181, %182 : vector<32x4xf32>
    %184 = vector.broadcast %145 : vector<1x4xf32> to vector<32x4xf32>
    %185 = arith.addf %183, %184 : vector<32x4xf32>
    %186 = vector.shape_cast %185 : vector<32x4xf32> to vector<4x8x4xf32>
    %c1_91 = arith.constant 1 : index
    %c1_92 = arith.constant 1 : index
    %c24 = arith.constant 24 : index
    %187 = vector.load %arg9[%c1_91, %c1_92, %c24] : memref<6x10x40xf32, #tpu.memory_space<vmem>>, vector<4x8x4xf32>
    tpu.vector_store %arg9[%c1_91, %c1_92, %c24], %186 {strides = array<i32>} : memref<6x10x40xf32, #tpu.memory_space<vmem>>, vector<4x8x4xf32>,
    %188 = vector.extract_strided_slice %23 {offsets = [0, 24], sizes = [32, 4], strides = [1, 1]} : vector<32x32xf32> to vector<32x4xf32>
    %189 = vector.broadcast %143 : vector<1x4xf32> to vector<32x4xf32>
    %190 = arith.mulf %188, %189 : vector<32x4xf32>
    %191 = vector.broadcast %145 : vector<1x4xf32> to vector<32x4xf32>
    %192 = arith.addf %190, %191 : vector<32x4xf32>
    %193 = vector.shape_cast %192 : vector<32x4xf32> to vector<4x8x4xf32>
    %c1_93 = arith.constant 1 : index
    %c1_94 = arith.constant 1 : index
    %c28 = arith.constant 28 : index
    %194 = vector.load %arg9[%c1_93, %c1_94, %c28] : memref<6x10x40xf32, #tpu.memory_space<vmem>>, vector<4x8x4xf32>
    tpu.vector_store %arg9[%c1_93, %c1_94, %c28], %193 {strides = array<i32>} : memref<6x10x40xf32, #tpu.memory_space<vmem>>, vector<4x8x4xf32>,
    %195 = vector.extract_strided_slice %23 {offsets = [0, 28], sizes = [32, 4], strides = [1, 1]} : vector<32x32xf32> to vector<32x4xf32>
    %196 = vector.broadcast %143 : vector<1x4xf32> to vector<32x4xf32>
    %197 = arith.mulf %195, %196 : vector<32x4xf32>
    %198 = vector.broadcast %145 : vector<1x4xf32> to vector<32x4xf32>
    %199 = arith.addf %197, %198 : vector<32x4xf32>
    %200 = vector.shape_cast %199 : vector<32x4xf32> to vector<4x8x4xf32>
    %c1_95 = arith.constant 1 : index
    %c1_96 = arith.constant 1 : index
    %c32 = arith.constant 32 : index
    %201 = vector.load %arg9[%c1_95, %c1_96, %c32] : memref<6x10x40xf32, #tpu.memory_space<vmem>>, vector<4x8x4xf32>
    tpu.vector_store %arg9[%c1_95, %c1_96, %c32], %200 {strides = array<i32>} : memref<6x10x40xf32, #tpu.memory_space<vmem>>, vector<4x8x4xf32>,
    %c0_97 = arith.constant 0 : index
    %c0_98 = arith.constant 0 : index
    %c0_99 = arith.constant 0 : index
    %202 = vector.load %arg9[%c0_97, %c0_98, %c0_99] : memref<6x10x40xf32, #tpu.memory_space<vmem>>, vector<4x8x40xf32>
    %203 = vector.shape_cast %202 : vector<4x8x40xf32> to vector<32x40xf32>
    %204 = arith.truncf %203 : vector<32x40xf32> to vector<32x40xbf16>
    %c0_100 = arith.constant 0 : index
    %c0_101 = arith.constant 0 : index
    %205 = vector.load %arg10[%c0_100, %c0_101] : memref<32x360xbf16, #tpu.memory_space<vmem>>, vector<32x40xbf16>
    tpu.vector_store %arg10[%c0_100, %c0_101], %204 {strides = array<i32>} : memref<32x360xbf16, #tpu.memory_space<vmem>>, vector<32x40xbf16>,
    %c0_102 = arith.constant 0 : index
    %c1_103 = arith.constant 1 : index
    %c0_104 = arith.constant 0 : index
    %206 = vector.load %arg9[%c0_102, %c1_103, %c0_104] : memref<6x10x40xf32, #tpu.memory_space<vmem>>, vector<4x8x40xf32>
    %207 = vector.shape_cast %206 : vector<4x8x40xf32> to vector<32x40xf32>
    %208 = arith.truncf %207 : vector<32x40xf32> to vector<32x40xbf16>
    %c0_105 = arith.constant 0 : index
    %c40 = arith.constant 40 : index
    %209 = vector.load %arg10[%c0_105, %c40] : memref<32x360xbf16, #tpu.memory_space<vmem>>, vector<32x40xbf16>
    tpu.vector_store %arg10[%c0_105, %c40], %208 {strides = array<i32>} : memref<32x360xbf16, #tpu.memory_space<vmem>>, vector<32x40xbf16>,
    %c0_106 = arith.constant 0 : index
    %c2_107 = arith.constant 2 : index
    %c0_108 = arith.constant 0 : index
    %210 = vector.load %arg9[%c0_106, %c2_107, %c0_108] : memref<6x10x40xf32, #tpu.memory_space<vmem>>, vector<4x8x40xf32>
    %211 = vector.shape_cast %210 : vector<4x8x40xf32> to vector<32x40xf32>
    %212 = arith.truncf %211 : vector<32x40xf32> to vector<32x40xbf16>
    %c0_109 = arith.constant 0 : index
    %c80 = arith.constant 80 : index
    %213 = vector.load %arg10[%c0_109, %c80] : memref<32x360xbf16, #tpu.memory_space<vmem>>, vector<32x40xbf16>
    tpu.vector_store %arg10[%c0_109, %c80], %212 {strides = array<i32>} : memref<32x360xbf16, #tpu.memory_space<vmem>>, vector<32x40xbf16>,
    %c1_110 = arith.constant 1 : index
    %c0_111 = arith.constant 0 : index
    %c0_112 = arith.constant 0 : index
    %214 = vector.load %arg9[%c1_110, %c0_111, %c0_112] : memref<6x10x40xf32, #tpu.memory_space<vmem>>, vector<4x8x40xf32>
    %215 = vector.shape_cast %214 : vector<4x8x40xf32> to vector<32x40xf32>
    %216 = arith.truncf %215 : vector<32x40xf32> to vector<32x40xbf16>
    %c0_113 = arith.constant 0 : index
    %c120 = arith.constant 120 : index
    %217 = vector.load %arg10[%c0_113, %c120] : memref<32x360xbf16, #tpu.memory_space<vmem>>, vector<32x40xbf16>
    tpu.vector_store %arg10[%c0_113, %c120], %216 {strides = array<i32>} : memref<32x360xbf16, #tpu.memory_space<vmem>>, vector<32x40xbf16>,
    %c1_114 = arith.constant 1 : index
    %c1_115 = arith.constant 1 : index
    %c0_116 = arith.constant 0 : index
    %218 = vector.load %arg9[%c1_114, %c1_115, %c0_116] : memref<6x10x40xf32, #tpu.memory_space<vmem>>, vector<4x8x40xf32>
    %219 = vector.shape_cast %218 : vector<4x8x40xf32> to vector<32x40xf32>
    %220 = arith.truncf %219 : vector<32x40xf32> to vector<32x40xbf16>
    %c0_117 = arith.constant 0 : index
    %c160 = arith.constant 160 : index
    %221 = vector.load %arg10[%c0_117, %c160] : memref<32x360xbf16, #tpu.memory_space<vmem>>, vector<32x40xbf16>
    tpu.vector_store %arg10[%c0_117, %c160], %220 {strides = array<i32>} : memref<32x360xbf16, #tpu.memory_space<vmem>>, vector<32x40xbf16>,
    %c1_118 = arith.constant 1 : index
    %c2_119 = arith.constant 2 : index
    %c0_120 = arith.constant 0 : index
    %222 = vector.load %arg9[%c1_118, %c2_119, %c0_120] : memref<6x10x40xf32, #tpu.memory_space<vmem>>, vector<4x8x40xf32>
    %223 = vector.shape_cast %222 : vector<4x8x40xf32> to vector<32x40xf32>
    %224 = arith.truncf %223 : vector<32x40xf32> to vector<32x40xbf16>
    %c0_121 = arith.constant 0 : index
    %c200 = arith.constant 200 : index
    %225 = vector.load %arg10[%c0_121, %c200] : memref<32x360xbf16, #tpu.memory_space<vmem>>, vector<32x40xbf16>
    tpu.vector_store %arg10[%c0_121, %c200], %224 {strides = array<i32>} : memref<32x360xbf16, #tpu.memory_space<vmem>>, vector<32x40xbf16>,
    %c2_122 = arith.constant 2 : index
    %c0_123 = arith.constant 0 : index
    %c0_124 = arith.constant 0 : index
    %226 = vector.load %arg9[%c2_122, %c0_123, %c0_124] : memref<6x10x40xf32, #tpu.memory_space<vmem>>, vector<4x8x40xf32>
    %227 = vector.shape_cast %226 : vector<4x8x40xf32> to vector<32x40xf32>
    %228 = arith.truncf %227 : vector<32x40xf32> to vector<32x40xbf16>
    %c0_125 = arith.constant 0 : index
    %c240 = arith.constant 240 : index
    %229 = vector.load %arg10[%c0_125, %c240] : memref<32x360xbf16, #tpu.memory_space<vmem>>, vector<32x40xbf16>
    tpu.vector_store %arg10[%c0_125, %c240], %228 {strides = array<i32>} : memref<32x360xbf16, #tpu.memory_space<vmem>>, vector<32x40xbf16>,
    %c2_126 = arith.constant 2 : index
    %c1_127 = arith.constant 1 : index
    %c0_128 = arith.constant 0 : index
    %230 = vector.load %arg9[%c2_126, %c1_127, %c0_128] : memref<6x10x40xf32, #tpu.memory_space<vmem>>, vector<4x8x40xf32>
    %231 = vector.shape_cast %230 : vector<4x8x40xf32> to vector<32x40xf32>
    %232 = arith.truncf %231 : vector<32x40xf32> to vector<32x40xbf16>
    %c0_129 = arith.constant 0 : index
    %c280 = arith.constant 280 : index
    %233 = vector.load %arg10[%c0_129, %c280] : memref<32x360xbf16, #tpu.memory_space<vmem>>, vector<32x40xbf16>
    tpu.vector_store %arg10[%c0_129, %c280], %232 {strides = array<i32>} : memref<32x360xbf16, #tpu.memory_space<vmem>>, vector<32x40xbf16>,
    %c2_130 = arith.constant 2 : index
    %c2_131 = arith.constant 2 : index
    %c0_132 = arith.constant 0 : index
    %234 = vector.load %arg9[%c2_130, %c2_131, %c0_132] : memref<6x10x40xf32, #tpu.memory_space<vmem>>, vector<4x8x40xf32>
    %235 = vector.shape_cast %234 : vector<4x8x40xf32> to vector<32x40xf32>
    %236 = arith.truncf %235 : vector<32x40xf32> to vector<32x40xbf16>
    %c0_133 = arith.constant 0 : index
    %c320 = arith.constant 320 : index
    %237 = vector.load %arg10[%c0_133, %c320] : memref<32x360xbf16, #tpu.memory_space<vmem>>, vector<32x40xbf16>
    tpu.vector_store %arg10[%c0_133, %c320], %236 {strides = array<i32>} : memref<32x360xbf16, #tpu.memory_space<vmem>>, vector<32x40xbf16>,
    %c0_134 = arith.constant 0 : index
    %c0_135 = arith.constant 0 : index
    %238 = vector.load %arg10[%c0_134, %c0_135] : memref<32x360xbf16, #tpu.memory_space<vmem>>, vector<32x360xbf16>
    %c0_136 = arith.constant 0 : index
    %c0_137 = arith.constant 0 : index
    %239 = vector.load %arg4[%c0_136, %c0_137] : memref<360x64xbf16, #tpu.memory_space<vmem>>, vector<360x64xbf16>
    %cst_138 = arith.constant dense<0.000000e+00> : vector<32x64xf32>
    %240 = tpu.matmul %238, %239, %cst_138 {dimension_numbers = #tpu.dot_dimension_numbers<[1], [0], [0], [1], [0, 0, 1, 1], [], []>} : vector<32x360xbf16>, vector<360x64xbf16>, vector<32x64xf32> -> vector<32x64xf32>
    %cst_139 = arith.constant 0.000000e+00 : f32
    %241 = vector.broadcast %cst_139 : f32 to vector<32x64xf32>
    %242 = arith.maximumf %240, %241 : vector<32x64xf32>
    %cst_140 = arith.constant 0.000000e+00 : f32
    %243 = vector.broadcast %cst_140 : f32 to vector<1x10x80xf32>
    %c0_141 = arith.constant 0 : index
    %c0_142 = arith.constant 0 : index
    %c0_143 = arith.constant 0 : index
    %244 = vector.load %arg11[%c0_141, %c0_142, %c0_143] : memref<6x10x80xf32, #tpu.memory_space<vmem>>, vector<1x10x80xf32>
    tpu.vector_store %arg11[%c0_141, %c0_142, %c0_143], %243 {strides = array<i32>} : memref<6x10x80xf32, #tpu.memory_space<vmem>>, vector<1x10x80xf32>,
    %cst_144 = arith.constant 0.000000e+00 : f32
    %245 = vector.broadcast %cst_144 : f32 to vector<1x10x80xf32>
    %c5_145 = arith.constant 5 : index
    %c0_146 = arith.constant 0 : index
    %c0_147 = arith.constant 0 : index
    %246 = vector.load %arg11[%c5_145, %c0_146, %c0_147] : memref<6x10x80xf32, #tpu.memory_space<vmem>>, vector<1x10x80xf32>
    tpu.vector_store %arg11[%c5_145, %c0_146, %c0_147], %245 {strides = array<i32>} : memref<6x10x80xf32, #tpu.memory_space<vmem>>, vector<1x10x80xf32>,
    %cst_148 = arith.constant 0.000000e+00 : f32
    %247 = vector.broadcast %cst_148 : f32 to vector<6x1x80xf32>
    %c0_149 = arith.constant 0 : index
    %c0_150 = arith.constant 0 : index
    %c0_151 = arith.constant 0 : index
    %248 = vector.load %arg11[%c0_149, %c0_150, %c0_151] : memref<6x10x80xf32, #tpu.memory_space<vmem>>, vector<6x1x80xf32>
    tpu.vector_store %arg11[%c0_149, %c0_150, %c0_151], %247 {strides = array<i32>} : memref<6x10x80xf32, #tpu.memory_space<vmem>>, vector<6x1x80xf32>,
    %cst_152 = arith.constant 0.000000e+00 : f32
    %249 = vector.broadcast %cst_152 : f32 to vector<6x1x80xf32>
    %c0_153 = arith.constant 0 : index
    %c9_154 = arith.constant 9 : index
    %c0_155 = arith.constant 0 : index
    %250 = vector.load %arg11[%c0_153, %c9_154, %c0_155] : memref<6x10x80xf32, #tpu.memory_space<vmem>>, vector<6x1x80xf32>
    tpu.vector_store %arg11[%c0_153, %c9_154, %c0_155], %249 {strides = array<i32>} : memref<6x10x80xf32, #tpu.memory_space<vmem>>, vector<6x1x80xf32>,
    %cst_156 = arith.constant 0.000000e+00 : f32
    %251 = vector.broadcast %cst_156 : f32 to vector<6x10x8xf32>
    %c0_157 = arith.constant 0 : index
    %c0_158 = arith.constant 0 : index
    %c0_159 = arith.constant 0 : index
    %252 = vector.load %arg11[%c0_157, %c0_158, %c0_159] : memref<6x10x80xf32, #tpu.memory_space<vmem>>, vector<6x10x8xf32>
    tpu.vector_store %arg11[%c0_157, %c0_158, %c0_159], %251 {strides = array<i32>} : memref<6x10x80xf32, #tpu.memory_space<vmem>>, vector<6x10x8xf32>,
    %cst_160 = arith.constant 0.000000e+00 : f32
    %253 = vector.broadcast %cst_160 : f32 to vector<6x10x8xf32>
    %c0_161 = arith.constant 0 : index
    %c0_162 = arith.constant 0 : index
    %c72 = arith.constant 72 : index
    %254 = vector.load %arg11[%c0_161, %c0_162, %c72] : memref<6x10x80xf32, #tpu.memory_space<vmem>>, vector<6x10x8xf32>
    tpu.vector_store %arg11[%c0_161, %c0_162, %c72], %253 {strides = array<i32>} : memref<6x10x80xf32, #tpu.memory_space<vmem>>, vector<6x10x8xf32>,
    %c0_163 = arith.constant 0 : index
    %c0_164 = arith.constant 0 : index
    %255 = vector.load %arg5[%c0_163, %c0_164] : memref<1x8xf32, #tpu.memory_space<vmem>>, vector<1x8xf32>
    %c0_165 = arith.constant 0 : index
    %c0_166 = arith.constant 0 : index
    %256 = vector.load %arg6[%c0_165, %c0_166] : memref<1x8xf32, #tpu.memory_space<vmem>>, vector<1x8xf32>
    %cst_167 = arith.constant 0.000000e+00 : f32
    %257 = vector.broadcast %cst_167 : f32 to vector<1x8xf32>
    %258 = vector.extract_strided_slice %242 {offsets = [0, 0], sizes = [32, 8], strides = [1, 1]} : vector<32x64xf32> to vector<32x8xf32>
    %cst_168 = arith.constant dense<0.000000e+00> : vector<8xf32>
    %259 = vector.multi_reduction <add>, %258, %cst_168 [0] : vector<32x8xf32> to vector<8xf32>
    %260 = vector.shape_cast %259 : vector<8xf32> to vector<1x8xf32>
    %261 = arith.addf %257, %260 : vector<1x8xf32>
    %262 = vector.extract_strided_slice %242 {offsets = [0, 8], sizes = [32, 8], strides = [1, 1]} : vector<32x64xf32> to vector<32x8xf32>
    %cst_169 = arith.constant dense<0.000000e+00> : vector<8xf32>
    %263 = vector.multi_reduction <add>, %262, %cst_169 [0] : vector<32x8xf32> to vector<8xf32>
    %264 = vector.shape_cast %263 : vector<8xf32> to vector<1x8xf32>
    %265 = arith.addf %261, %264 : vector<1x8xf32>
    %266 = vector.extract_strided_slice %242 {offsets = [0, 16], sizes = [32, 8], strides = [1, 1]} : vector<32x64xf32> to vector<32x8xf32>
    %cst_170 = arith.constant dense<0.000000e+00> : vector<8xf32>
    %267 = vector.multi_reduction <add>, %266, %cst_170 [0] : vector<32x8xf32> to vector<8xf32>
    %268 = vector.shape_cast %267 : vector<8xf32> to vector<1x8xf32>
    %269 = arith.addf %265, %268 : vector<1x8xf32>
    %270 = vector.extract_strided_slice %242 {offsets = [0, 24], sizes = [32, 8], strides = [1, 1]} : vector<32x64xf32> to vector<32x8xf32>
    %cst_171 = arith.constant dense<0.000000e+00> : vector<8xf32>
    %271 = vector.multi_reduction <add>, %270, %cst_171 [0] : vector<32x8xf32> to vector<8xf32>
    %272 = vector.shape_cast %271 : vector<8xf32> to vector<1x8xf32>
    %273 = arith.addf %269, %272 : vector<1x8xf32>
    %274 = vector.extract_strided_slice %242 {offsets = [0, 32], sizes = [32, 8], strides = [1, 1]} : vector<32x64xf32> to vector<32x8xf32>
    %cst_172 = arith.constant dense<0.000000e+00> : vector<8xf32>
    %275 = vector.multi_reduction <add>, %274, %cst_172 [0] : vector<32x8xf32> to vector<8xf32>
    %276 = vector.shape_cast %275 : vector<8xf32> to vector<1x8xf32>
    %277 = arith.addf %273, %276 : vector<1x8xf32>
    %278 = vector.extract_strided_slice %242 {offsets = [0, 40], sizes = [32, 8], strides = [1, 1]} : vector<32x64xf32> to vector<32x8xf32>
    %cst_173 = arith.constant dense<0.000000e+00> : vector<8xf32>
    %279 = vector.multi_reduction <add>, %278, %cst_173 [0] : vector<32x8xf32> to vector<8xf32>
    %280 = vector.shape_cast %279 : vector<8xf32> to vector<1x8xf32>
    %281 = arith.addf %277, %280 : vector<1x8xf32>
    %282 = vector.extract_strided_slice %242 {offsets = [0, 48], sizes = [32, 8], strides = [1, 1]} : vector<32x64xf32> to vector<32x8xf32>
    %cst_174 = arith.constant dense<0.000000e+00> : vector<8xf32>
    %283 = vector.multi_reduction <add>, %282, %cst_174 [0] : vector<32x8xf32> to vector<8xf32>
    %284 = vector.shape_cast %283 : vector<8xf32> to vector<1x8xf32>
    %285 = arith.addf %281, %284 : vector<1x8xf32>
    %286 = vector.extract_strided_slice %242 {offsets = [0, 56], sizes = [32, 8], strides = [1, 1]} : vector<32x64xf32> to vector<32x8xf32>
    %cst_175 = arith.constant dense<0.000000e+00> : vector<8xf32>
    %287 = vector.multi_reduction <add>, %286, %cst_175 [0] : vector<32x8xf32> to vector<8xf32>
    %288 = vector.shape_cast %287 : vector<8xf32> to vector<1x8xf32>
    %289 = arith.addf %285, %288 : vector<1x8xf32>
    %cst_176 = arith.constant 2.560000e+02 : f32
    %290 = vector.broadcast %cst_176 : f32 to vector<1x8xf32>
    %291 = arith.divf %289, %290 : vector<1x8xf32>
    %cst_177 = arith.constant 0.000000e+00 : f32
    %292 = vector.broadcast %cst_177 : f32 to vector<1x8xf32>
    %293 = vector.extract_strided_slice %242 {offsets = [0, 0], sizes = [32, 8], strides = [1, 1]} : vector<32x64xf32> to vector<32x8xf32>
    %294 = vector.broadcast %291 : vector<1x8xf32> to vector<32x8xf32>
    %295 = arith.subf %293, %294 : vector<32x8xf32>
    %296 = arith.mulf %295, %295 : vector<32x8xf32>
    %cst_178 = arith.constant dense<0.000000e+00> : vector<8xf32>
    %297 = vector.multi_reduction <add>, %296, %cst_178 [0] : vector<32x8xf32> to vector<8xf32>
    %298 = vector.shape_cast %297 : vector<8xf32> to vector<1x8xf32>
    %299 = arith.addf %292, %298 : vector<1x8xf32>
    %300 = vector.extract_strided_slice %242 {offsets = [0, 8], sizes = [32, 8], strides = [1, 1]} : vector<32x64xf32> to vector<32x8xf32>
    %301 = vector.broadcast %291 : vector<1x8xf32> to vector<32x8xf32>
    %302 = arith.subf %300, %301 : vector<32x8xf32>
    %303 = arith.mulf %302, %302 : vector<32x8xf32>
    %cst_179 = arith.constant dense<0.000000e+00> : vector<8xf32>
    %304 = vector.multi_reduction <add>, %303, %cst_179 [0] : vector<32x8xf32> to vector<8xf32>
    %305 = vector.shape_cast %304 : vector<8xf32> to vector<1x8xf32>
    %306 = arith.addf %299, %305 : vector<1x8xf32>
    %307 = vector.extract_strided_slice %242 {offsets = [0, 16], sizes = [32, 8], strides = [1, 1]} : vector<32x64xf32> to vector<32x8xf32>
    %308 = vector.broadcast %291 : vector<1x8xf32> to vector<32x8xf32>
    %309 = arith.subf %307, %308 : vector<32x8xf32>
    %310 = arith.mulf %309, %309 : vector<32x8xf32>
    %cst_180 = arith.constant dense<0.000000e+00> : vector<8xf32>
    %311 = vector.multi_reduction <add>, %310, %cst_180 [0] : vector<32x8xf32> to vector<8xf32>
    %312 = vector.shape_cast %311 : vector<8xf32> to vector<1x8xf32>
    %313 = arith.addf %306, %312 : vector<1x8xf32>
    %314 = vector.extract_strided_slice %242 {offsets = [0, 24], sizes = [32, 8], strides = [1, 1]} : vector<32x64xf32> to vector<32x8xf32>
    %315 = vector.broadcast %291 : vector<1x8xf32> to vector<32x8xf32>
    %316 = arith.subf %314, %315 : vector<32x8xf32>
    %317 = arith.mulf %316, %316 : vector<32x8xf32>
    %cst_181 = arith.constant dense<0.000000e+00> : vector<8xf32>
    %318 = vector.multi_reduction <add>, %317, %cst_181 [0] : vector<32x8xf32> to vector<8xf32>
    %319 = vector.shape_cast %318 : vector<8xf32> to vector<1x8xf32>
    %320 = arith.addf %313, %319 : vector<1x8xf32>
    %321 = vector.extract_strided_slice %242 {offsets = [0, 32], sizes = [32, 8], strides = [1, 1]} : vector<32x64xf32> to vector<32x8xf32>
    %322 = vector.broadcast %291 : vector<1x8xf32> to vector<32x8xf32>
    %323 = arith.subf %321, %322 : vector<32x8xf32>
    %324 = arith.mulf %323, %323 : vector<32x8xf32>
    %cst_182 = arith.constant dense<0.000000e+00> : vector<8xf32>
    %325 = vector.multi_reduction <add>, %324, %cst_182 [0] : vector<32x8xf32> to vector<8xf32>
    %326 = vector.shape_cast %325 : vector<8xf32> to vector<1x8xf32>
    %327 = arith.addf %320, %326 : vector<1x8xf32>
    %328 = vector.extract_strided_slice %242 {offsets = [0, 40], sizes = [32, 8], strides = [1, 1]} : vector<32x64xf32> to vector<32x8xf32>
    %329 = vector.broadcast %291 : vector<1x8xf32> to vector<32x8xf32>
    %330 = arith.subf %328, %329 : vector<32x8xf32>
    %331 = arith.mulf %330, %330 : vector<32x8xf32>
    %cst_183 = arith.constant dense<0.000000e+00> : vector<8xf32>
    %332 = vector.multi_reduction <add>, %331, %cst_183 [0] : vector<32x8xf32> to vector<8xf32>
    %333 = vector.shape_cast %332 : vector<8xf32> to vector<1x8xf32>
    %334 = arith.addf %327, %333 : vector<1x8xf32>
    %335 = vector.extract_strided_slice %242 {offsets = [0, 48], sizes = [32, 8], strides = [1, 1]} : vector<32x64xf32> to vector<32x8xf32>
    %336 = vector.broadcast %291 : vector<1x8xf32> to vector<32x8xf32>
    %337 = arith.subf %335, %336 : vector<32x8xf32>
    %338 = arith.mulf %337, %337 : vector<32x8xf32>
    %cst_184 = arith.constant dense<0.000000e+00> : vector<8xf32>
    %339 = vector.multi_reduction <add>, %338, %cst_184 [0] : vector<32x8xf32> to vector<8xf32>
    %340 = vector.shape_cast %339 : vector<8xf32> to vector<1x8xf32>
    %341 = arith.addf %334, %340 : vector<1x8xf32>
    %342 = vector.extract_strided_slice %242 {offsets = [0, 56], sizes = [32, 8], strides = [1, 1]} : vector<32x64xf32> to vector<32x8xf32>
    %343 = vector.broadcast %291 : vector<1x8xf32> to vector<32x8xf32>
    %344 = arith.subf %342, %343 : vector<32x8xf32>
    %345 = arith.mulf %344, %344 : vector<32x8xf32>
    %cst_185 = arith.constant dense<0.000000e+00> : vector<8xf32>
    %346 = vector.multi_reduction <add>, %345, %cst_185 [0] : vector<32x8xf32> to vector<8xf32>
    %347 = vector.shape_cast %346 : vector<8xf32> to vector<1x8xf32>
    %348 = arith.addf %341, %347 : vector<1x8xf32>
    %cst_186 = arith.constant 2.560000e+02 : f32
    %349 = vector.broadcast %cst_186 : f32 to vector<1x8xf32>
    %350 = arith.divf %348, %349 : vector<1x8xf32>
    %cst_187 = arith.constant 9.99999974E-6 : f32
    %351 = vector.broadcast %cst_187 : f32 to vector<1x8xf32>
    %352 = arith.addf %350, %351 : vector<1x8xf32>
    %353 = math.rsqrt %352 : vector<1x8xf32>
    %354 = arith.mulf %255, %353 : vector<1x8xf32>
    %355 = arith.mulf %291, %354 : vector<1x8xf32>
    %356 = arith.subf %256, %355 : vector<1x8xf32>
    %357 = vector.extract_strided_slice %242 {offsets = [0, 0], sizes = [32, 8], strides = [1, 1]} : vector<32x64xf32> to vector<32x8xf32>
    %358 = vector.broadcast %354 : vector<1x8xf32> to vector<32x8xf32>
    %359 = arith.mulf %357, %358 : vector<32x8xf32>
    %360 = vector.broadcast %356 : vector<1x8xf32> to vector<32x8xf32>
    %361 = arith.addf %359, %360 : vector<32x8xf32>
    %362 = vector.shape_cast %361 : vector<32x8xf32> to vector<4x8x8xf32>
    %c1_188 = arith.constant 1 : index
    %c1_189 = arith.constant 1 : index
    %c8_190 = arith.constant 8 : index
    %363 = vector.load %arg11[%c1_188, %c1_189, %c8_190] : memref<6x10x80xf32, #tpu.memory_space<vmem>>, vector<4x8x8xf32>
    tpu.vector_store %arg11[%c1_188, %c1_189, %c8_190], %362 {strides = array<i32>} : memref<6x10x80xf32, #tpu.memory_space<vmem>>, vector<4x8x8xf32>,
    %364 = vector.extract_strided_slice %242 {offsets = [0, 8], sizes = [32, 8], strides = [1, 1]} : vector<32x64xf32> to vector<32x8xf32>
    %365 = vector.broadcast %354 : vector<1x8xf32> to vector<32x8xf32>
    %366 = arith.mulf %364, %365 : vector<32x8xf32>
    %367 = vector.broadcast %356 : vector<1x8xf32> to vector<32x8xf32>
    %368 = arith.addf %366, %367 : vector<32x8xf32>
    %369 = vector.shape_cast %368 : vector<32x8xf32> to vector<4x8x8xf32>
    %c1_191 = arith.constant 1 : index
    %c1_192 = arith.constant 1 : index
    %c16_193 = arith.constant 16 : index
    %370 = vector.load %arg11[%c1_191, %c1_192, %c16_193] : memref<6x10x80xf32, #tpu.memory_space<vmem>>, vector<4x8x8xf32>
    tpu.vector_store %arg11[%c1_191, %c1_192, %c16_193], %369 {strides = array<i32>} : memref<6x10x80xf32, #tpu.memory_space<vmem>>, vector<4x8x8xf32>,
    %371 = vector.extract_strided_slice %242 {offsets = [0, 16], sizes = [32, 8], strides = [1, 1]} : vector<32x64xf32> to vector<32x8xf32>
    %372 = vector.broadcast %354 : vector<1x8xf32> to vector<32x8xf32>
    %373 = arith.mulf %371, %372 : vector<32x8xf32>
    %374 = vector.broadcast %356 : vector<1x8xf32> to vector<32x8xf32>
    %375 = arith.addf %373, %374 : vector<32x8xf32>
    %376 = vector.shape_cast %375 : vector<32x8xf32> to vector<4x8x8xf32>
    %c1_194 = arith.constant 1 : index
    %c1_195 = arith.constant 1 : index
    %c24_196 = arith.constant 24 : index
    %377 = vector.load %arg11[%c1_194, %c1_195, %c24_196] : memref<6x10x80xf32, #tpu.memory_space<vmem>>, vector<4x8x8xf32>
    tpu.vector_store %arg11[%c1_194, %c1_195, %c24_196], %376 {strides = array<i32>} : memref<6x10x80xf32, #tpu.memory_space<vmem>>, vector<4x8x8xf32>,
    %378 = vector.extract_strided_slice %242 {offsets = [0, 24], sizes = [32, 8], strides = [1, 1]} : vector<32x64xf32> to vector<32x8xf32>
    %379 = vector.broadcast %354 : vector<1x8xf32> to vector<32x8xf32>
    %380 = arith.mulf %378, %379 : vector<32x8xf32>
    %381 = vector.broadcast %356 : vector<1x8xf32> to vector<32x8xf32>
    %382 = arith.addf %380, %381 : vector<32x8xf32>
    %383 = vector.shape_cast %382 : vector<32x8xf32> to vector<4x8x8xf32>
    %c1_197 = arith.constant 1 : index
    %c1_198 = arith.constant 1 : index
    %c32_199 = arith.constant 32 : index
    %384 = vector.load %arg11[%c1_197, %c1_198, %c32_199] : memref<6x10x80xf32, #tpu.memory_space<vmem>>, vector<4x8x8xf32>
    tpu.vector_store %arg11[%c1_197, %c1_198, %c32_199], %383 {strides = array<i32>} : memref<6x10x80xf32, #tpu.memory_space<vmem>>, vector<4x8x8xf32>,
    %385 = vector.extract_strided_slice %242 {offsets = [0, 32], sizes = [32, 8], strides = [1, 1]} : vector<32x64xf32> to vector<32x8xf32>
    %386 = vector.broadcast %354 : vector<1x8xf32> to vector<32x8xf32>
    %387 = arith.mulf %385, %386 : vector<32x8xf32>
    %388 = vector.broadcast %356 : vector<1x8xf32> to vector<32x8xf32>
    %389 = arith.addf %387, %388 : vector<32x8xf32>
    %390 = vector.shape_cast %389 : vector<32x8xf32> to vector<4x8x8xf32>
    %c1_200 = arith.constant 1 : index
    %c1_201 = arith.constant 1 : index
    %c40_202 = arith.constant 40 : index
    %391 = vector.load %arg11[%c1_200, %c1_201, %c40_202] : memref<6x10x80xf32, #tpu.memory_space<vmem>>, vector<4x8x8xf32>
    tpu.vector_store %arg11[%c1_200, %c1_201, %c40_202], %390 {strides = array<i32>} : memref<6x10x80xf32, #tpu.memory_space<vmem>>, vector<4x8x8xf32>,
    %392 = vector.extract_strided_slice %242 {offsets = [0, 40], sizes = [32, 8], strides = [1, 1]} : vector<32x64xf32> to vector<32x8xf32>
    %393 = vector.broadcast %354 : vector<1x8xf32> to vector<32x8xf32>
    %394 = arith.mulf %392, %393 : vector<32x8xf32>
    %395 = vector.broadcast %356 : vector<1x8xf32> to vector<32x8xf32>
    %396 = arith.addf %394, %395 : vector<32x8xf32>
    %397 = vector.shape_cast %396 : vector<32x8xf32> to vector<4x8x8xf32>
    %c1_203 = arith.constant 1 : index
    %c1_204 = arith.constant 1 : index
    %c48 = arith.constant 48 : index
    %398 = vector.load %arg11[%c1_203, %c1_204, %c48] : memref<6x10x80xf32, #tpu.memory_space<vmem>>, vector<4x8x8xf32>
    tpu.vector_store %arg11[%c1_203, %c1_204, %c48], %397 {strides = array<i32>} : memref<6x10x80xf32, #tpu.memory_space<vmem>>, vector<4x8x8xf32>,
    %399 = vector.extract_strided_slice %242 {offsets = [0, 48], sizes = [32, 8], strides = [1, 1]} : vector<32x64xf32> to vector<32x8xf32>
    %400 = vector.broadcast %354 : vector<1x8xf32> to vector<32x8xf32>
    %401 = arith.mulf %399, %400 : vector<32x8xf32>
    %402 = vector.broadcast %356 : vector<1x8xf32> to vector<32x8xf32>
    %403 = arith.addf %401, %402 : vector<32x8xf32>
    %404 = vector.shape_cast %403 : vector<32x8xf32> to vector<4x8x8xf32>
    %c1_205 = arith.constant 1 : index
    %c1_206 = arith.constant 1 : index
    %c56 = arith.constant 56 : index
    %405 = vector.load %arg11[%c1_205, %c1_206, %c56] : memref<6x10x80xf32, #tpu.memory_space<vmem>>, vector<4x8x8xf32>
    tpu.vector_store %arg11[%c1_205, %c1_206, %c56], %404 {strides = array<i32>} : memref<6x10x80xf32, #tpu.memory_space<vmem>>, vector<4x8x8xf32>,
    %406 = vector.extract_strided_slice %242 {offsets = [0, 56], sizes = [32, 8], strides = [1, 1]} : vector<32x64xf32> to vector<32x8xf32>
    %407 = vector.broadcast %354 : vector<1x8xf32> to vector<32x8xf32>
    %408 = arith.mulf %406, %407 : vector<32x8xf32>
    %409 = vector.broadcast %356 : vector<1x8xf32> to vector<32x8xf32>
    %410 = arith.addf %408, %409 : vector<32x8xf32>
    %411 = vector.shape_cast %410 : vector<32x8xf32> to vector<4x8x8xf32>
    %c1_207 = arith.constant 1 : index
    %c1_208 = arith.constant 1 : index
    %c64 = arith.constant 64 : index
    %412 = vector.load %arg11[%c1_207, %c1_208, %c64] : memref<6x10x80xf32, #tpu.memory_space<vmem>>, vector<4x8x8xf32>
    tpu.vector_store %arg11[%c1_207, %c1_208, %c64], %411 {strides = array<i32>} : memref<6x10x80xf32, #tpu.memory_space<vmem>>, vector<4x8x8xf32>,
    %c0_209 = arith.constant 0 : index
    %c0_210 = arith.constant 0 : index
    %c0_211 = arith.constant 0 : index
    %413 = vector.load %arg11[%c0_209, %c0_210, %c0_211] : memref<6x10x80xf32, #tpu.memory_space<vmem>>, vector<4x8x80xf32>
    %414 = vector.shape_cast %413 : vector<4x8x80xf32> to vector<32x80xf32>
    %415 = arith.truncf %414 : vector<32x80xf32> to vector<32x80xbf16>
    %c0_212 = arith.constant 0 : index
    %c0_213 = arith.constant 0 : index
    %416 = vector.load %arg12[%c0_212, %c0_213] : memref<32x720xbf16, #tpu.memory_space<vmem>>, vector<32x80xbf16>
    tpu.vector_store %arg12[%c0_212, %c0_213], %415 {strides = array<i32>} : memref<32x720xbf16, #tpu.memory_space<vmem>>, vector<32x80xbf16>,
    %c0_214 = arith.constant 0 : index
    %c1_215 = arith.constant 1 : index
    %c0_216 = arith.constant 0 : index
    %417 = vector.load %arg11[%c0_214, %c1_215, %c0_216] : memref<6x10x80xf32, #tpu.memory_space<vmem>>, vector<4x8x80xf32>
    %418 = vector.shape_cast %417 : vector<4x8x80xf32> to vector<32x80xf32>
    %419 = arith.truncf %418 : vector<32x80xf32> to vector<32x80xbf16>
    %c0_217 = arith.constant 0 : index
    %c80_218 = arith.constant 80 : index
    %420 = vector.load %arg12[%c0_217, %c80_218] : memref<32x720xbf16, #tpu.memory_space<vmem>>, vector<32x80xbf16>
    tpu.vector_store %arg12[%c0_217, %c80_218], %419 {strides = array<i32>} : memref<32x720xbf16, #tpu.memory_space<vmem>>, vector<32x80xbf16>,
    %c0_219 = arith.constant 0 : index
    %c2_220 = arith.constant 2 : index
    %c0_221 = arith.constant 0 : index
    %421 = vector.load %arg11[%c0_219, %c2_220, %c0_221] : memref<6x10x80xf32, #tpu.memory_space<vmem>>, vector<4x8x80xf32>
    %422 = vector.shape_cast %421 : vector<4x8x80xf32> to vector<32x80xf32>
    %423 = arith.truncf %422 : vector<32x80xf32> to vector<32x80xbf16>
    %c0_222 = arith.constant 0 : index
    %c160_223 = arith.constant 160 : index
    %424 = vector.load %arg12[%c0_222, %c160_223] : memref<32x720xbf16, #tpu.memory_space<vmem>>, vector<32x80xbf16>
    tpu.vector_store %arg12[%c0_222, %c160_223], %423 {strides = array<i32>} : memref<32x720xbf16, #tpu.memory_space<vmem>>, vector<32x80xbf16>,
    %c1_224 = arith.constant 1 : index
    %c0_225 = arith.constant 0 : index
    %c0_226 = arith.constant 0 : index
    %425 = vector.load %arg11[%c1_224, %c0_225, %c0_226] : memref<6x10x80xf32, #tpu.memory_space<vmem>>, vector<4x8x80xf32>
    %426 = vector.shape_cast %425 : vector<4x8x80xf32> to vector<32x80xf32>
    %427 = arith.truncf %426 : vector<32x80xf32> to vector<32x80xbf16>
    %c0_227 = arith.constant 0 : index
    %c240_228 = arith.constant 240 : index
    %428 = vector.load %arg12[%c0_227, %c240_228] : memref<32x720xbf16, #tpu.memory_space<vmem>>, vector<32x80xbf16>
    tpu.vector_store %arg12[%c0_227, %c240_228], %427 {strides = array<i32>} : memref<32x720xbf16, #tpu.memory_space<vmem>>, vector<32x80xbf16>,
    %c1_229 = arith.constant 1 : index
    %c1_230 = arith.constant 1 : index
    %c0_231 = arith.constant 0 : index
    %429 = vector.load %arg11[%c1_229, %c1_230, %c0_231] : memref<6x10x80xf32, #tpu.memory_space<vmem>>, vector<4x8x80xf32>
    %430 = vector.shape_cast %429 : vector<4x8x80xf32> to vector<32x80xf32>
    %431 = arith.truncf %430 : vector<32x80xf32> to vector<32x80xbf16>
    %c0_232 = arith.constant 0 : index
    %c320_233 = arith.constant 320 : index
    %432 = vector.load %arg12[%c0_232, %c320_233] : memref<32x720xbf16, #tpu.memory_space<vmem>>, vector<32x80xbf16>
    tpu.vector_store %arg12[%c0_232, %c320_233], %431 {strides = array<i32>} : memref<32x720xbf16, #tpu.memory_space<vmem>>, vector<32x80xbf16>,
    %c1_234 = arith.constant 1 : index
    %c2_235 = arith.constant 2 : index
    %c0_236 = arith.constant 0 : index
    %433 = vector.load %arg11[%c1_234, %c2_235, %c0_236] : memref<6x10x80xf32, #tpu.memory_space<vmem>>, vector<4x8x80xf32>
    %434 = vector.shape_cast %433 : vector<4x8x80xf32> to vector<32x80xf32>
    %435 = arith.truncf %434 : vector<32x80xf32> to vector<32x80xbf16>
    %c0_237 = arith.constant 0 : index
    %c400 = arith.constant 400 : index
    %436 = vector.load %arg12[%c0_237, %c400] : memref<32x720xbf16, #tpu.memory_space<vmem>>, vector<32x80xbf16>
    tpu.vector_store %arg12[%c0_237, %c400], %435 {strides = array<i32>} : memref<32x720xbf16, #tpu.memory_space<vmem>>, vector<32x80xbf16>,
    %c2_238 = arith.constant 2 : index
    %c0_239 = arith.constant 0 : index
    %c0_240 = arith.constant 0 : index
    %437 = vector.load %arg11[%c2_238, %c0_239, %c0_240] : memref<6x10x80xf32, #tpu.memory_space<vmem>>, vector<4x8x80xf32>
    %438 = vector.shape_cast %437 : vector<4x8x80xf32> to vector<32x80xf32>
    %439 = arith.truncf %438 : vector<32x80xf32> to vector<32x80xbf16>
    %c0_241 = arith.constant 0 : index
    %c480 = arith.constant 480 : index
    %440 = vector.load %arg12[%c0_241, %c480] : memref<32x720xbf16, #tpu.memory_space<vmem>>, vector<32x80xbf16>
    tpu.vector_store %arg12[%c0_241, %c480], %439 {strides = array<i32>} : memref<32x720xbf16, #tpu.memory_space<vmem>>, vector<32x80xbf16>,
    %c2_242 = arith.constant 2 : index
    %c1_243 = arith.constant 1 : index
    %c0_244 = arith.constant 0 : index
    %441 = vector.load %arg11[%c2_242, %c1_243, %c0_244] : memref<6x10x80xf32, #tpu.memory_space<vmem>>, vector<4x8x80xf32>
    %442 = vector.shape_cast %441 : vector<4x8x80xf32> to vector<32x80xf32>
    %443 = arith.truncf %442 : vector<32x80xf32> to vector<32x80xbf16>
    %c0_245 = arith.constant 0 : index
    %c560 = arith.constant 560 : index
    %444 = vector.load %arg12[%c0_245, %c560] : memref<32x720xbf16, #tpu.memory_space<vmem>>, vector<32x80xbf16>
    tpu.vector_store %arg12[%c0_245, %c560], %443 {strides = array<i32>} : memref<32x720xbf16, #tpu.memory_space<vmem>>, vector<32x80xbf16>,
    %c2_246 = arith.constant 2 : index
    %c2_247 = arith.constant 2 : index
    %c0_248 = arith.constant 0 : index
    %445 = vector.load %arg11[%c2_246, %c2_247, %c0_248] : memref<6x10x80xf32, #tpu.memory_space<vmem>>, vector<4x8x80xf32>
    %446 = vector.shape_cast %445 : vector<4x8x80xf32> to vector<32x80xf32>
    %447 = arith.truncf %446 : vector<32x80xf32> to vector<32x80xbf16>
    %c0_249 = arith.constant 0 : index
    %c640 = arith.constant 640 : index
    %448 = vector.load %arg12[%c0_249, %c640] : memref<32x720xbf16, #tpu.memory_space<vmem>>, vector<32x80xbf16>
    tpu.vector_store %arg12[%c0_249, %c640], %447 {strides = array<i32>} : memref<32x720xbf16, #tpu.memory_space<vmem>>, vector<32x80xbf16>,
    %c0_250 = arith.constant 0 : index
    %c0_251 = arith.constant 0 : index
    %449 = vector.load %arg12[%c0_250, %c0_251] : memref<32x720xbf16, #tpu.memory_space<vmem>>, vector<32x720xbf16>
    %c0_252 = arith.constant 0 : index
    %c0_253 = arith.constant 0 : index
    %450 = vector.load %arg7[%c0_252, %c0_253] : memref<720x128xbf16, #tpu.memory_space<vmem>>, vector<720x128xbf16>
    %cst_254 = arith.constant dense<0.000000e+00> : vector<32x128xf32>
    %451 = tpu.matmul %449, %450, %cst_254 {dimension_numbers = #tpu.dot_dimension_numbers<[1], [0], [0], [1], [0, 0, 1, 1], [], []>} : vector<32x720xbf16>, vector<720x128xbf16>, vector<32x128xf32> -> vector<32x128xf32>
    %cst_255 = arith.constant 0.000000e+00 : f32
    %452 = vector.broadcast %cst_255 : f32 to vector<32x128xf32>
    %453 = arith.maximumf %451, %452 : vector<32x128xf32>
    %c0_256 = arith.constant 0 : index
    %c0_257 = arith.constant 0 : index
    %c0_258 = arith.constant 0 : index
    %454 = vector.load %arg8[%c0_256, %c0_257, %c0_258] : memref<1x32x128xf32, #tpu.memory_space<vmem>>, vector<1x32x128xf32>
    %455 = vector.shape_cast %454 : vector<1x32x128xf32> to vector<32x128xf32>
    %456 = vector.shape_cast %453 : vector<32x128xf32> to vector<1x32x128xf32>
    tpu.vector_store %arg8[%c0_256, %c0_257, %c0_258], %456 {strides = array<i32>} : memref<1x32x128xf32, #tpu.memory_space<vmem>>, vector<1x32x128xf32>,
    return
  }
  func.func @transform_0(%arg0: i32) -> (i32, i32, i32, i32, i32) {
    %c0_i32 = arith.constant 0 : i32
    %c0_i32_0 = arith.constant 0 : i32
    %c0_i32_1 = arith.constant 0 : i32
    %c0_i32_2 = arith.constant 0 : i32
    %c0_i32_3 = arith.constant 0 : i32
    return %arg0, %c0_i32, %c0_i32_0, %c0_i32_1, %c0_i32_2 : i32, i32, i32, i32, i32
  }
  func.func @transform_1(%arg0: i32) -> (i32, i32) {
    %c0_i32 = arith.constant 0 : i32
    %c0_i32_0 = arith.constant 0 : i32
    %c0_i32_1 = arith.constant 0 : i32
    return %c0_i32, %c0_i32_0 : i32, i32
  }
  func.func @transform_2(%arg0: i32) -> (i32, i32) {
    %c0_i32 = arith.constant 0 : i32
    %c0_i32_0 = arith.constant 0 : i32
    %c0_i32_1 = arith.constant 0 : i32
    return %c0_i32, %c0_i32_0 : i32, i32
  }
  func.func @transform_3(%arg0: i32) -> (i32, i32) {
    %c0_i32 = arith.constant 0 : i32
    %c0_i32_0 = arith.constant 0 : i32
    %c0_i32_1 = arith.constant 0 : i32
    return %c0_i32, %c0_i32_0 : i32, i32
  }
  func.func @transform_4(%arg0: i32) -> (i32, i32) {
    %c0_i32 = arith.constant 0 : i32
    %c0_i32_0 = arith.constant 0 : i32
    %c0_i32_1 = arith.constant 0 : i32
    return %c0_i32, %c0_i32_0 : i32, i32
  }
  func.func @transform_5(%arg0: i32) -> (i32, i32) {
    %c0_i32 = arith.constant 0 : i32
    %c0_i32_0 = arith.constant 0 : i32
    %c0_i32_1 = arith.constant 0 : i32
    return %c0_i32, %c0_i32_0 : i32, i32
  }
  func.func @transform_6(%arg0: i32) -> (i32, i32) {
    %c0_i32 = arith.constant 0 : i32
    %c0_i32_0 = arith.constant 0 : i32
    %c0_i32_1 = arith.constant 0 : i32
    return %c0_i32, %c0_i32_0 : i32, i32
  }
  func.func @transform_7(%arg0: i32) -> (i32, i32, i32) {
    %c0_i32 = arith.constant 0 : i32
    %c0_i32_0 = arith.constant 0 : i32
    %c0_i32_1 = arith.constant 0 : i32
    return %arg0, %c0_i32, %c0_i32_0 : i32, i32, i32
  }
}

</mosaic_0001>

<bundles_post_ra>
// kernel: tpu_custom_call.1
= control target key start
LH: loop header
LB: loop body
LE: loop exit
PB: predicated region body
PF: predicated region fallthrough
CT: control target
= control target key end

     0   :  { %s5357_s0 = inlined_call_operand.hbm [shape: f32[2,8,4,8,32], index: 0, kind: input, shape index: {}]   ;;  %s5358_s1 = inlined_call_operand.vmem [shape: f32[1,4], index: 1, kind: input, shape index: {}]   ;;  %s5359_s2 = inlined_call_operand.vmem [shape: f32[1,4], index: 2, kind: input, shape index: {}]   ;;  %s5360_s3 = inlined_call_operand.vmem [shape: bf16[360,64], index: 3, kind: input, shape index: {}]   ;;  %s5361_s4 = inlined_call_operand.vmem [shape: f32[1,8], index: 4, kind: input, shape index: {}]   ;;  %s5362_s5 = inlined_call_operand.vmem [shape: f32[1,8], index: 5, kind: input, shape index: {}]   ;;  %s5363_s6 = inlined_call_operand.hbm [shape: bf16[720,128], index: 6, kind: input, shape index: {}]   ;;  %s5364_s7 = inlined_call_operand.hbm [shape: f32[2,32,128], index: 7, kind: output, shape index: {}]  }
   0x1   :  { %5380 = sst [smem:[#allocation15_spill]] %s5363_s6 }
   0x2   :  { %12 = vsyncpa [#allocation7], 0 }
   0x3   :  { %14 = vsyncpa [#allocation7 + $0x1], 0 }
   0x4   :  { %15 = vsyncpa [#allocation10], 0 }
   0x5   :  { %16 = vsyncpa [#allocation8], 0 }
   0x6   :  { %18 = vsyncpa [#allocation8 + $0x1], 0  ;;  %s4020_s24 = smov 0   ;;  %s4022_s25 = smov 0  }
   0x7   :  { %s4024_s26 = smov 0   ;;  %s4026_s27 = smov 0  }
   0x8 LB: > { %s4041_s28 = sadd.s32 4294967295, %s3946_s27   ;;  %s3240_s29 = sadd.s32 4294967294, %s3946_s27   ;;  %s3946_s27 = sphi %s4026_s27, %s5413_s27   ;;  %s3942_s26 = sphi %s4024_s26, %s5412_s26   ;;  %s3938_s25 = sphi %s4022_s25, %s5411_s25   ;;  %s3934_s24 = sphi %s4020_s24, %s5410_s24  }
   0x9   : > { %p44_p0 = scmp.ne.s32.totalorder %s3938_s25, %s3934_s24  ;;  %p45_p1 = scmp.eq.s32.totalorder %s4041_s28, 0 }
   0xa   : > { %p194_p2 = scmp.eq.s32.totalorder %s4041_s28, 1  ;;  %p200_p3 = scmp.eq.s32.totalorder %s3240_s29, 1 }
   0xb   : > { %p4050_p4 = por %p45_p1, %p44_p0  ;;  %p3241_p5 = scmp.ge.s32.totalorder %s3946_s27, 1 }
   0xc   : > { %p4055_p6 = por %p200_p3, %p44_p0  ;;  %p207_p7 = scmp.lt.s32.totalorder %s3946_s27, 3 }
   0xd   : > { %s5383_s6 = sld [smem:[#allocation15_spill]]  ;;  %s3948_s13 = smov [#allocation9]  }
   0xe   : > { %p4063_p8 = pnand %p3241_p5, %p207_p7  ;;  %s235_s14 = sshll.u32 %s3948_s13, 4  ;;  %s236_s14 = int_to_ptr.vmem [resolvable:$true] %s235_s14 }
   0xf   : > { %s4073_s15 = sadd.s32 1, %s3946_s27   ;;  %s3949_s16 = smov 64  }
  0x10   : > { %p3728_p9 = pneg %p4063_p8  ;;  %s3950_s17 = smov 4  }
  0x11   : > { %s28_s18 = ssub.s32 %s3946_s27, %s4073_s15  ;;  %s31_s19 = sadd.s32 1, %s3942_s26 }
  0x12   : > { %p3729_p10 = pnand %p3728_p9, %p45_p1  ;;  %p29_p12 = scmp.eq.s32.totalorder %s28_s18, 0 }
  0x13   : > { %s233_s11 = sshll.u32 %s5383_s6, 4  ;;  %p38_p13 = scmp.ne.s32.totalorder %s3942_s26, %s3938_s25  ;;  %s234_s11 = int_to_ptr.hbm [resolvable:$true] %s233_s11 }
  0x14   : > { %3731 = dma.hbm_to_vmem [thread:$0]  (!%p3729_p10), %s234_s11, 5760, %s236_s14, [#allocation10], %s3949_s16, %s3949_s16, %s3950_s17  }
  0x15   : > { %p39_p0 = scmp.eq.s32.totalorder %s3946_s27, 0  ;;  %p3741_p3 = scmp.lt.s32.totalorder %s3946_s27, 2 }
  0x16   : > { %s4083_s20 = scalar_select %p29_p12, %s3942_s26, %s31_s19  }
  0x17   : > { %p40_p5 = por %p39_p0, %p38_p13  ;;  %p4087_p7 = por %p194_p2, %p38_p13 }
  0x18   : > { %s249_s22 = sand.u32 1, %s3942_s26   ;;  %s3628_s23 = sshll.u32 %s3946_s27, 8 }
  0x19   : > { %s3244_s29 = sshll.u32 %s249_s22, 8  ;;  %s258_s11 = scalar_lea.hbm %s5357_s0, %s3628_s23 }
  0x1a   : > { %s259_s13 = sshll.u32 %s258_s11, 4  ;;  %s253_s14 = scalar_lea.vmem [#allocation6], %s3244_s29  ;;  %s260_s13 = int_to_ptr.hbm [resolvable:$true] %s259_s13 }
  0x1b   : > { %s261_s16 = sshll.u32 %s253_s14, 4  ;;  %p4098_p9 = pnand %p3741_p3, %p40_p5  ;;  %s262_s16 = int_to_ptr.vmem [resolvable:$true] %s261_s16 }
  0x1c   : > { %s250_s18 = scalar_lea.sflag [#allocation7], %s249_s22  ;;  %s3846_s19 = sshra.s32 %s260_s13, 4  ;;  %s3847_s19 = int_to_ptr.hbm [resolvable:$true] %s3846_s19 }
  0x1d   : > { %s3848_s6 = scalar_lea.hbm %s3847_s19, 256  ;;  %p3850_p10 = pneg %p4098_p9 }
  0x1e   : > { %p3849_p2 = scmp.ne.s32.totalorder %s3847_s19, %s3848_s6  ;;  %s3853_s9 = scalar_lea.hbm %s5357_s0, 512 }
  0x1f   : > { %p3854_p0 = scmp.lt.s32.totalorder %s3847_s19, %s5357_s0  ;;  %p3855_p3 = scmp.lt.s32.totalorder %s3853_s9, %s3848_s6 }
  0x20   : > { %p3851_p12 = pnand %p3850_p10, %p3849_p2 }
  0x21   : > { %p3856_p5 = por %p3855_p3, %p3854_p0 }
  0x22   : > { %p3852_p13 = pneg %p3851_p12 }
  0x24   : > { %p3857_p11 = pnand %p3856_p5, %p3852_p13 }
  0x26   : > { %3860 = shalt.err (!%p3857_p11)
}
  0x27   : > { %s3951_s22 = smov 128   ;;  %s3952_s14 = smov 8  }
  0x28   : > { %3735 = dma.hbm_to_vmem [thread:$0]  (!%p4098_p9), %s260_s13, 4096, %s262_s16, %s250_s18, %s3951_s22, %s3951_s22, %s3952_s14  }
  0x29   : > { %273 = sbr.rel (%p4063_p8) target bundleno = 2375 (0x947), region = 48  ;;  %s4115_s23 = sand.u32 (!%p4063_p8), 1, %s3938_s25  }
  0x2a   : > { %s3248_s29 = sshll.u32 (!%p4063_p8), %s4115_s23, 8  ;;  %s276_s19 = scalar_lea.sflag (!%p4063_p8), [#allocation7], %s4115_s23 }
  0x2b   : > { %s4119_s6 = scalar_lea.vmem (!%p4063_p8), [#allocation6], %s3248_s29 }
  0x2e   : > { %3921 = dma.done.wait (%p4050_p4), %s276_s19, 4096  }
  0x2f   : > { %3923 = vsyncadd (%p4050_p4), %s276_s19, 4294963200 }
  0x30   : > { %3925 = dma.done.wait (%p45_p1), [#allocation10], 5760  }
  0x31   : > { %3927 = vsyncadd (%p45_p1), [#allocation10], 4294961536  ;;  %v317_v0 = vld [vmem:[%s4119_s6] sm:$0xff]  ;;  %v318_v1 = vld [vmem:[%s4119_s6 + $0x8] sm:$0xff]  ;;  %vm448_vm0 = vcmask 64544   ;;  %vm486_vm1 = vcmask 130144  }
  0x32   : > { %v319_v2 = vld [vmem:[%s4119_s6 + $0x10] sm:$0xff]  ;;  %v320_v3 = vld [vmem:[%s4119_s6 + $0x18] sm:$0xff]  ;;  %v3251_v4 = vld [vmem:[%s4119_s6 + $0x20] sm:$0xff]  ;;  %vm467_vm2 = vcmask 97344   ;;  %vm505_vm3 = vcmask 162944   ;;  %vm562_vm4 = vcmask 261344  }
  0x33   : > { %v3252_v5 = vld [vmem:[%s4119_s6 + $0x28] sm:$0xff]  ;;  %v3253_v6 = vld [vmem:[%s4119_s6 + $0x30] sm:$0xff]  ;;  %v3254_v7 = vld [vmem:[%s4119_s6 + $0x38] sm:$0xff]  ;;  %v326_v8 = vmax.f32 %v317_v0, %v3251_v4  ;;  %vm524_vm5 = vcmask 195744   ;;  %vm543_vm6 = vcmask 228544   ;;  %s3953_s30 = smov 124  }
  0x34   : > { %v327_v9 = vmax.f32 %v318_v1, %v3252_v5  ;;  %v3255_v10 = vld [vmem:[%s4119_s6 + $0x40] sm:$0xff]  ;;  %v328_v11 = vmax.f32 %v319_v2, %v3253_v6  ;;  %v329_v12 = vmax.f32 %v320_v3, %v3254_v7  ;;  %v3256_v13 = vld [vmem:[%s4119_s6 + $0x48] sm:$0xff]  ;;  %v3257_v14 = vld [vmem:[%s4119_s6 + $0x50] sm:$0xff]  ;;  %s3954_s12 = smov 116   ;;  %s3955_s13 = smov 120   ;;  %vm404_vm7 = vcmask 31744  }
  0x35   : > { %v3258_v15 = vld [vmem:[%s4119_s6 + $0x58] sm:$0xff]  ;;  %v335_v16 = vmax.f32 %v326_v8, %v3255_v10  ;;  %v3259_v18 = vld [vmem:[%s4119_s6 + $0x60] sm:$0xff]  ;;  %v3260_v19 = vld [vmem:[%s4119_s6 + $0x68] sm:$0xff]  ;;  %s3956_s16 = smov 112   ;;  %s3957_s17 = smov 108   ;;  %vm581_vm8 = vcmask 24576  }
  0x36   : > { %v336_v17 = vmax.f32 %v327_v9, %v3256_v13  ;;  %v3261_v20 = vld [vmem:[%s4119_s6 + $0x70] sm:$0xff]  ;;  %v337_v21 = vmax.f32 %v328_v11, %v3257_v14  ;;  %v338_v22 = vmax.f32 %v329_v12, %v3258_v15  ;;  %v3262_v23 = vld [vmem:[%s4119_s6 + $0x78] sm:$0xff]  ;;  %v3263_v24 = vld [vmem:[%s4119_s6 + $0x80] sm:$0xff]  ;;  %s3958_s18 = smov 100   ;;  %s3959_s9 = smov 104   ;;  %vm384_vm10 = vcmask 326656  }
  0x37   : > { %v3264_v25 = vld [vmem:[%s4119_s6 + $0x88] sm:$0xff]  ;;  %v344_v26 = vmax.f32 %v335_v16, %v3259_v18  ;;  %v3265_v28 = vld [vmem:[%s4119_s6 + $0x90] sm:$0xff]  ;;  %v3266_v29 = vld [vmem:[%s4119_s6 + $0x98] sm:$0xff]  ;;  %vm386_vm11 = vcmask 320512   ;;  %vm391_vm12 = vcmask 319488   ;;  %vm406_vm13 = vcmask 25600  }
  0x38   : > { %v345_v27 = vmax.f32 %v336_v17, %v3260_v19  ;;  %v346_v30 = vmax.f32 %v337_v21, %v3261_v20  ;;  %v347_v31 = vmax.f32 %v338_v22, %v3262_v23  ;;  %v3267_v32 = vld [vmem:[%s4119_s6 + $0xa0] sm:$0xff]  ;;  %v3268_v33 = vld [vmem:[%s4119_s6 + $0xa8] sm:$0xff]  ;;  %v3269_v36 = vld [vmem:[%s4119_s6 + $0xb0] sm:$0xff]  ;;  %vm418_vm14 = vcmask 326944   ;;  %s3962_s10 = smov 80   ;;  %s5365_s11 = smov 40  }
  0x39   : > { %v353_v34 = vmax.f32 %v344_v26, %v3263_v24  ;;  %v3270_v37 = vld [vmem:[%s4119_s6 + $0xb8] sm:$0xff]  ;;  %v3271_v40 = vld [vmem:[%s4119_s6 + $0xc0] sm:$0xff]  ;;  %v3272_v41 = vld [vmem:[%s4119_s6 + $0xc8] sm:$0xff]  ;;  %vm420_vm15 = vcmask 320800   ;;  %s3969_s22 = smov 12   ;;  %s3970_s14 = smov 20  }
  0x3a   : > { %v354_v35 = vmax.f32 %v345_v27, %v3264_v25  ;;  %v355_v38 = vmax.f32 %v346_v30, %v3265_v28  ;;  %v356_v39 = vmax.f32 %v347_v31, %v3266_v29  ;;  %v3273_v44 = vld [vmem:[%s4119_s6 + $0xd0] sm:$0xff]  ;;  %v3274_v45 = vld [vmem:[%s4119_s6 + $0xd8] sm:$0xff]  ;;  %v3275_v48 = vld [vmem:[%s4119_s6 + $0xe0] sm:$0xff]  ;;  %s5369_s29 = smov 32   ;;  %s5373_s19 = smov 72  }
  0x3b   : > { %v362_v42 = vmax.f32 %v353_v34, %v3267_v32  ;;  %v3276_v49 = vld [vmem:[%s4119_s6 + $0xe8] sm:$0xff]  ;;  %v3277_v52 = vld [vmem:[%s4119_s6 + $0xf0] sm:$0xff]  ;;  %v3278_v53 = vld [vmem:[%s4119_s6 + $0xf8] sm:$0xff]  ;;  %s5377_s6 = smov 24  }
  0x3c   : > { %v363_v43 = vmax.f32 %v354_v35, %v3268_v33  ;;  %v364_v46 = vmax.f32 %v355_v38, %v3269_v36  ;;  %v365_v47 = vmax.f32 %v356_v39, %v3270_v37 }
  0x3d   : > { %v371_v50 = vmax.f32 %v362_v42, %v3271_v40 }
  0x3e   : > { %v372_v51 = vmax.f32 %v363_v43, %v3272_v41  ;;  %v373_v54 = vmax.f32 %v364_v46, %v3273_v44  ;;  %v374_v55 = vmax.f32 %v365_v47, %v3274_v45 }
  0x3f   : > { %v4161_v56 = vmax.f32 %v371_v50, %v3275_v48 }
  0x40   : > { %v4163_v57 = vmax.f32 %v372_v51, %v3276_v49  ;;  %v4165_v58 = vmax.f32 %v373_v54, %v3277_v52  ;;  %v4167_v59 = vmax.f32 %v374_v55, %v3278_v53 }
  0x41   : > { %v449_v60 = vsel %vm448_vm0, %v4161_v56, 0.0  ;;  %v487_v62 = vsel %vm486_vm1, %v4161_v56, 0.0  ;;  %v468_v6 = vsel %vm467_vm2, %v4161_v56, 0.0  ;;  %v506_v13 = vsel %vm505_vm3, %v4161_v56, 0.0 }
  0x42   : > { %v450_v61 = vsel %vm448_vm0, %v4163_v57, 0.0  ;;  %v488_v63 = vsel %vm486_vm1, %v4163_v57, 0.0  ;;  %v452_v1 = vsel %vm448_vm0, %v4165_v58, 0.0  ;;  %v454_v2 = vsel %vm448_vm0, %v4167_v59, 0.0 }
  0x43   : > { %v451_v0 = vadd.f32 %v450_v61, %v449_v60  ;;  %v489_v3 = vadd.f32 %v488_v63, %v487_v62  ;;  %v490_v4 = vsel %vm486_vm1, %v4165_v58, 0.0  ;;  %v492_v5 = vsel %vm486_vm1, %v4167_v59, 0.0 }
  0x44   : > { %v469_v7 = vsel %vm467_vm2, %v4163_v57, 0.0  ;;  %v471_v11 = vsel %vm467_vm2, %v4165_v58, 0.0  ;;  %v473_v12 = vsel %vm467_vm2, %v4167_v59, 0.0  ;;  %v507_v14 = vsel %vm505_vm3, %v4163_v57, 0.0 }
  0x45   : > { %v453_v8 = vadd.f32 %v452_v1, %v451_v0  ;;  %v491_v9 = vadd.f32 %v490_v4, %v489_v3  ;;  %v470_v10 = vadd.f32 %v469_v7, %v468_v6  ;;  %v509_v15 = vsel %vm505_vm3, %v4165_v58, 0.0 }
  0x46   : > { %v508_v19 = vadd.f32 %v507_v14, %v506_v13  ;;  %v511_v20 = vsel %vm505_vm3, %v4167_v59, 0.0  ;;  %v563_v21 = vsel %vm562_vm4, %v4161_v56, 0.0  ;;  %v564_v22 = vsel %vm562_vm4, %v4163_v57, 0.0 }
  0x47   : > { %v455_v16 = vadd.f32 %v454_v2, %v453_v8  ;;  %v493_v17 = vadd.f32 %v492_v5, %v491_v9  ;;  %v472_v18 = vadd.f32 %v471_v11, %v470_v10  ;;  %v566_v23 = vsel %vm562_vm4, %v4165_v58, 0.0 }
  0x48   : > { %v510_v27 = vadd.f32 %v509_v15, %v508_v19  ;;  %v565_v28 = vadd.f32 %v564_v22, %v563_v21  ;;  %v568_v29 = vsel %vm562_vm4, %v4167_v59, 0.0  ;;  %v525_v30 = vsel %vm524_vm5, %v4161_v56, 0.0 }
  0x49   : > { %v456_v24 = vrot.slane %v455_v16, 4  ;;  %v494_v25 = vrot.slane %v493_v17, 4  ;;  %v474_v26 = vadd.f32 %v473_v12, %v472_v18  ;;  %v526_v31 = vsel %vm524_vm5, %v4163_v57, 0.0 }
  0x4a   : > { %v512_v35 = vadd.f32 %v511_v20, %v510_v27  ;;  %v567_v36 = vadd.f32 %v566_v23, %v565_v28  ;;  %v527_v37 = vadd.f32 %v526_v31, %v525_v30  ;;  %v528_v38 = vsel %vm524_vm5, %v4165_v58, 0.0 }
  0x4b   : > { %v457_v32 = vadd.f32 %v456_v24, %v455_v16  ;;  %v495_v33 = vadd.f32 %v494_v25, %v493_v17  ;;  %v475_v34 = vrot.slane %v474_v26, 4  ;;  %v530_v39 = vsel %vm524_vm5, %v4167_v59, 0.0 }
  0x4c   : > { %v513_v43 = vrot.slane %v512_v35, 4  ;;  %v569_v44 = vadd.f32 %v568_v29, %v567_v36  ;;  %v529_v45 = vadd.f32 %v528_v38, %v527_v37  ;;  %v544_v52 = vsel %vm543_vm6, %v4161_v56, 0.0 }
  0x4d   : > { %v458_v40 = vrot.slane %v457_v32, 2  ;;  %v496_v41 = vrot.slane %v495_v33, 2  ;;  %v476_v42 = vadd.f32 %v475_v34, %v474_v26  ;;  %v545_v53 = vsel %vm543_vm6, %v4163_v57, 0.0 }
  0x4e   : > { %v514_v49 = vadd.f32 %v513_v43, %v512_v35  ;;  %v570_v50 = vrot.slane %v569_v44, 4  ;;  %v531_v51 = vadd.f32 %v530_v39, %v529_v45  ;;  %v546_v0 = vadd.f32 %v545_v53, %v544_v52 }
  0x4f   : > { %v459_v46 = vadd.f32 %v458_v40, %v457_v32  ;;  %v497_v47 = vadd.f32 %v496_v41, %v495_v33  ;;  %v477_v48 = vrot.slane %v476_v42, 2  ;;  %v547_v1 = vsel %vm543_vm6, %v4165_v58, 0.0 }
  0x50   : > { %v515_v61 = vrot.slane %v514_v49, 2  ;;  %v571_v62 = vadd.f32 %v570_v50, %v569_v44  ;;  %v532_v63 = vrot.slane %v531_v51, 4  ;;  %v548_v6 = vadd.f32 %v547_v1, %v546_v0 }
  0x51   : > { %v460_v54 = vrot.slane %v459_v46, 1  ;;  %v498_v55 = vrot.slane %v497_v47, 1  ;;  %v478_v60 = vadd.f32 %v477_v48, %v476_v42  ;;  %v549_v7 = vsel %vm543_vm6, %v4167_v59, 0.0 }
  0x52   : > { %v516_v4 = vadd.f32 %v515_v61, %v514_v49  ;;  %v533_v5 = vadd.f32 %v532_v63, %v531_v51  ;;  %v572_v10 = vrot.slane %v571_v62, 2  ;;  %v550_v12 = vadd.f32 %v549_v7, %v548_v6 }
  0x53   : > { %v461_v2 = vadd.f32 %v460_v54, %v459_v46  ;;  %v499_v3 = vadd.f32 %v498_v55, %v497_v47  ;;  %v479_v8 = vrot.slane %v478_v60, 1  ;;  %v435_v27 = vsel %vm404_vm7, %v4163_v57, 0.0 }
  0x54   : > { %v517_v9 = vrot.slane %v516_v4, 1  ;;  %v534_v11 = vrot.slane %v533_v5, 2  ;;  %v551_v14 = vrot.slane %v550_v12, 4  ;;  %v573_v17 = vadd.f32 %v572_v10, %v571_v62 }
  0x55   : > { %463 = vrot.lane.b32.xlu0 %v461_v2, %s3953_s30  ;;  %501 = vrot.lane.b32.xlu1 %v499_v3, %s3954_s12  ;;  %v480_v15 = vadd.f32 %v479_v8, %v478_v60  ;;  %v434_v28 = vsel %vm404_vm7, %v4161_v56, 0.0  ;;  %v437_v30 = vsel %vm404_vm7, %v4165_v58, 0.0  ;;  %v439_v32 = vsel %vm404_vm7, %v4167_v59, 0.0 }
  0x56   : > { %v535_v13 = vadd.f32 %v534_v11, %v533_v5  ;;  %v518_v16 = vadd.f32 %v517_v9, %v516_v4  ;;  %v552_v19 = vadd.f32 %v551_v14, %v550_v12  ;;  %v574_v22 = vrot.slane %v573_v17, 1 }
  0x57   : > { %v436_v29 = vadd.f32 %v435_v27, %v434_v28  ;;  %v3960_v55 = vmov 1024.0  }
  0x58   : > { %v536_v18 = vrot.slane %v535_v13, 1  ;;  %v553_v21 = vrot.slane %v552_v19, 2  ;;  %v575_v25 = vadd.f32 %v574_v22, %v573_v17  ;;  %3808 = vrcp.f32 %v3960_v55 }
  0x59   : > { %v438_v31 = vadd.f32 %v437_v30, %v436_v29 }
  0x5a   : > { %v537_v20 = vadd.f32 %v536_v18, %v535_v13  ;;  %v554_v23 = vadd.f32 %v553_v21, %v552_v19 }
  0x5b   : > { %v440_v33 = vadd.f32 %v439_v32, %v438_v31 }
  0x5c   : > { %539 = vrot.lane.b32.xlu2 %v537_v20, %s3957_s17  ;;  %v555_v24 = vrot.slane %v554_v23, 1 }
  0x5d   : > { %482 = vrot.lane.b32.xlu0 %v480_v15, %s3955_s13  ;;  %520 = vrot.lane.b32.xlu1 %v518_v16, %s3956_s16  ;;  %v441_v34 = vrot.slane %v440_v33, 4 }
  0x5e   : > { %v556_v26 = vadd.f32 %v555_v24, %v554_v23  ;;  %v3809_v60 = vpop.eup %3808 }
  0x5f   : > { %v442_v35 = vadd.f32 %v441_v34, %v440_v33  ;;  %v586_v61 = vmul.f32 1024.0, %v3809_v60  ;;  %vm590_vm9 = vweird.f32 %v3809_v60 }
  0x61   : > { %v443_v36 = vrot.slane %v442_v35, 2  ;;  %v587_v62 = vsub.f32 1.0, %v586_v61 }
  0x63   : > { %v444_v37 = vadd.f32 %v443_v36, %v442_v35  ;;  %v588_v63 = vmul.f32 %v3809_v60, %v587_v62 }
  0x64   : > { %558 = vrot.lane.b32.xlu2 %v556_v26, %s3959_s9 }
  0x65   : > { %577 = vrot.lane.b32.xlu0 %v575_v25, %s3958_s18  ;;  %v445_v38 = vrot.slane %v444_v37, 1  ;;  %v589_v0 = vadd.f32 %v3809_v60, %v588_v63 }
  0x67   : > { %v446_v41 = vadd.f32 %v445_v38, %v444_v37  ;;  %v4241_v1 = vsel %vm590_vm9, %v3809_v60, %v589_v0  ;;  %vm1071_vm9 = vcmask 650560  }
  0xb6   : > { %v540_v42 = vpop.permute.xlu2 %539 }
  0xbe   : > { %v559_v49 = vpop.permute.xlu2 %558 }
  0xc7   : > { %v464_v39 = vpop.permute.xlu0 %463  ;;  %v502_v40 = vpop.permute.xlu1 %501 }
  0xc8   : > { %v466_v43 = vadd.f32 %v464_v39, %v446_v41 }
  0xcf   : > { %v483_v44 = vpop.permute.xlu0 %482  ;;  %v521_v46 = vpop.permute.xlu1 %520 }
  0xd0   : > { %v485_v45 = vadd.f32 %v483_v44, %v466_v43 }
  0xd2   : > { %v504_v47 = vadd.f32 %v502_v40, %v485_v45 }
  0xd4   : > { %v523_v48 = vadd.f32 %v521_v46, %v504_v47 }
  0xd6   : > { %v542_v50 = vadd.f32 %v540_v42, %v523_v48 }
  0xd7   : > { %v578_v51 = vpop.permute.xlu0 %577 }
  0xd8   : > { %v561_v52 = vadd.f32 %v559_v49, %v542_v50 }
  0xda   : > { %v580_v53 = vadd.f32 %v578_v51, %v561_v52 }
  0xdc   : > { %v582_v54 = vsel %vm581_vm8, %v580_v53, 0.0 }
  0xdd   : > { %583 = vadd.xlane.f32.xlu1 %v582_v54 }
 0x150   : > { %v584_v2 = vpop.xlane.xlu1 %583 }
 0x151   : > { %v4244_v3 = vmul.f32 %v4241_v1, %v584_v2 }
 0x153   : > { %v593_v4 = vperm.slane %v4244_v3, 0 }
 0x155   : > { %v594_v5 = vsub.f32 %v4161_v56, %v593_v4  ;;  %v595_v6 = vsub.f32 %v4163_v57, %v593_v4  ;;  %v596_v7 = vsub.f32 %v4165_v58, %v593_v4  ;;  %v597_v8 = vsub.f32 %v4167_v59, %v593_v4 }
 0x157   : > { %v4251_v9 = vmul.f32 %v594_v5, %v594_v5  ;;  %v4253_v10 = vmul.f32 %v595_v6, %v595_v6  ;;  %v4255_v11 = vmul.f32 %v596_v7, %v596_v7  ;;  %v4257_v12 = vmul.f32 %v597_v8, %v597_v8 }
 0x159   : > { %v634_v13 = vsel %vm467_vm2, %v4251_v9, 0.0  ;;  %v635_v14 = vsel %vm467_vm2, %v4253_v10, 0.0  ;;  %v637_v15 = vsel %vm467_vm2, %v4255_v11, 0.0  ;;  %v639_v16 = vsel %vm467_vm2, %v4257_v12, 0.0 }
 0x15a   : > { %v636_v17 = vadd.f32 %v635_v14, %v634_v13  ;;  %v616_v18 = vsel %vm448_vm0, %v4251_v9, 0.0  ;;  %v617_v19 = vsel %vm448_vm0, %v4253_v10, 0.0  ;;  %v619_v20 = vsel %vm448_vm0, %v4255_v11, 0.0 }
 0x15b   : > { %v618_v21 = vadd.f32 %v617_v19, %v616_v18  ;;  %v621_v22 = vsel %vm448_vm0, %v4257_v12, 0.0  ;;  %v670_v23 = vsel %vm505_vm3, %v4251_v9, 0.0  ;;  %v671_v24 = vsel %vm505_vm3, %v4253_v10, 0.0 }
 0x15c   : > { %v638_v25 = vadd.f32 %v637_v15, %v636_v17  ;;  %v672_v26 = vadd.f32 %v671_v24, %v670_v23  ;;  %v673_v27 = vsel %vm505_vm3, %v4255_v11, 0.0  ;;  %v675_v28 = vsel %vm505_vm3, %v4257_v12, 0.0 }
 0x15d   : > { %v620_v29 = vadd.f32 %v619_v20, %v618_v21  ;;  %v652_v30 = vsel %vm486_vm1, %v4251_v9, 0.0  ;;  %v653_v31 = vsel %vm486_vm1, %v4253_v10, 0.0  ;;  %v655_v32 = vsel %vm486_vm1, %v4255_v11, 0.0 }
 0x15e   : > { %v640_v33 = vadd.f32 %v639_v16, %v638_v25  ;;  %v674_v34 = vadd.f32 %v673_v27, %v672_v26  ;;  %v654_v35 = vadd.f32 %v653_v31, %v652_v30  ;;  %v657_v36 = vsel %vm486_vm1, %v4257_v12, 0.0 }
 0x15f   : > { %v622_v37 = vadd.f32 %v621_v22, %v620_v29  ;;  %v706_v38 = vsel %vm543_vm6, %v4251_v9, 0.0  ;;  %v707_v39 = vsel %vm543_vm6, %v4253_v10, 0.0  ;;  %v709_v40 = vsel %vm543_vm6, %v4255_v11, 0.0 }
 0x160   : > { %v641_v41 = vrot.slane %v640_v33, 4  ;;  %v676_v42 = vadd.f32 %v675_v28, %v674_v34  ;;  %v656_v43 = vadd.f32 %v655_v32, %v654_v35  ;;  %v708_v44 = vadd.f32 %v707_v39, %v706_v38 }
 0x161   : > { %v623_v45 = vrot.slane %v622_v37, 4  ;;  %v711_v46 = vsel %vm543_vm6, %v4257_v12, 0.0  ;;  %v688_v47 = vsel %vm524_vm5, %v4251_v9, 0.0  ;;  %v689_v48 = vsel %vm524_vm5, %v4253_v10, 0.0 }
 0x162   : > { %v642_v49 = vadd.f32 %v641_v41, %v640_v33  ;;  %v677_v50 = vrot.slane %v676_v42, 4  ;;  %v658_v51 = vadd.f32 %v657_v36, %v656_v43  ;;  %v710_v52 = vadd.f32 %v709_v40, %v708_v44 }
 0x163   : > { %v624_v53 = vadd.f32 %v623_v45, %v622_v37  ;;  %v690_v54 = vadd.f32 %v689_v48, %v688_v47  ;;  %v691_v55 = vsel %vm524_vm5, %v4255_v11, 0.0  ;;  %v693_v60 = vsel %vm524_vm5, %v4257_v12, 0.0 }
 0x164   : > { %v643_v61 = vrot.slane %v642_v49, 2  ;;  %v678_v62 = vadd.f32 %v677_v50, %v676_v42  ;;  %v659_v63 = vrot.slane %v658_v51, 4  ;;  %v712_v0 = vadd.f32 %v711_v46, %v710_v52 }
 0x165   : > { %v625_v2 = vrot.slane %v624_v53, 2  ;;  %v692_v4 = vadd.f32 %v691_v55, %v690_v54  ;;  %v724_v5 = vsel %vm562_vm4, %v4251_v9, 0.0  ;;  %v725_v6 = vsel %vm562_vm4, %v4253_v10, 0.0 }
 0x166   : > { %v644_v7 = vadd.f32 %v643_v61, %v642_v49  ;;  %v679_v8 = vrot.slane %v678_v62, 2  ;;  %v660_v13 = vadd.f32 %v659_v63, %v658_v51  ;;  %v713_v14 = vrot.slane %v712_v0, 4 }
 0x167   : > { %v626_v15 = vadd.f32 %v625_v2, %v624_v53  ;;  %v694_v16 = vadd.f32 %v693_v60, %v692_v4  ;;  %v726_v17 = vadd.f32 %v725_v6, %v724_v5  ;;  %v727_v20 = vsel %vm562_vm4, %v4255_v11, 0.0 }
 0x168   : > { %v645_v18 = vrot.slane %v644_v7, 1  ;;  %v661_v19 = vrot.slane %v660_v13, 2  ;;  %v680_v22 = vadd.f32 %v679_v8, %v678_v62  ;;  %v714_v27 = vadd.f32 %v713_v14, %v712_v0 }
 0x169   : > { %v627_v21 = vrot.slane %v626_v15, 1  ;;  %v695_v23 = vrot.slane %v694_v16, 4  ;;  %v728_v24 = vadd.f32 %v727_v20, %v726_v17  ;;  %v729_v28 = vsel %vm562_vm4, %v4257_v12, 0.0 }
 0x16a   : > { %v646_v25 = vadd.f32 %v645_v18, %v644_v7  ;;  %v662_v26 = vadd.f32 %v661_v19, %v660_v13  ;;  %v603_v32 = vsel %vm404_vm7, %v4253_v10, 0.0  ;;  %v602_v33 = vsel %vm404_vm7, %v4251_v9, 0.0 }
 0x16b   : > { %v628_v29 = vadd.f32 %v627_v21, %v626_v15  ;;  %v696_v30 = vadd.f32 %v695_v23, %v694_v16  ;;  %v730_v31 = vadd.f32 %v729_v28, %v728_v24  ;;  %v681_v34 = vrot.slane %v680_v22, 1 }
 0x16c   : > { %648 = vrot.lane.b32.xlu0 %v646_v25, %s3955_s13  ;;  %v715_v35 = vrot.slane %v714_v27, 2  ;;  %v604_v36 = vadd.f32 %v603_v32, %v602_v33  ;;  %v663_v37 = vrot.slane %v662_v26, 1  ;;  %v605_v40 = vsel %vm404_vm7, %v4255_v11, 0.0 }
 0x16d   : > { %630 = vrot.lane.b32.xlu2 %v628_v29, %s3953_s30  ;;  %v697_v38 = vrot.slane %v696_v30, 2  ;;  %v731_v39 = vrot.slane %v730_v31, 4  ;;  %v607_v10 = vsel %vm404_vm7, %v4257_v12, 0.0  ;;  %v682_v42 = vadd.f32 %v681_v34, %v680_v22  ;;  %s3965_s30 = smov 4  }
 0x16e   : > { %v606_v41 = vadd.f32 %v605_v40, %v604_v36  ;;  %v716_v43 = vadd.f32 %v715_v35, %v714_v27  ;;  %v664_v45 = vadd.f32 %v663_v37, %v662_v26  ;;  %v3961_v53 = vmov 0.0  }
 0x16f   : > { %v698_v46 = vadd.f32 %v697_v38, %v696_v30  ;;  %v732_v9 = vadd.f32 %v731_v39, %v730_v31  ;;  %385 = vst.msk [vmem:[#allocation2] sm:$0xff] %vm384_vm10, %v3961_v53  ;;  %v432_v39 = vld [vmem:[%s5358_s1] sm:$0x1] }
 0x170   : > { %v4325_v44 = vadd.f32 %v607_v10, %v606_v41  ;;  %v717_v47 = vrot.slane %v716_v43, 1  ;;  %387 = vst.msk [vmem:[#allocation2 + $0x8] sm:$0x3] %vm386_vm11, %v3961_v53 }
 0x171   : > { %v699_v48 = vrot.slane %v698_v46, 1  ;;  %v733_v49 = vrot.slane %v732_v9, 2  ;;  %392 = vst.msk [vmem:[#allocation2] sm:$0x1] %vm391_vm12, %v3961_v53 }
 0x172   : > { %v718_v50 = vadd.f32 %v717_v47, %v716_v43  ;;  %398 = vst.msk [vmem:[#allocation2 + $0x9] sm:$0x1] %vm391_vm12, %v3961_v53  ;;  %v609_v62 = vrot.slane %v4325_v44, 4 }
 0x173   : > { %v700_v11 = vadd.f32 %v699_v48, %v698_v46  ;;  %v734_v51 = vadd.f32 %v733_v49, %v732_v9  ;;  %405 = vst.msk [vmem:[#allocation2] sm:$0xff] %vm404_vm7, %v3961_v53 }
 0x174   : > { %684 = vrot.lane.b32.xlu0 %v682_v42, %s3956_s16  ;;  %407 = vst.msk [vmem:[#allocation2 + $0x8] sm:$0x3] %vm406_vm13, %v3961_v53  ;;  %v610_v63 = vadd.f32 %v609_v62, %v4325_v44 }
 0x175   : > { %666 = vrot.lane.b32.xlu2 %v664_v45, %s3954_s12  ;;  %v735_v12 = vrot.slane %v734_v51, 1  ;;  %419 = vst.msk [vmem:[#allocation2] sm:$0xff] %vm418_vm14, %v3961_v53  ;;  %s5371_s12 = smov 16  }
 0x176   : > { %421 = vst.msk [vmem:[#allocation2 + $0x8] sm:$0x3] %vm420_vm15, %v3961_v53  ;;  %v611_v2 = vrot.slane %v610_v63, 2 }
 0x177   : > { %v736_v52 = vadd.f32 %v735_v12, %v734_v51  ;;  %389 = vst.msk [vmem:[#allocation2 + $0x50] sm:$0xff] %vm384_vm10, %v3961_v53  ;;  %vm1100_vm10 = vcmask 978560  }
 0x178   : > { %390 = vst.msk [vmem:[#allocation2 + $0x58] sm:$0x3] %vm386_vm11, %v3961_v53  ;;  %v612_v6 = vadd.f32 %v611_v2, %v610_v63 }
 0x179   : > { %393 = vst.msk [vmem:[#allocation2 + $0x10] sm:$0x1] %vm391_vm12, %v3961_v53 }
 0x17a   : > { %394 = vst.msk [vmem:[#allocation2 + $0x20] sm:$0x1] %vm391_vm12, %v3961_v53  ;;  %v613_v7 = vrot.slane %v612_v6, 1 }
 0x17b   : > { %395 = vst.msk [vmem:[#allocation2 + $0x30] sm:$0x1] %vm391_vm12, %v3961_v53 }
 0x17c   : > { %720 = vrot.lane.b32.xlu0 %v718_v50, %s3959_s9  ;;  %396 = vst.msk [vmem:[#allocation2 + $0x40] sm:$0x1] %vm391_vm12, %v3961_v53  ;;  %v1034_v4 = vld [vmem:[#allocation2] sm:$0xff]  ;;  %v614_v14 = vadd.f32 %v613_v7, %v612_v6 }
 0x17d   : > { %702 = vrot.lane.b32.xlu2 %v700_v11, %s3957_s17  ;;  %v1076_v54 = vld [vmem:[#allocation2 + $0x2] sm:$0xff]  ;;  %399 = vst.msk [vmem:[#allocation2 + $0x19] sm:$0x1] %vm391_vm12, %v3961_v53  ;;  %v1038_v5 = vpack.c.bf16 %v1034_v4, %v1034_v4  ;;  %s3967_s17 = smov 28  }
 0x17e   : > { %v1080_v55 = vpack.c.bf16 %v1076_v54, %v1076_v54  ;;  %400 = vst.msk [vmem:[#allocation2 + $0x29] sm:$0x1] %vm391_vm12, %v3961_v53  ;;  %v1047_v60 = vld [vmem:[#allocation2 + $0x1] sm:$0xff] }
 0x17f   : > { %401 = vst.msk [vmem:[#allocation2 + $0x39] sm:$0x1] %vm391_vm12, %v3961_v53  ;;  %v1051_v61 = vpack.c.bf16 %v1047_v60, %v1047_v60 }
 0x180   : > { %402 = vst.msk [vmem:[#allocation2 + $0x49] sm:$0x1] %vm391_vm12, %v3961_v53 }
 0x181   : > { %397 = vst.msk [vmem:[#allocation2 + $0x50] sm:$0x1] %vm391_vm12, %v3961_v53 }
 0x182   : > { %403 = vst.msk [vmem:[#allocation2 + $0x59] sm:$0x1] %vm391_vm12, %v3961_v53 }
 0x183   : > { %408 = vst.msk [vmem:[#allocation2 + $0x10] sm:$0xff] %vm404_vm7, %v3961_v53 }
 0x184   : > { %1088 = vrot.lane.b32.xlu0 %v1080_v55, %s3962_s10  ;;  %409 = vst.msk [vmem:[#allocation2 + $0x18] sm:$0x3] %vm406_vm13, %v3961_v53 }
 0x185   : > { %738 = vrot.lane.b32.xlu2 %v736_v52, %s3958_s18  ;;  %410 = vst.msk [vmem:[#allocation2 + $0x20] sm:$0xff] %vm404_vm7, %v3961_v53  ;;  %s5367_s18 = smov 8  }
 0x186   : > { %411 = vst.msk [vmem:[#allocation2 + $0x28] sm:$0x3] %vm406_vm13, %v3961_v53 }
 0x187   : > { %412 = vst.msk [vmem:[#allocation2 + $0x30] sm:$0xff] %vm404_vm7, %v3961_v53 }
 0x188   : > { %413 = vst.msk [vmem:[#allocation2 + $0x38] sm:$0x3] %vm406_vm13, %v3961_v53 }
 0x189   : > { %414 = vst.msk [vmem:[#allocation2 + $0x40] sm:$0xff] %vm404_vm7, %v3961_v53 }
 0x18a   : > { %415 = vst.msk [vmem:[#allocation2 + $0x48] sm:$0x3] %vm406_vm13, %v3961_v53 }
 0x18b   : > { %416 = vst.msk [vmem:[#allocation2 + $0x50] sm:$0xff] %vm404_vm7, %v3961_v53  ;;  %vm1042_vm7 = vcmask 322560  }
 0x18c   : > { %417 = vst.msk [vmem:[#allocation2 + $0x58] sm:$0x3] %vm406_vm13, %v3961_v53  ;;  %vm1198_vm13 = vcmask 912960  }
 0x18d   : > { %1059 = vrot.lane.b32.xlu2 %v1051_v61, %s5365_s11  ;;  %422 = vst.msk [vmem:[#allocation2 + $0x10] sm:$0xff] %vm418_vm14, %v3961_v53 }
 0x18e   : > { %423 = vst.msk [vmem:[#allocation2 + $0x18] sm:$0x3] %vm420_vm15, %v3961_v53 }
 0x18f   : > { %424 = vst.msk [vmem:[#allocation2 + $0x20] sm:$0xff] %vm418_vm14, %v3961_v53 }
 0x190   : > { %425 = vst.msk [vmem:[#allocation2 + $0x28] sm:$0x3] %vm420_vm15, %v3961_v53 }
 0x191   : > { %426 = vst.msk [vmem:[#allocation2 + $0x30] sm:$0xff] %vm418_vm14, %v3961_v53 }
 0x192   : > { %427 = vst.msk [vmem:[#allocation2 + $0x38] sm:$0x3] %vm420_vm15, %v3961_v53 }
 0x193   : > { %428 = vst.msk [vmem:[#allocation2 + $0x40] sm:$0xff] %vm418_vm14, %v3961_v53 }
 0x194   : > { %429 = vst.msk [vmem:[#allocation2 + $0x48] sm:$0x3] %vm420_vm15, %v3961_v53 }
 0x195   : > { %430 = vst.msk [vmem:[#allocation2 + $0x50] sm:$0xff] %vm418_vm14, %v3961_v53  ;;  %vm1237_vm14 = vcmask 1044352  }
 0x196   : > { %431 = vst.msk [vmem:[#allocation2 + $0x58] sm:$0x3] %vm420_vm15, %v3961_v53  ;;  %vm1238_vm15 = vcmask 195588  }
 0x197   : > { %1043 = vst.msk [vmem:[#allocation3] sm:$0xf] %vm1042_vm7, %v1038_v5 }
 0x19c   : > { %v1207_v29 = vld [vmem:[#allocation2 + $0x50] sm:$0xff] }
 0x19d   : > { %v1211_v30 = vpack.c.bf16 %v1207_v29, %v1207_v29 }
 0x19f   : > { %1222 = vrot.lane.b32.xlu2 %v1211_v30, %s3956_s16 }
 0x1c7   : > { %v631_v0 = vpop.permute.xlu2 %630 }
 0x1c8   : > { %v633_v15 = vadd.f32 %v631_v0, %v614_v14 }
 0x1cf   : > { %v667_v8 = vpop.permute.xlu2 %666 }
 0x1d7   : > { %v703_v17 = vpop.permute.xlu2 %702 }
 0x1de   : > { %v649_v13 = vpop.permute.xlu0 %648 }
 0x1df   : > { %v651_v16 = vadd.f32 %v649_v13, %v633_v15  ;;  %v739_v24 = vpop.permute.xlu2 %738 }
 0x1e1   : > { %v669_v19 = vadd.f32 %v667_v8, %v651_v16 }
 0x1e6   : > { %v685_v18 = vpop.permute.xlu0 %684 }
 0x1e7   : > { %v687_v20 = vadd.f32 %v685_v18, %v669_v19  ;;  %v1060_v27 = vpop.permute.xlu2 %1059 }
 0x1e8   : > { %1072 = vst.msk [vmem:[#allocation3] sm:$0xf] %vm1071_vm9, %v1060_v27 }
 0x1e9   : > { %v705_v21 = vadd.f32 %v703_v17, %v687_v20 }
 0x1ee   : > { %v721_v22 = vpop.permute.xlu0 %720 }
 0x1ef   : > { %v723_v23 = vadd.f32 %v721_v22, %v705_v21 }
 0x1f1   : > { %v741_v25 = vadd.f32 %v739_v24, %v723_v23 }
 0x1f3   : > { %v742_v26 = vsel %vm581_vm8, %v741_v25, 0.0 }
 0x1f4   : > { %743 = vadd.xlane.f32.xlu0 %v742_v26 }
 0x1f6   : > { %v1089_v28 = vpop.permute.xlu0 %1088 }
 0x1f7   : > { %1101 = vst.msk [vmem:[#allocation3] sm:$0xf] %vm1100_vm10, %v1089_v28 }
 0x1f9   : > { %v4441_v51 = vpop.permute.xlu2 %1222 }
 0x267   : > { %v744_v31 = vpop.xlane.xlu0 %743 }
 0x268   : > { %v745_v32 = vmul.f32 %v744_v31, %v4241_v1  ;;  %v433_v1 = vld [vmem:[%s5359_s2] sm:$0x1] }
 0x26a   : > { %v746_v33 = vadd.f32 1e-05, %v745_v32 }
 0x26c   : > { %3810 = vrsqrt.f32 %v746_v33  ;;  %vm753_vm11 = vweird.f32 %v746_v33 }
 0x272   : > { %v3811_v34 = vpop.eup %3810 }
 0x273   : > { %v748_v35 = vmul.f32 %v3811_v34, %v746_v33  ;;  %vm754_vm8 = vweird.f32 %v3811_v34 }
 0x274   : > { %vm755_vm12 = vmor %vm753_vm11, %vm754_vm8  ;;  %vm5379_vm8 = vcmask 916480   ;;  %vm1268_vm11 = vcmask 519360  }
 0x275   : > { %v749_v36 = vmul.f32 %v3811_v34, %v748_v35 }
 0x277   : > { %v750_v37 = vmul.f32 0.5, %v749_v36 }
 0x279   : > { %v751_v38 = vsub.f32 1.5, %v750_v37 }
 0x27b   : > { %v752_v40 = vmul.f32 %v3811_v34, %v751_v38 }
 0x27d   : > { %v756_v41 = vsel %vm755_vm12, %v3811_v34, %v752_v40  ;;  %vm1297_vm12 = vcmask 847360  }
 0x27e   : > { %v757_v10 = vmul.f32 %v756_v41, %v432_v39 }
 0x280   : > { %v758_v42 = vmul.f32 %v757_v10, %v4244_v3  ;;  %v761_v43 = vperm.slane %v757_v10, 0 }
 0x282   : > { %v759_v44 = vsub.f32 %v433_v1, %v758_v42  ;;  %965 = vrot.lane.b32.xlu1 %v761_v43, %s5377_s6  ;;  %795 = vrot.lane.b32.xlu2 %v761_v43, %s3965_s30  ;;  %v763_v46 = vmul.f32 %v761_v43, %v4161_v56  ;;  %v765_v9 = vmul.f32 %v761_v43, %v4165_v58 }
 0x283   : > { %v766_v48 = vmul.f32 %v761_v43, %v4167_v59  ;;  %v764_v50 = vmul.f32 %v761_v43, %v4163_v57 }
 0x284   : > { %v768_v45 = vperm.slane %v759_v44, 0 }
 0x286   : > { %904 = vrot.lane.b32.xlu0 %v768_v45, %s5371_s12  ;;  %v770_v3 = vadd.f32 %v768_v45, %v763_v46  ;;  %v772_v47 = vadd.f32 %v768_v45, %v765_v9  ;;  %v773_v49 = vadd.f32 %v768_v45, %v766_v48  ;;  %v771_v11 = vadd.f32 %v768_v45, %v764_v50 }
 0x28a   : > { %999 = vrot.lane.b32.xlu1 %v761_v43, %s3967_s17  ;;  %829 = vrot.lane.b32.xlu2 %v761_v43, %s5367_s18 }
 0x28e   : > { %778 = vrot.lane.b32.xlu0 %v770_v3, %s3965_s30 }
 0x292   : > { %863 = vrot.lane.b32.xlu2 %v761_v43, %s3969_s22  ;;  %802 = vrot.lane.b32.xlu1 %v768_v45, %s3965_s30 }
 0x296   : > { %782 = vrot.lane.b32.xlu0 %v772_v47, %s3965_s30 }
 0x29a   : > { %897 = vrot.lane.b32.xlu2 %v761_v43, %s5371_s12  ;;  %870 = vrot.lane.b32.xlu1 %v768_v45, %s3969_s22  ;;  %s5391_s12 = smov 72   ;;  %s5395_s22 = smov 40  }
 0x29e   : > { %784 = vrot.lane.b32.xlu0 %v773_v49, %s3965_s30 }
 0x2a2   : > { %931 = vrot.lane.b32.xlu2 %v761_v43, %s3970_s14  ;;  %1006 = vrot.lane.b32.xlu1 %v768_v45, %s3967_s17  ;;  %s3977_s17 = smov 48  }
 0x2aa   : > { %836 = vrot.lane.b32.xlu2 %v768_v45, %s5367_s18  ;;  %s5392_s18 = smov 24  }
 0x2b2   : > { %938 = vrot.lane.b32.xlu2 %v768_v45, %s3970_s14  ;;  %s3975_s14 = smov 96  }
 0x2ba   : > { %972 = vrot.lane.b32.xlu2 %v768_v45, %s5377_s6 }
 0x2c2   : > { %780 = vrot.lane.b32.xlu2 %v771_v11, %s3965_s30 }
 0x2dc   : > { %v4443_v12 = vpop.permute.xlu2 %795 }
 0x2dd   : > { %v798_v2 = vmul.f32 %v4443_v12, %v4161_v56  ;;  %v799_v5 = vmul.f32 %v4443_v12, %v4163_v57  ;;  %v800_v20 = vmul.f32 %v4443_v12, %v4165_v58 }
 0x2e4   : > { %v4445_v52 = vpop.permute.xlu2 %829 }
 0x2e5   : > { %v832_v4 = vmul.f32 %v4445_v52, %v4161_v56  ;;  %v833_v16 = vmul.f32 %v4445_v52, %v4163_v57  ;;  %v834_v28 = vmul.f32 %v4445_v52, %v4165_v58 }
 0x2ec   : > { %v4447_v54 = vpop.permute.xlu2 %863 }
 0x2ed   : > { %v866_v17 = vmul.f32 %v4447_v54, %v4161_v56  ;;  %v867_v25 = vmul.f32 %v4447_v54, %v4163_v57  ;;  %v868_v35 = vmul.f32 %v4447_v54, %v4165_v58 }
 0x2f4   : > { %v4449_v55 = vpop.permute.xlu1 %965  ;;  %v4451_v60 = vpop.permute.xlu2 %897 }
 0x2f5   : > { %v900_v26 = vmul.f32 %v4451_v60, %v4161_v56  ;;  %v901_v32 = vmul.f32 %v4451_v60, %v4163_v57  ;;  %v968_v40 = vmul.f32 %v4449_v55, %v4161_v56  ;;  %v902_v41 = vmul.f32 %v4451_v60, %v4165_v58 }
 0x2f6   : > { %v969_v44 = vmul.f32 %v4449_v55, %v4163_v57  ;;  %v970_v49 = vmul.f32 %v4449_v55, %v4165_v58 }
 0x2f8   : > { %v4453_v61 = vpop.permute.xlu0 %904 }
 0x2f9   : > { %v907_v30 = vadd.f32 %v4453_v61, %v900_v26  ;;  %v908_v36 = vadd.f32 %v4453_v61, %v901_v32  ;;  %v909_v42 = vadd.f32 %v4453_v61, %v902_v41 }
 0x2fc   : > { %v4455_v62 = vpop.permute.xlu1 %999  ;;  %v4457_v63 = vpop.permute.xlu2 %931 }
 0x2fd   : > { %v934_v33 = vmul.f32 %v4457_v63, %v4161_v56  ;;  %v935_v39 = vmul.f32 %v4457_v63, %v4163_v57  ;;  %v1002_v45 = vmul.f32 %v4455_v62, %v4161_v56  ;;  %v936_v46 = vmul.f32 %v4457_v63, %v4165_v58 }
 0x2fe   : > { %v1003_v48 = vmul.f32 %v4455_v62, %v4163_v57  ;;  %v869_v56 = vmul.f32 %v4447_v54, %v4167_v59  ;;  %v801_v57 = vmul.f32 %v4443_v12, %v4167_v59 }
 0x300   : > { %v779_v0 = vpop.permute.xlu0 %778 }
 0x301   : > { %791 = vst.msk [vmem:[#allocation2 + $0x11] sm:$0xff] %vm448_vm0, %v779_v0 }
 0x304   : > { %v4466_v6 = vpop.permute.xlu2 %836  ;;  %v4468_v7 = vpop.permute.xlu1 %802 }
 0x305   : > { %v805_v8 = vadd.f32 %v4468_v7, %v798_v2  ;;  %v839_v13 = vadd.f32 %v4466_v6, %v832_v4  ;;  %v806_v14 = vadd.f32 %v4468_v7, %v799_v5  ;;  %v840_v21 = vadd.f32 %v4466_v6, %v833_v16 }
 0x306   : > { %v807_v23 = vadd.f32 %v4468_v7, %v800_v20  ;;  %v841_v31 = vadd.f32 %v4466_v6, %v834_v28  ;;  %v1004_v2 = vmul.f32 %v4455_v62, %v4165_v58  ;;  %v971_v4 = vmul.f32 %v4449_v55, %v4167_v59 }
 0x307   : > { %813 = vrot.lane.b32.xlu1 %v805_v8, %s3965_s30  ;;  %847 = vrot.lane.b32.xlu2 %v839_v13, %s3965_s30  ;;  %v808_v54 = vadd.f32 %v4468_v7, %v801_v57  ;;  %v835_v13 = vmul.f32 %v4445_v52, %v4167_v59  ;;  %v903_v58 = vmul.f32 %v4451_v60, %v4167_v59 }
 0x308   : > { %815 = vrot.lane.b32.xlu0 %v806_v14, %s3965_s30  ;;  %v783_v15 = vpop.permute.xlu0 %782  ;;  %v937_v7 = vmul.f32 %v4457_v63, %v4167_v59  ;;  %v1005_v14 = vmul.f32 %v4455_v62, %v4167_v59 }
 0x309   : > { %793 = vst.msk [vmem:[#allocation2 + $0x31] sm:$0xff] %vm448_vm0, %v783_v15  ;;  %v842_v12 = vadd.f32 %v4466_v6, %v835_v13  ;;  %v910_v55 = vadd.f32 %v4453_v61, %v903_v58  ;;  %v1276_v58 = vld [vmem:[#allocation2 + $0x52] sm:$0xff] }
 0x30c   : > { %v4481_v18 = vpop.permute.xlu2 %938  ;;  %v871_v19 = vpop.permute.xlu1 %870 }
 0x30d   : > { %v873_v22 = vadd.f32 %v871_v19, %v866_v17  ;;  %v874_v29 = vadd.f32 %v871_v19, %v867_v25  ;;  %v941_v37 = vadd.f32 %v4481_v18, %v934_v33  ;;  %v875_v38 = vadd.f32 %v871_v19, %v868_v35 }
 0x30e   : > { %v942_v10 = vadd.f32 %v4481_v18, %v935_v39  ;;  %v943_v47 = vadd.f32 %v4481_v18, %v936_v46  ;;  %v876_v0 = vadd.f32 %v871_v19, %v869_v56  ;;  %v944_v15 = vadd.f32 %v4481_v18, %v937_v7  ;;  %v3640_v7 = vld [vmem:[%s5360_s3 + $0x28] sm:$0xff] }
 0x30f   : > { %849 = vrot.lane.b32.xlu1 %v840_v21, %s3965_s30  ;;  %881 = vrot.lane.b32.xlu2 %v873_v22, %s3965_s30 }
 0x310   : > { %817 = vrot.lane.b32.xlu0 %v807_v23, %s3965_s30  ;;  %v785_v24 = vpop.permute.xlu0 %784 }
 0x311   : > { %794 = vst.msk [vmem:[#allocation2 + $0x41] sm:$0xff] %vm448_vm0, %v785_v24 }
 0x314   : > { %v973_v27 = vpop.permute.xlu2 %972  ;;  %v1007_v43 = vpop.permute.xlu1 %1006 }
 0x315   : > { %v975_v1 = vadd.f32 %v973_v27, %v968_v40  ;;  %v976_v3 = vadd.f32 %v973_v27, %v969_v44  ;;  %v1009_v9 = vadd.f32 %v1007_v43, %v1002_v45  ;;  %v1010_v50 = vadd.f32 %v1007_v43, %v1003_v48 }
 0x316   : > { %v977_v11 = vadd.f32 %v973_v27, %v970_v49  ;;  %v1011_v5 = vadd.f32 %v1007_v43, %v1004_v2  ;;  %v978_v8 = vadd.f32 %v973_v27, %v971_v4  ;;  %v1012_v52 = vadd.f32 %v1007_v43, %v1005_v14 }
 0x317   : > { %883 = vrot.lane.b32.xlu1 %v874_v29, %s3965_s30  ;;  %915 = vrot.lane.b32.xlu2 %v907_v30, %s3965_s30  ;;  %v1280_v14 = vpack.c.bf16 %v1276_v58, %v1276_v58 }
 0x318   : > { %851 = vrot.lane.b32.xlu0 %v841_v31, %s3965_s30 }
 0x31c   : > { %v781_v34 = vpop.permute.xlu2 %780 }
 0x31d   : > { %792 = vst.msk [vmem:[#allocation2 + $0x21] sm:$0xff] %vm448_vm0, %v781_v34  ;;  %vm1029_vm0 = vcmask 294144  }
 0x31f   : > { %917 = vrot.lane.b32.xlu1 %v908_v36, %s3965_s30  ;;  %949 = vrot.lane.b32.xlu2 %v941_v37, %s3965_s30 }
 0x320   : > { %885 = vrot.lane.b32.xlu0 %v875_v38, %s3965_s30 }
 0x327   : > { %951 = vrot.lane.b32.xlu1 %v942_v10, %s3965_s30  ;;  %983 = vrot.lane.b32.xlu2 %v975_v1, %s3965_s30 }
 0x328   : > { %919 = vrot.lane.b32.xlu0 %v909_v42, %s3965_s30 }
 0x32f   : > { %985 = vrot.lane.b32.xlu1 %v976_v3, %s3965_s30  ;;  %1017 = vrot.lane.b32.xlu2 %v1009_v9, %s3965_s30 }
 0x330   : > { %953 = vrot.lane.b32.xlu0 %v943_v47, %s3965_s30 }
 0x337   : > { %1019 = vrot.lane.b32.xlu1 %v1010_v50, %s3965_s30  ;;  %987 = vrot.lane.b32.xlu2 %v977_v11, %s3965_s30 }
 0x338   : > { %887 = vrot.lane.b32.xlu0 %v876_v0, %s3965_s30 }
 0x33f   : > { %1021 = vrot.lane.b32.xlu1 %v1011_v5, %s3965_s30  ;;  %819 = vrot.lane.b32.xlu2 %v808_v54, %s3965_s30  ;;  %v1247_v54 = vld [vmem:[#allocation2 + $0x51] sm:$0xff] }
 0x340   : > { %989 = vrot.lane.b32.xlu0 %v978_v8, %s3965_s30  ;;  %v3642_v8 = vld [vmem:[%s5360_s3 + $0x38] sm:$0xff]  ;;  %v1251_v13 = vpack.c.bf16 %v1247_v54, %v1247_v54 }
 0x341   : > { %1531 = vmatpush.bf16.msra.mxu0 %v3642_v8 }
 0x347   : > { %853 = vrot.lane.b32.xlu1 %v842_v12, %s3965_s30  ;;  %921 = vrot.lane.b32.xlu2 %v910_v55, %s3965_s30  ;;  %v3641_v12 = vld [vmem:[%s5360_s3 + $0x30] sm:$0xff]  ;;  %v3650_v55 = vld [vmem:[%s5360_s3 + $0x78] sm:$0xff] }
 0x348   : > { %1532 = vmatpush.bf16.msra.mxu0 %v3641_v12  ;;  %1550 = vmatpush.bf16.msra.mxu1 %v3650_v55 }
 0x34c   : > { %1533 = vmatpush.bf16.msra.mxu0 %v3640_v7 }
 0x34f   : > { %955 = vrot.lane.b32.xlu1 %v944_v15, %s3965_s30  ;;  %1023 = vrot.lane.b32.xlu2 %v1012_v52, %s3965_s30  ;;  %s5375_s30 = smov 64   ;;  %v3639_v15 = vld [vmem:[%s5360_s3 + $0x20] sm:$0xff]  ;;  %v3638_v52 = vld [vmem:[%s5360_s3 + $0x18] sm:$0xff] }
 0x350   : > { %1534 = vmatpush.bf16.msra.mxu0 %v3639_v15 }
 0x354   : > { %1535 = vmatpush.bf16.msra.mxu0 %v3638_v52 }
 0x361   : > { %v848_v60 = vpop.permute.xlu2 %847 }
 0x369   : > { %v882_v6 = vpop.permute.xlu2 %881 }
 0x371   : > { %v916_v61 = vpop.permute.xlu2 %915 }
 0x379   : > { %v814_v16 = vpop.permute.xlu1 %813  ;;  %v950_v17 = vpop.permute.xlu2 %949 }
 0x37a   : > { %825 = vst.msk [vmem:[#allocation2 + $0x11] sm:$0xff] %vm467_vm2, %v814_v16  ;;  %v816_v19 = vpop.permute.xlu0 %815 }
 0x37b   : > { %859 = vst.msk [vmem:[#allocation2 + $0x11] sm:$0xff] %vm486_vm1, %v848_v60 }
 0x37c   : > { %893 = vst.msk [vmem:[#allocation2 + $0x11] sm:$0xff] %vm505_vm3, %v882_v6 }
 0x37d   : > { %927 = vst.msk [vmem:[#allocation2 + $0x11] sm:$0xff] %vm524_vm5, %v916_v61  ;;  %v1227_v61 = vrot.slane %v4441_v51, 4 }
 0x37e   : > { %961 = vst.msk [vmem:[#allocation2 + $0x11] sm:$0xff] %vm543_vm6, %v950_v17 }
 0x37f   : > { %826 = vst.msk [vmem:[#allocation2 + $0x21] sm:$0xff] %vm467_vm2, %v816_v19 }
 0x381   : > { %v850_v59 = vpop.permute.xlu1 %849  ;;  %v984_v62 = vpop.permute.xlu2 %983 }
 0x382   : > { %860 = vst.msk [vmem:[#allocation2 + $0x21] sm:$0xff] %vm486_vm1, %v850_v59  ;;  %v818_v63 = vpop.permute.xlu0 %817  ;;  %v3649_v59 = vld [vmem:[%s5360_s3 + $0x70] sm:$0xff] }
 0x383   : > { %995 = vst.msk [vmem:[#allocation2 + $0x11] sm:$0xff] %vm562_vm4, %v984_v62  ;;  %v3637_v62 = vld [vmem:[%s5360_s3 + $0x10] sm:$0xff]  ;;  %1551 = vmatpush.bf16.msra.mxu1 %v3649_v59 }
 0x384   : > { %827 = vst.msk [vmem:[#allocation2 + $0x31] sm:$0xff] %vm467_vm2, %v818_v63  ;;  %1536 = vmatpush.bf16.msra.mxu0 %v3637_v62  ;;  %v3648_v63 = vld [vmem:[%s5360_s3 + $0x68] sm:$0xff] }
 0x387   : > { %1552 = vmatpush.bf16.msra.mxu1 %v3648_v63 }
 0x389   : > { %v884_v18 = vpop.permute.xlu1 %883  ;;  %v1018_v20 = vpop.permute.xlu2 %1017 }
 0x38a   : > { %894 = vst.msk [vmem:[#allocation2 + $0x21] sm:$0xff] %vm505_vm3, %v884_v18  ;;  %v852_v21 = vpop.permute.xlu0 %851  ;;  %v3636_v18 = vld [vmem:[%s5360_s3 + $0x8] sm:$0xff] }
 0x38b   : > { %1030 = vst.msk [vmem:[#allocation2 + $0x11] sm:$0xff] %vm1029_vm0, %v1018_v20  ;;  %1537 = vmatpush.bf16.msra.mxu0 %v3636_v18 }
 0x38c   : > { %861 = vst.msk [vmem:[#allocation2 + $0x31] sm:$0xff] %vm486_vm1, %v852_v21  ;;  %v3647_v21 = vld [vmem:[%s5360_s3 + $0x60] sm:$0xff] }
 0x38d   : > { %1553 = vmatpush.bf16.msra.mxu1 %v3647_v21 }
 0x391   : > { %v918_v22 = vpop.permute.xlu1 %917  ;;  %v988_v23 = vpop.permute.xlu2 %987 }
 0x392   : > { %928 = vst.msk [vmem:[#allocation2 + $0x21] sm:$0xff] %vm524_vm5, %v918_v22  ;;  %v886_v24 = vpop.permute.xlu0 %885  ;;  %v1105_v25 = vld [vmem:[#allocation2 + $0x10] sm:$0xff] }
 0x393   : > { %v1077_v26 = vld [vmem:[#allocation2 + $0x12] sm:$0xff]  ;;  %895 = vst.msk [vmem:[#allocation2 + $0x31] sm:$0xff] %vm505_vm3, %v886_v24  ;;  %v1109_v27 = vpack.c.bf16 %v1105_v25, %v1105_v25 }
 0x394   : > { %v1081_v28 = vpack.c.bf16 %v1077_v26, %v1077_v26  ;;  %v1145_v29 = vld [vmem:[#allocation2 + $0x11] sm:$0xff] }
 0x395   : > { %1117 = vrot.lane.b32.xlu1 %v1109_v27, %s3955_s13  ;;  %1044 = vst.msk [vmem:[#allocation3 + $0xc] sm:$0xf] %vm1042_vm7, %v1109_v27  ;;  %v1149_v33 = vpack.c.bf16 %v1145_v29, %v1145_v29  ;;  %v1354_v22 = vld [vmem:[%s5360_s3 + $0xb0] sm:$0xf]  ;;  %v3646_v25 = vld [vmem:[%s5360_s3 + $0x58] sm:$0xff] }
 0x396   : > { %1090 = vrot.lane.b32.xlu2 %v1081_v28, %s3962_s10  ;;  %v1474_v24 = vunpack.c.l.b16 %v1354_v22  ;;  %1554 = vmatpush.bf16.msra.mxu1 %v3646_v25  ;;  %v3645_v29 = vld [vmem:[%s5360_s3 + $0x50] sm:$0xff] }
 0x398   : > { %v1497_v26 = vpack.c.b16 %v1474_v24, %v1474_v24 }
 0x399   : > { %v952_v30 = vpop.permute.xlu1 %951  ;;  %v820_v31 = vpop.permute.xlu2 %819 }
 0x39a   : > { %962 = vst.msk [vmem:[#allocation2 + $0x21] sm:$0xff] %vm543_vm6, %v952_v30  ;;  %v920_v32 = vpop.permute.xlu0 %919  ;;  %1555 = vmatpush.bf16.msra.mxu1 %v3645_v29  ;;  %v3655_v30 = vld [vmem:[%s5360_s3 + $0xa0] sm:$0xff] }
 0x39b   : > { %828 = vst.msk [vmem:[#allocation2 + $0x41] sm:$0xff] %vm467_vm2, %v820_v31  ;;  %vm1139_vm2 = vcmask 261124   ;;  %v3644_v31 = vld [vmem:[%s5360_s3 + $0x48] sm:$0xff] }
 0x39c   : > { %929 = vst.msk [vmem:[#allocation2 + $0x31] sm:$0xff] %vm524_vm5, %v920_v32  ;;  %v3654_v32 = vld [vmem:[%s5360_s3 + $0x98] sm:$0xff] }
 0x39d   : > { %1061 = vrot.lane.b32.xlu1 %v1149_v33, %s5365_s11 }
 0x39e   : > { %1157 = vrot.lane.b32.xlu2 %v1149_v33, %s5369_s29  ;;  %1556 = vmatpush.bf16.msra.mxu1 %v3644_v31  ;;  %v3643_v33 = vld [vmem:[%s5360_s3 + $0x40] sm:$0xff] }
 0x3a1   : > { %v986_v34 = vpop.permute.xlu1 %985  ;;  %v922_v42 = vpop.permute.xlu2 %921 }
 0x3a2   : > { %996 = vst.msk [vmem:[#allocation2 + $0x21] sm:$0xff] %vm562_vm4, %v986_v34  ;;  %v954_v35 = vpop.permute.xlu0 %953  ;;  %1557 = vmatpush.bf16.msra.mxu1 %v3643_v33  ;;  %v3653_v34 = vld [vmem:[%s5360_s3 + $0x90] sm:$0xff] }
 0x3a3   : > { %963 = vst.msk [vmem:[#allocation2 + $0x31] sm:$0xff] %vm543_vm6, %v954_v35 }
 0x3a4   : > { %997 = vst.msk [vmem:[#allocation2 + $0x31] sm:$0xff] %vm562_vm4, %v988_v23  ;;  %v3635_v23 = vld [vmem:[%s5360_s3] sm:$0xff] }
 0x3a5   : > { %1538 = vmatpush.bf16.msra.mxu0 %v3635_v23  ;;  %v1232_v23 = vsel %vm5379_vm8, %v1227_v61, %v4441_v51 }
 0x3a9   : > { %v1020_v36 = vpop.permute.xlu1 %1019  ;;  %v1024_v47 = vpop.permute.xlu2 %1023 }
 0x3aa   : > { %1031 = vst.msk [vmem:[#allocation2 + $0x21] sm:$0xff] %vm1029_vm0, %v1020_v36  ;;  %v888_v1 = vpop.permute.xlu0 %887 }
 0x3b1   : > { %v1022_v37 = vpop.permute.xlu1 %1021  ;;  %v1204_v38 = vld [vmem:[#allocation2 + $0x20] sm:$0xff] }
 0x3b2   : > { %v1175_v39 = vld [vmem:[#allocation2 + $0x22] sm:$0xff]  ;;  %1032 = vst.msk [vmem:[#allocation2 + $0x31] sm:$0xff] %vm1029_vm0, %v1022_v37  ;;  %v1208_v40 = vpack.c.bf16 %v1204_v38, %v1204_v38  ;;  %v990_v9 = vpop.permute.xlu0 %989 }
 0x3b3   : > { %v1179_v41 = vpack.c.bf16 %v1175_v39, %v1175_v39  ;;  %v1146_v10 = vld [vmem:[#allocation2 + $0x21] sm:$0xff] }
 0x3b4   : > { %1216 = vrot.lane.b32.xlu1 %v1208_v40, %s3956_s16  ;;  %1045 = vst.msk [vmem:[#allocation3 + $0x18] sm:$0xf] %vm1042_vm7, %v1208_v40  ;;  %1119 = vrot.lane.b32.xlu0 %v1208_v40, %s3955_s13  ;;  %v1150_v45 = vpack.c.bf16 %v1146_v10, %v1146_v10  ;;  %v3652_v38 = vld [vmem:[%s5360_s3 + $0x88] sm:$0xff] }
 0x3b5   : > { %1188 = vrot.lane.b32.xlu2 %v1179_v41, %s5373_s19 }
 0x3b9   : > { %v854_v43 = vpop.permute.xlu1 %853  ;;  %v1205_v44 = vld [vmem:[#allocation2 + $0x30] sm:$0xff] }
 0x3ba   : > { %862 = vst.msk [vmem:[#allocation2 + $0x41] sm:$0xff] %vm486_vm1, %v854_v43  ;;  %v1209_v46 = vpack.c.bf16 %v1205_v44, %v1205_v44  ;;  %v1274_v48 = vld [vmem:[#allocation2 + $0x32] sm:$0xff]  ;;  %vm1138_vm1 = vcmask 1044416  }
 0x3bb   : > { %896 = vst.msk [vmem:[#allocation2 + $0x41] sm:$0xff] %vm505_vm3, %v888_v1  ;;  %v1245_v49 = vld [vmem:[#allocation2 + $0x31] sm:$0xff]  ;;  %v1278_v56 = vpack.c.bf16 %v1274_v48, %v1274_v48  ;;  %vm1129_vm3 = vcmask 982016  }
 0x3bc   : > { %930 = vst.msk [vmem:[#allocation2 + $0x41] sm:$0xff] %vm524_vm5, %v922_v42  ;;  %1159 = vrot.lane.b32.xlu1 %v1150_v45, %s5369_s29  ;;  %1218 = vrot.lane.b32.xlu0 %v1209_v46, %s3956_s16  ;;  %v1249_v50 = vpack.c.bf16 %v1245_v49, %v1245_v49  ;;  %vm1169_vm5 = vcmask 584960  }
 0x3bd   : > { %1285 = vrot.lane.b32.xlu2 %v1179_v41, %s5375_s30  ;;  %1046 = vst.msk [vmem:[#allocation3 + $0x24] sm:$0xf] %vm1042_vm7, %v1209_v46  ;;  %vm4715_vm7 = vmor %vm1238_vm15, %vm1237_vm14 }
 0x3c1   : > { %v956_v3 = vpop.permute.xlu1 %955 }
 0x3c2   : > { %964 = vst.msk [vmem:[#allocation2 + $0x41] sm:$0xff] %vm543_vm6, %v956_v3  ;;  %vm1527_vm6 = vcmask 1043456  }
 0x3c3   : > { %998 = vst.msk [vmem:[#allocation2 + $0x41] sm:$0xff] %vm562_vm4, %v990_v9  ;;  %vm4648_vm4 = vmor %vm1139_vm2, %vm1138_vm1  ;;  %v1529_v27 = vsel %vm1527_vm6, %v1497_v26, 0  ;;  %vm1656_vm1 = vcmask 130112   ;;  %vm1770_vm6 = vcmask 523712  }
 0x3c4   : > { %1033 = vst.msk [vmem:[#allocation2 + $0x41] sm:$0xff] %vm1029_vm0, %v1024_v47  ;;  %1256 = vrot.lane.b32.xlu1 %v1150_v45, %s5377_s6  ;;  %1186 = vrot.lane.b32.xlu0 %v1081_v28, %s5373_s19  ;;  %v3656_v28 = vld [vmem:[%s5360_s3 + $0xa8] sm:$0xff]  ;;  %vm1520_vm0 = vcmask 850944  }
 0x3c5   : > { %1570 = vmatpush.bf16.msra.mxu2 %v1529_v27 }
 0x3c9   : > { %1571 = vmatpush.bf16.msra.mxu2 %v3656_v28 }
 0x3cb   : > { %v1108_v11 = vld [vmem:[#allocation2 + $0x40] sm:$0xff] }
 0x3cc   : > { %1287 = vrot.lane.b32.xlu1 %v1278_v56, %s5375_s30  ;;  %v1112_v0 = vpack.c.bf16 %v1108_v11, %v1108_v11  ;;  %1258 = vrot.lane.b32.xlu0 %v1249_v50, %s5377_s6  ;;  %v1177_v2 = vld [vmem:[#allocation2 + $0x42] sm:$0xff] }
 0x3cd   : > { %v1148_v57 = vld [vmem:[#allocation2 + $0x41] sm:$0xff]  ;;  %v1181_v4 = vpack.c.bf16 %v1177_v2, %v1177_v2  ;;  %1572 = vmatpush.bf16.msra.mxu2 %v3655_v30 }
 0x3ce   : > { %1123 = vrot.lane.b32.xlu2 %v1112_v0, %s3955_s13  ;;  %v1152_v5 = vpack.c.bf16 %v1148_v57, %v1148_v57 }
 0x3d1   : > { %1573 = vmatpush.bf16.msra.mxu2 %v3654_v32 }
 0x3d4   : > { %1063 = vrot.lane.b32.xlu1 %v1150_v45, %s5365_s11  ;;  %1121 = vrot.lane.b32.xlu0 %v1209_v46, %s3955_s13 }
 0x3d5   : > { %1574 = vmatpush.bf16.msra.mxu2 %v3653_v34 }
 0x3d6   : > { %1092 = vrot.lane.b32.xlu2 %v1179_v41, %s3962_s10  ;;  %v3651_v41 = vld [vmem:[%s5360_s3 + $0x80] sm:$0xff] }
 0x3d9   : > { %1575 = vmatpush.bf16.msra.mxu2 %v3652_v38 }
 0x3dc   : > { %1094 = vrot.lane.b32.xlu1 %v1278_v56, %s3962_s10  ;;  %1065 = vrot.lane.b32.xlu0 %v1249_v50, %s5365_s11  ;;  %s3974_s11 = smov 88  }
 0x3dd   : > { %1576 = vmatpush.bf16.msra.mxu2 %v3651_v41 }
 0x3de   : > { %1190 = vrot.lane.b32.xlu2 %v1278_v56, %s5373_s19 }
 0x3e4   : > { %1161 = vrot.lane.b32.xlu1 %v1249_v50, %s5369_s29  ;;  %1220 = vrot.lane.b32.xlu0 %v1112_v0, %s3956_s16 }
 0x3e6   : > { %1262 = vrot.lane.b32.xlu2 %v1251_v13, %s5377_s6 }
 0x3ec   : > { %1192 = vrot.lane.b32.xlu1 %v1181_v4, %s5373_s19  ;;  %1163 = vrot.lane.b32.xlu0 %v1152_v5, %s5369_s29  ;;  %s5393_s29 = smov 16   ;;  %s5394_s19 = smov 8  }
 0x3f0   : > { %v1091_v60 = vpop.permute.xlu2 %1090 }
 0x3f4   : > { %1289 = vrot.lane.b32.xlu1 %v1181_v4, %s5375_s30  ;;  %1260 = vrot.lane.b32.xlu0 %v1152_v5, %s5377_s6  ;;  %s5396_s6 = smov 32  }
 0x3f8   : > { %v1158_v19 = vpop.permute.xlu2 %1157 }
 0x3fc   : > { %1291 = vrot.lane.b32.xlu0 %v1280_v14, %s5375_s30  ;;  %s3978_s30 = smov 56  }
 0x407   : > { %v1118_v6 = vpop.permute.xlu1 %1117 }
 0x408   : > { %v1125_v16 = vrot.slane %v1118_v6, 4 }
 0x40a   : > { %v1130_v17 = vsel %vm1129_vm3, %v1125_v16, %v1118_v6 }
 0x40b   : > { %1141 = vst.msk [vmem:[#allocation3] sm:$0xff] %vm4648_vm4, %v1130_v17 }
 0x40c   : > { %1170 = vst.msk [vmem:[#allocation3 + $0x4] sm:$0xf] %vm1169_vm5, %v1158_v19 }
 0x40f   : > { %v1062_v20 = vpop.permute.xlu1 %1061  ;;  %v1189_v40 = vpop.permute.xlu2 %1188 }
 0x410   : > { %1073 = vst.msk [vmem:[#allocation3 + $0xc] sm:$0xf] %vm1071_vm9, %v1062_v20 }
 0x411   : > { %1102 = vst.msk [vmem:[#allocation3 + $0xc] sm:$0xf] %vm1100_vm10, %v1091_v60 }
 0x412   : > { %v3281_v45 = vld [vmem:[#allocation3] sm:$0xf] }
 0x417   : > { %v1286_v47 = vpop.permute.xlu2 %1285 }
 0x426   : > { %v1217_v35 = vpop.permute.xlu1 %1216  ;;  %v1120_v36 = vpop.permute.xlu0 %1119 }
 0x427   : > { %v1126_v37 = vrot.slane %v1120_v36, 4  ;;  %v1224_v9 = vrot.slane %v1217_v35, 4 }
 0x428   : > { %v1124_v50 = vpop.permute.xlu2 %1123 }
 0x429   : > { %v1131_v39 = vsel %vm1129_vm3, %v1126_v37, %v1120_v36  ;;  %v1229_v56 = vsel %vm5379_vm8, %v1224_v9, %v1217_v35  ;;  %v1128_v14 = vrot.slane %v1124_v50, 4 }
 0x42a   : > { %1142 = vst.msk [vmem:[#allocation3 + $0xc] sm:$0xff] %vm4648_vm4, %v1131_v39 }
 0x42b   : > { %v1133_v60 = vsel %vm1129_vm3, %v1128_v14, %v1124_v50 }
 0x42e   : > { %v1160_v10 = vpop.permute.xlu1 %1159  ;;  %v1219_v1 = vpop.permute.xlu0 %1218 }
 0x42f   : > { %1171 = vst.msk [vmem:[#allocation3 + $0x10] sm:$0xf] %vm1169_vm5, %v1160_v10  ;;  %v1225_v43 = vrot.slane %v1219_v1, 4 }
 0x430   : > { %1200 = vst.msk [vmem:[#allocation3 + $0x10] sm:$0xf] %vm1198_vm13, %v1189_v40  ;;  %v1093_v54 = vpop.permute.xlu2 %1092 }
 0x431   : > { %v1230_v44 = vsel %vm5379_vm8, %v1225_v43, %v1219_v1  ;;  %v3630_v46 = vld [vmem:[#allocation3 + $0x8] sm:$0xf0] }
 0x432   : > { %1241 = vst.msk [vmem:[#allocation3 + $0x10] sm:$0xff] %vm4715_vm7, %v1230_v44  ;;  %v3282_v3 = vor.u32 %v3630_v46, %v3281_v45 }
 0x434   : > { %1539 = vmatmul.bf16.vlgmr.msra.gmra.mxu0 %v3282_v3 }
 0x436   : > { %v1257_v48 = vpop.permute.xlu1 %1256  ;;  %v1187_v49 = vpop.permute.xlu0 %1186 }
 0x437   : > { %1199 = vst.msk [vmem:[#allocation3 + $0x4] sm:$0xf] %vm1198_vm13, %v1187_v49 }
 0x438   : > { %1240 = vst.msk [vmem:[#allocation3 + $0x4] sm:$0xff] %vm4715_vm7, %v1229_v56  ;;  %v1191_v16 = vpop.permute.xlu2 %1190 }
 0x439   : > { %1269 = vst.msk [vmem:[#allocation3 + $0x8] sm:$0xf] %vm1268_vm11, %v1257_v48  ;;  %v3283_v57 = vld [vmem:[#allocation3 + $0xc] sm:$0xf0] }
 0x43a   : > { %1298 = vst.msk [vmem:[#allocation3 + $0x8] sm:$0xf] %vm1297_vm12, %v1286_v47 }
 0x43e   : > { %v1288_v11 = vpop.permute.xlu1 %1287  ;;  %v1259_v0 = vpop.permute.xlu0 %1258 }
 0x43f   : > { %1270 = vst.msk [vmem:[#allocation3 + $0x14] sm:$0xf] %vm1268_vm11, %v1259_v0  ;;  %v3629_v2 = vld [vmem:[#allocation3 + $0x4] sm:$0xf] }
 0x440   : > { %1299 = vst.msk [vmem:[#allocation3 + $0x14] sm:$0xf] %vm1297_vm12, %v1288_v11  ;;  %v3286_v4 = vor.u32 %v3629_v2, %v3283_v57  ;;  %v1263_v22 = vpop.permute.xlu2 %1262 }
 0x441   : > { %v3289_v13 = vld [vmem:[#allocation3 + $0x8] sm:$0xf] }
 0x442   : > { %1558 = vmatmul.bf16.vlgmr.msra.gmra.mxu1 %v3286_v4 }
 0x446   : > { %v1064_v5 = vpop.permute.xlu1 %1063  ;;  %v1122_v8 = vpop.permute.xlu0 %1121 }
 0x447   : > { %1074 = vst.msk [vmem:[#allocation3 + $0x18] sm:$0xf] %vm1071_vm9, %v1064_v5  ;;  %v1127_v58 = vrot.slane %v1122_v8, 4  ;;  %v3631_v12 = vld [vmem:[#allocation3 + $0x10] sm:$0xf0] }
 0x448   : > { %1103 = vst.msk [vmem:[#allocation3 + $0x18] sm:$0xf] %vm1100_vm10, %v1093_v54  ;;  %v3290_v55 = vor.u32 %v3631_v12, %v3289_v13 }
 0x449   : > { %v1132_v7 = vsel %vm1129_vm3, %v1127_v58, %v1122_v8  ;;  %vm1751_vm3 = vcmask 458112  }
 0x44a   : > { %1143 = vst.msk [vmem:[#allocation3 + $0x18] sm:$0xff] %vm4648_vm4, %v1132_v7  ;;  %3391 = vmatmul.msk.bf16.vlgmr.msra.gmra.mxu2 %vm1520_vm0, %v3290_v55 }
 0x44e   : > { %v1095_v15 = vpop.permute.xlu1 %1094  ;;  %v1066_v52 = vpop.permute.xlu0 %1065 }
 0x44f   : > { %1075 = vst.msk [vmem:[#allocation3 + $0x24] sm:$0xf] %vm1071_vm9, %v1066_v52  ;;  %vm1694_vm9 = vcmask 261312  }
 0x450   : > { %1104 = vst.msk [vmem:[#allocation3 + $0x24] sm:$0xf] %vm1100_vm10, %v1095_v15  ;;  %vm1675_vm10 = vcmask 195712  }
 0x451   : > { %1144 = vst.msk [vmem:[#allocation3 + $0x24] sm:$0xff] %vm4648_vm4, %v1133_v60  ;;  %v3293_v59 = vld [vmem:[#allocation3 + $0x18] sm:$0xf]  ;;  %vm1732_vm4 = vcmask 392512  }
 0x456   : > { %v1162_v6 = vpop.permute.xlu1 %1161  ;;  %v1221_v17 = vpop.permute.xlu0 %1220 }
 0x457   : > { %1172 = vst.msk [vmem:[#allocation3 + $0x1c] sm:$0xf] %vm1169_vm5, %v1162_v6  ;;  %v1226_v19 = vrot.slane %v1221_v17, 4 }
 0x458   : > { %1201 = vst.msk [vmem:[#allocation3 + $0x1c] sm:$0xf] %vm1198_vm13, %v1191_v16  ;;  %v3633_v62 = vld [vmem:[#allocation3 + $0x20] sm:$0xf0] }
 0x459   : > { %v1231_v63 = vsel %vm5379_vm8, %v1226_v19, %v1221_v17  ;;  %v3294_v18 = vor.u32 %v3633_v62, %v3293_v59  ;;  %vm1628_vm8 = vcmask 648768  }
 0x45a   : > { %1242 = vst.msk [vmem:[#allocation3 + $0x1c] sm:$0xff] %vm4715_vm7, %v1231_v63 }
 0x45b   : > { %1544 = vmatmul.bf16.gmra.mxu0 %v3294_v18 }
 0x45e   : > { %v1193_v20 = vpop.permute.xlu1 %1192  ;;  %v1164_v21 = vpop.permute.xlu0 %1163 }
 0x45f   : > { %1173 = vst.msk [vmem:[#allocation3 + $0x28] sm:$0xf] %vm1169_vm5, %v1164_v21  ;;  %vm1713_vm5 = vcmask 326912  }
 0x460   : > { %1202 = vst.msk [vmem:[#allocation3 + $0x28] sm:$0xf] %vm1198_vm13, %v1193_v20  ;;  %vm1612_vm13 = vcmask 64512  }
 0x461   : > { %1243 = vst.msk [vmem:[#allocation3 + $0x28] sm:$0xff] %vm4715_vm7, %v1232_v23  ;;  %v3632_v26 = vld [vmem:[#allocation3 + $0x1c] sm:$0xf]  ;;  %vm1592_vm7 = vcmask 654336  }
 0x462   : > { %1272 = vst.msk [vmem:[#allocation3 + $0x2c] sm:$0xf] %vm1268_vm11, %v1263_v22 }
 0x463   : > { %1593 = vst.msk [vmem:[#allocation4] sm:$0xff] %vm1592_vm7, %v3961_v53 }
 0x464   : > { %1597 = vst.msk [vmem:[#allocation4 + $0x50] sm:$0xff] %vm1592_vm7, %v3961_v53 }
 0x466   : > { %v1290_v24 = vpop.permute.xlu1 %1289  ;;  %v1261_v25 = vpop.permute.xlu0 %1260 }
 0x467   : > { %1271 = vst.msk [vmem:[#allocation3 + $0x20] sm:$0xf] %vm1268_vm11, %v1261_v25  ;;  %vm1594_vm11 = vcmask 648192  }
 0x468   : > { %1300 = vst.msk [vmem:[#allocation3 + $0x20] sm:$0xf] %vm1297_vm12, %v1290_v24  ;;  %v3295_v27 = vld [vmem:[#allocation3 + $0x24] sm:$0xf0] }
 0x469   : > { %v3298_v28 = vor.u32 %v3632_v26, %v3295_v27  ;;  %1595 = vst.msk [vmem:[#allocation4 + $0x8] sm:$0x3] %vm1594_vm11, %v3961_v53 }
 0x46a   : > { %1598 = vst.msk [vmem:[#allocation4 + $0x58] sm:$0x3] %vm1594_vm11, %v3961_v53 }
 0x46b   : > { %1563 = vmatmul.bf16.gmra.mxu1 %v3298_v28 }
 0x46e   : > { %v1292_v29 = vpop.permute.xlu0 %1291 }
 0x46f   : > { %1301 = vst.msk [vmem:[#allocation3 + $0x2c] sm:$0xf] %vm1297_vm12, %v1292_v29  ;;  %v3301_v51 = vld [vmem:[#allocation3 + $0x20] sm:$0xf]  ;;  %vm1599_vm12 = vcmask 647168  }
 0x470   : > { %1600 = vst.msk [vmem:[#allocation4] sm:$0x1] %vm1599_vm12, %v3961_v53 }
 0x471   : > { %1606 = vst.msk [vmem:[#allocation4 + $0x9] sm:$0x1] %vm1599_vm12, %v3961_v53 }
 0x472   : > { %1613 = vst.msk [vmem:[#allocation4] sm:$0xff] %vm1612_vm13, %v3961_v53 }
 0x473   : > { %1601 = vst.msk [vmem:[#allocation4 + $0x10] sm:$0x1] %vm1599_vm12, %v3961_v53 }
 0x474   : > { %1602 = vst.msk [vmem:[#allocation4 + $0x20] sm:$0x1] %vm1599_vm12, %v3961_v53 }
 0x475   : > { %1603 = vst.msk [vmem:[#allocation4 + $0x30] sm:$0x1] %vm1599_vm12, %v3961_v53 }
 0x476   : > { %v3634_v30 = vld [vmem:[#allocation3 + $0x28] sm:$0xf0]  ;;  %1604 = vst.msk [vmem:[#allocation4 + $0x40] sm:$0x1] %vm1599_vm12, %v3961_v53 }
 0x477   : > { %v3302_v31 = vor.u32 %v3634_v30, %v3301_v51  ;;  %1607 = vst.msk [vmem:[#allocation4 + $0x19] sm:$0x1] %vm1599_vm12, %v3961_v53 }
 0x478   : > { %1608 = vst.msk [vmem:[#allocation4 + $0x29] sm:$0x1] %vm1599_vm12, %v3961_v53 }
 0x479   : > { %3392 = vmatmul.msk.bf16.gmra.mxu2 %vm1520_vm0, %v3302_v31  ;;  %vm1614_vm0 = vcmask 58368   ;;  %1609 = vst.msk [vmem:[#allocation4 + $0x39] sm:$0x1] %vm1599_vm12, %v3961_v53 }
 0x47a   : > { %1615 = vst.msk [vmem:[#allocation4 + $0x8] sm:$0x3] %vm1614_vm0, %v3961_v53 }
 0x47b   : > { %1629 = vst.msk [vmem:[#allocation4 + $0x8] sm:$0x3] %vm1628_vm8, %v3961_v53 }
 0x47c   : > { %1610 = vst.msk [vmem:[#allocation4 + $0x49] sm:$0x1] %vm1599_vm12, %v3961_v53 }
 0x47d   : > { %1605 = vst.msk [vmem:[#allocation4 + $0x50] sm:$0x1] %vm1599_vm12, %v3961_v53 }
 0x47e   : > { %1611 = vst.msk [vmem:[#allocation4 + $0x59] sm:$0x1] %vm1599_vm12, %v3961_v53 }
 0x47f   : > { %1616 = vst.msk [vmem:[#allocation4 + $0x10] sm:$0xff] %vm1612_vm13, %v3961_v53 }
 0x480   : > { %1617 = vst.msk [vmem:[#allocation4 + $0x18] sm:$0x3] %vm1614_vm0, %v3961_v53 }
 0x481   : > { %1618 = vst.msk [vmem:[#allocation4 + $0x20] sm:$0xff] %vm1612_vm13, %v3961_v53 }
 0x482   : > { %1619 = vst.msk [vmem:[#allocation4 + $0x28] sm:$0x3] %vm1614_vm0, %v3961_v53 }
 0x483   : > { %1620 = vst.msk [vmem:[#allocation4 + $0x30] sm:$0xff] %vm1612_vm13, %v3961_v53 }
 0x484   : > { %1621 = vst.msk [vmem:[#allocation4 + $0x38] sm:$0x3] %vm1614_vm0, %v3961_v53 }
 0x485   : > { %1622 = vst.msk [vmem:[#allocation4 + $0x40] sm:$0xff] %vm1612_vm13, %v3961_v53 }
 0x486   : > { %1623 = vst.msk [vmem:[#allocation4 + $0x48] sm:$0x3] %vm1614_vm0, %v3961_v53 }
 0x487   : > { %1624 = vst.msk [vmem:[#allocation4 + $0x50] sm:$0xff] %vm1612_vm13, %v3961_v53 }
 0x488   : > { %1625 = vst.msk [vmem:[#allocation4 + $0x58] sm:$0x3] %vm1614_vm0, %v3961_v53  ;;  %vm2359_vm0 = vcmask 1044096  }
 0x489   : > { %1631 = vst.msk [vmem:[#allocation4 + $0x18] sm:$0x3] %vm1628_vm8, %v3961_v53 }
 0x48a   : > { %1633 = vst.msk [vmem:[#allocation4 + $0x28] sm:$0x3] %vm1628_vm8, %v3961_v53 }
 0x48b   : > { %1635 = vst.msk [vmem:[#allocation4 + $0x38] sm:$0x3] %vm1628_vm8, %v3961_v53 }
 0x48c   : > { %1637 = vst.msk [vmem:[#allocation4 + $0x48] sm:$0x3] %vm1628_vm8, %v3961_v53 }
 0x48d   : > { %1639 = vst.msk [vmem:[#allocation4 + $0x58] sm:$0x3] %vm1628_vm8, %v3961_v53  ;;  %vm2321_vm8 = vcmask 650240  }
 0x4b1   : > { %v1540_v33 = vpop.f32.mrf.mxu0 }
 0x4b9   : > { %v1542_v36 = vpop.f32.mrf.mxu0 }
 0x4bf   : > { %v1559_v32 = vpop.f32.mrf.mxu1 }
 0x4c0   : > { %v1560_v39 = vadd.f32 %v1559_v32, %v1540_v33 }
 0x4c7   : > { %v1561_v35 = vpop.f32.mrf.mxu1 }
 0x4c8   : > { %v1562_v38 = vadd.f32 %v1561_v35, %v1542_v36 }
 0x4cd   : > { %v1578_v34 = vpop.f32.mrf.mxu2 }
 0x4ce   : > { %v1579_v10 = vadd.f32 %v1578_v34, %v1560_v39 }
 0x4d0   : > { %v4760_v44 = vmax.f32 %v1579_v10, 0.0 }
 0x4d2   : > { %v1695_v48 = vsel %vm1694_vm9, %v4760_v44, 0.0  ;;  %v1676_v49 = vsel %vm1675_vm10, %v4760_v44, 0.0  ;;  %v1657_v56 = vsel %vm1656_vm1, %v4760_v44, 0.0  ;;  %v1752_v11 = vsel %vm1751_vm3, %v4760_v44, 0.0 }
 0x4d3   : > { %v1733_v0 = vsel %vm1732_vm4, %v4760_v44, 0.0  ;;  %v1714_v2 = vsel %vm1713_vm5, %v4760_v44, 0.0  ;;  %v1771_v8 = vsel %vm1770_vm6, %v4760_v44, 0.0 }
 0x4d5   : > { %v1580_v37 = vpop.f32.mrf.mxu2 }
 0x4d6   : > { %v1581_v41 = vadd.f32 %v1580_v37, %v1562_v38 }
 0x4d8   : > { %v1545_v1 = vpop.f32.mrf.mxu0  ;;  %v4758_v42 = vmax.f32 %v1581_v41, 0.0 }
 0x4da   : > { %v1696_v3 = vsel %vm1694_vm9, %v4758_v42, 0.0  ;;  %v1677_v50 = vsel %vm1675_vm10, %v4758_v42, 0.0  ;;  %v1658_v5 = vsel %vm1656_vm1, %v4758_v42, 0.0  ;;  %v1753_v54 = vsel %vm1751_vm3, %v4758_v42, 0.0 }
 0x4db   : > { %v1697_v4 = vadd.f32 %v1696_v3, %v1695_v48  ;;  %v1734_v58 = vsel %vm1732_vm4, %v4758_v42, 0.0  ;;  %v1715_v12 = vsel %vm1713_vm5, %v4758_v42, 0.0  ;;  %v1772_v55 = vsel %vm1770_vm6, %v4758_v42, 0.0 }
 0x4dc   : > { %v1678_v15 = vadd.f32 %v1677_v50, %v1676_v49  ;;  %v1659_v16 = vadd.f32 %v1658_v5, %v1657_v56  ;;  %v1754_v59 = vadd.f32 %v1753_v54, %v1752_v11  ;;  %v1735_v62 = vadd.f32 %v1734_v58, %v1733_v0 }
 0x4dd   : > { %v1716_v63 = vadd.f32 %v1715_v12, %v1714_v2  ;;  %v1773_v18 = vadd.f32 %v1772_v55, %v1771_v8 }
 0x4e0   : > { %v1547_v57 = vpop.f32.mrf.mxu0 }
 0x4e8   : > { %v1564_v40 = vpop.f32.mrf.mxu1 }
 0x4e9   : > { %v1565_v43 = vadd.f32 %v1564_v40, %v1545_v1 }
 0x4f0   : > { %v1566_v9 = vpop.f32.mrf.mxu1 }
 0x4f1   : > { %v1567_v13 = vadd.f32 %v1566_v9, %v1547_v57 }
 0x4fc   : > { %v1583_v45 = vpop.f32.mrf.mxu2 }
 0x4fd   : > { %v1584_v46 = vadd.f32 %v1583_v45, %v1565_v43 }
 0x4ff   : > { %v4764_v47 = vmax.f32 %v1584_v46, 0.0 }
 0x501   : > { %v1698_v14 = vsel %vm1694_vm9, %v4764_v47, 0.0  ;;  %v1679_v52 = vsel %vm1675_vm10, %v4764_v47, 0.0  ;;  %v1660_v60 = vsel %vm1656_vm1, %v4764_v47, 0.0  ;;  %v1755_v17 = vsel %vm1751_vm3, %v4764_v47, 0.0 }
 0x502   : > { %v1736_v19 = vsel %vm1732_vm4, %v4764_v47, 0.0  ;;  %v1699_v20 = vadd.f32 %v1698_v14, %v1697_v4  ;;  %v1680_v21 = vadd.f32 %v1679_v52, %v1678_v15  ;;  %v1661_v22 = vadd.f32 %v1660_v60, %v1659_v16 }
 0x503   : > { %v1756_v23 = vadd.f32 %v1755_v17, %v1754_v59  ;;  %v1737_v24 = vadd.f32 %v1736_v19, %v1735_v62  ;;  %v1717_v25 = vsel %vm1713_vm5, %v4764_v47, 0.0  ;;  %v1774_v26 = vsel %vm1770_vm6, %v4764_v47, 0.0 }
 0x504   : > { %v1585_v7 = vpop.f32.mrf.mxu2  ;;  %v1718_v35 = vadd.f32 %v1717_v25, %v1716_v63  ;;  %v1775_v43 = vadd.f32 %v1774_v26, %v1773_v18  ;;  %v1643_v26 = vsel %vm1612_vm13, %v4758_v42, 0.0 }
 0x505   : > { %v1586_v6 = vadd.f32 %v1585_v7, %v1567_v13 }
 0x507   : > { %v4802_v61 = vmax.f32 %v1586_v6, 0.0 }
 0x509   : > { %v1700_v27 = vsel %vm1694_vm9, %v4802_v61, 0.0  ;;  %v1681_v28 = vsel %vm1675_vm10, %v4802_v61, 0.0  ;;  %v1662_v29 = vsel %vm1656_vm1, %v4802_v61, 0.0  ;;  %v1757_v51 = vsel %vm1751_vm3, %v4802_v61, 0.0 }
 0x50a   : > { %v1701_v30 = vadd.f32 %v1700_v27, %v1699_v20  ;;  %v1682_v31 = vadd.f32 %v1681_v28, %v1680_v21  ;;  %v1663_v32 = vadd.f32 %v1662_v29, %v1661_v22  ;;  %v1758_v33 = vadd.f32 %v1757_v51, %v1756_v23 }
 0x50b   : > { %v1738_v34 = vsel %vm1732_vm4, %v4802_v61, 0.0  ;;  %v1719_v36 = vsel %vm1713_vm5, %v4802_v61, 0.0  ;;  %v1776_v37 = vsel %vm1770_vm6, %v4802_v61, 0.0  ;;  %v1642_v27 = vsel %vm1612_vm13, %v4760_v44, 0.0 }
 0x50c   : > { %v1702_v38 = vrot.slane %v1701_v30, 4  ;;  %v1683_v39 = vrot.slane %v1682_v31, 4  ;;  %v1664_v40 = vrot.slane %v1663_v32, 4  ;;  %v1759_v41 = vrot.slane %v1758_v33, 4 }
 0x50d   : > { %v1739_v10 = vadd.f32 %v1738_v34, %v1737_v24  ;;  %v1720_v1 = vadd.f32 %v1719_v36, %v1718_v35  ;;  %v1777_v56 = vadd.f32 %v1776_v37, %v1775_v43  ;;  %v1645_v28 = vsel %vm1612_vm13, %v4764_v47, 0.0 }
 0x50e   : > { %v1703_v45 = vadd.f32 %v1702_v38, %v1701_v30  ;;  %v1684_v46 = vadd.f32 %v1683_v39, %v1682_v31  ;;  %v1665_v3 = vadd.f32 %v1664_v40, %v1663_v32  ;;  %v1760_v9 = vadd.f32 %v1759_v41, %v1758_v33 }
 0x50f   : > { %v1740_v48 = vrot.slane %v1739_v10, 4  ;;  %v1721_v49 = vrot.slane %v1720_v1, 4  ;;  %v1778_v12 = vrot.slane %v1777_v56, 4  ;;  %v1644_v29 = vadd.f32 %v1643_v26, %v1642_v27 }
 0x510   : > { %v1704_v50 = vrot.slane %v1703_v45, 2  ;;  %v1685_v11 = vrot.slane %v1684_v46, 2  ;;  %v1666_v0 = vrot.slane %v1665_v3, 2  ;;  %v1761_v2 = vrot.slane %v1760_v9, 2 }
 0x511   : > { %v1741_v57 = vadd.f32 %v1740_v48, %v1739_v10  ;;  %v1722_v4 = vadd.f32 %v1721_v49, %v1720_v1  ;;  %v1779_v19 = vadd.f32 %v1778_v12, %v1777_v56  ;;  %v1647_v51 = vsel %vm1612_vm13, %v4802_v61, 0.0 }
 0x512   : > { %v1705_v5 = vadd.f32 %v1704_v50, %v1703_v45  ;;  %v1686_v54 = vadd.f32 %v1685_v11, %v1684_v46  ;;  %v1667_v8 = vadd.f32 %v1666_v0, %v1665_v3  ;;  %v1762_v15 = vadd.f32 %v1761_v2, %v1760_v9 }
 0x513   : > { %v1742_v13 = vrot.slane %v1741_v57, 2  ;;  %v1723_v58 = vrot.slane %v1722_v4, 2  ;;  %v1780_v18 = vrot.slane %v1779_v19, 2  ;;  %v1646_v30 = vadd.f32 %v1645_v28, %v1644_v29 }
 0x514   : > { %v1706_v55 = vrot.slane %v1705_v5, 1  ;;  %v1687_v7 = vrot.slane %v1686_v54, 1  ;;  %v1668_v14 = vrot.slane %v1667_v8, 1  ;;  %v1763_v59 = vrot.slane %v1762_v15, 1 }
 0x515   : > { %v1743_v16 = vadd.f32 %v1742_v13, %v1741_v57  ;;  %v1724_v17 = vadd.f32 %v1723_v58, %v1722_v4  ;;  %v1781_v23 = vadd.f32 %v1780_v18, %v1779_v19  ;;  %v1648_v31 = vadd.f32 %v1647_v51, %v1646_v30 }
 0x516   : > { %v1707_v52 = vadd.f32 %v1706_v55, %v1705_v5  ;;  %v1688_v60 = vadd.f32 %v1687_v7, %v1686_v54  ;;  %v1669_v6 = vadd.f32 %v1668_v14, %v1667_v8  ;;  %v1764_v20 = vadd.f32 %v1763_v59, %v1762_v15 }
 0x517   : > { %v1744_v62 = vrot.slane %v1743_v16, 1  ;;  %v1725_v63 = vrot.slane %v1724_v17, 1  ;;  %v1782_v24 = vrot.slane %v1781_v23, 1  ;;  %v1649_v32 = vrot.slane %v1648_v31, 4 }
 0x518   : > { %1709 = vrot.lane.b32.xlu0 %v1707_v52, %s3959_s9  ;;  %1690 = vrot.lane.b32.xlu1 %v1688_v60, %s3956_s16  ;;  %v3976_v35 = vmov 256.0  }
 0x519   : > { %1671 = vrot.lane.b32.xlu2 %v1669_v6, %s3955_s13  ;;  %v1745_v21 = vadd.f32 %v1744_v62, %v1743_v16  ;;  %v1726_v22 = vadd.f32 %v1725_v63, %v1724_v17  ;;  %v1783_v25 = vadd.f32 %v1782_v24, %v1781_v23  ;;  %v1650_v33 = vadd.f32 %v1649_v32, %v1648_v31 }
 0x51a   : > { %3812 = vrcp.f32 %v3976_v35 }
 0x51b   : > { %v1651_v34 = vrot.slane %v1650_v33, 2 }
 0x51d   : > { %v1652_v36 = vadd.f32 %v1651_v34, %v1650_v33 }
 0x51f   : > { %v1653_v39 = vrot.slane %v1652_v36, 1 }
 0x520   : > { %1766 = vrot.lane.b32.xlu0 %v1764_v20, %s3962_s10  ;;  %1747 = vrot.lane.b32.xlu1 %v1745_v21, %s3974_s11  ;;  %v3813_v38 = vpop.eup %3812 }
 0x521   : > { %1728 = vrot.lane.b32.xlu2 %v1726_v22, %s3975_s14  ;;  %v1790_v40 = vmul.f32 256.0, %v3813_v38  ;;  %v1654_v41 = vadd.f32 %v1653_v39, %v1652_v36  ;;  %vm1794_vm15 = vweird.f32 %v3813_v38 }
 0x523   : > { %v1791_v45 = vsub.f32 1.0, %v1790_v40 }
 0x525   : > { %v1792_v48 = vmul.f32 %v3813_v38, %v1791_v45 }
 0x527   : > { %v1793_v56 = vadd.f32 %v3813_v38, %v1792_v48 }
 0x529   : > { %1785 = vrot.lane.b32.xlu2 %v1783_v25, %s5391_s12  ;;  %v4837_v4 = vsel %vm1794_vm15, %v3813_v38, %v1793_v56  ;;  %vm1626_vm15 = vcmask 654912  }
 0x52a   : > { %1627 = vst.msk [vmem:[#allocation4] sm:$0xff] %vm1626_vm15, %v3961_v53 }
 0x52b   : > { %1630 = vst.msk [vmem:[#allocation4 + $0x10] sm:$0xff] %vm1626_vm15, %v3961_v53 }
 0x52c   : > { %1632 = vst.msk [vmem:[#allocation4 + $0x20] sm:$0xff] %vm1626_vm15, %v3961_v53 }
 0x52d   : > { %1634 = vst.msk [vmem:[#allocation4 + $0x30] sm:$0xff] %vm1626_vm15, %v3961_v53 }
 0x52e   : > { %1636 = vst.msk [vmem:[#allocation4 + $0x40] sm:$0xff] %vm1626_vm15, %v3961_v53 }
 0x52f   : > { %1638 = vst.msk [vmem:[#allocation4 + $0x50] sm:$0xff] %vm1626_vm15, %v3961_v53  ;;  %vm5047_vm15 = vmor %vm1139_vm2, %vm2359_vm0  ;;  %vm2308_vm2 = vcmask 589312   ;;  %vm2496_vm0 = vcmask 781440  }
 0x573   : > { %v1672_v37 = vpop.permute.xlu2 %1671 }
 0x574   : > { %v1674_v10 = vadd.f32 %v1672_v37, %v1654_v41 }
 0x57b   : > { %v1729_v3 = vpop.permute.xlu2 %1728 }
 0x583   : > { %v1786_v57 = vpop.permute.xlu2 %1785 }
 0x58a   : > { %v1710_v1 = vpop.permute.xlu0 %1709  ;;  %v1691_v43 = vpop.permute.xlu1 %1690 }
 0x58b   : > { %v1693_v46 = vadd.f32 %v1691_v43, %v1674_v10 }
 0x58d   : > { %v1712_v9 = vadd.f32 %v1710_v1, %v1693_v46 }
 0x58f   : > { %v1731_v49 = vadd.f32 %v1729_v3, %v1712_v9 }
 0x592   : > { %v1748_v50 = vpop.permute.xlu1 %1747  ;;  %v1767_v0 = vpop.permute.xlu0 %1766 }
 0x593   : > { %v1750_v11 = vadd.f32 %v1748_v50, %v1731_v49 }
 0x595   : > { %v1769_v2 = vadd.f32 %v1767_v0, %v1750_v11 }
 0x597   : > { %v1788_v5 = vadd.f32 %v1786_v57, %v1769_v2 }
 0x599   : > { %v4840_v54 = vmul.f32 %v4837_v4, %v1788_v5 }
 0x59b   : > { %v4843_v8 = vperm.slane %v4840_v54, 0 }
 0x59d   : > { %1879 = vrot.lane.b32.xlu2 %v4843_v8, %s5392_s18  ;;  %1850 = vrot.lane.b32.xlu0 %v4843_v8, %s5393_s29 }
 0x59e   : > { %1821 = vrot.lane.b32.xlu1 %v4843_v8, %s5394_s19 }
 0x5a5   : > { %1966 = vrot.lane.b32.xlu2 %v4843_v8, %s3977_s17  ;;  %1937 = vrot.lane.b32.xlu0 %v4843_v8, %s5395_s22 }
 0x5a6   : > { %1908 = vrot.lane.b32.xlu1 %v4843_v8, %s5396_s6 }
 0x5ae   : > { %1995 = vrot.lane.b32.xlu1 %v4843_v8, %s3978_s30 }
 0x5f7   : > { %v1880_v13 = vpop.permute.xlu2 %1879 }
 0x5f8   : > { %v1882_v58 = vsub.f32 %v4760_v44, %v1880_v13  ;;  %v1883_v12 = vsub.f32 %v4758_v42, %v1880_v13  ;;  %v1884_v55 = vsub.f32 %v4764_v47, %v1880_v13  ;;  %v1885_v7 = vsub.f32 %v4802_v61, %v1880_v13 }
 0x5fa   : > { %v1886_v14 = vmul.f32 %v1882_v58, %v1882_v58  ;;  %v1887_v15 = vmul.f32 %v1883_v12, %v1883_v12  ;;  %v1888_v52 = vmul.f32 %v1884_v55, %v1884_v55  ;;  %v1889_v60 = vmul.f32 %v1885_v7, %v1885_v7 }
 0x5fc   : > { %v1890_v6 = vsel %vm1694_vm9, %v1886_v14, 0.0  ;;  %v1891_v16 = vsel %vm1694_vm9, %v1887_v15, 0.0  ;;  %v1893_v19 = vsel %vm1694_vm9, %v1888_v52, 0.0  ;;  %v1895_v62 = vsel %vm1694_vm9, %v1889_v60, 0.0 }
 0x5fd   : > { %v1892_v17 = vadd.f32 %v1891_v16, %v1890_v6 }
 0x5ff   : > { %v1894_v59 = vadd.f32 %v1893_v19, %v1892_v17  ;;  %v1967_v63 = vpop.permute.xlu2 %1966 }
 0x600   : > { %v1969_v18 = vsub.f32 %v4760_v44, %v1967_v63  ;;  %v1970_v20 = vsub.f32 %v4758_v42, %v1967_v63  ;;  %v1971_v21 = vsub.f32 %v4764_v47, %v1967_v63  ;;  %v1972_v22 = vsub.f32 %v4802_v61, %v1967_v63 }
 0x601   : > { %v1896_v23 = vadd.f32 %v1895_v62, %v1894_v59 }
 0x602   : > { %v1973_v24 = vmul.f32 %v1969_v18, %v1969_v18  ;;  %v1974_v25 = vmul.f32 %v1970_v20, %v1970_v20  ;;  %v1975_v26 = vmul.f32 %v1971_v21, %v1971_v21  ;;  %v1976_v28 = vmul.f32 %v1972_v22, %v1972_v22 }
 0x603   : > { %v1897_v27 = vrot.slane %v1896_v23, 4 }
 0x604   : > { %v1977_v29 = vsel %vm1751_vm3, %v1973_v24, 0.0  ;;  %v1978_v51 = vsel %vm1751_vm3, %v1974_v25, 0.0  ;;  %v1980_v32 = vsel %vm1751_vm3, %v1975_v26, 0.0  ;;  %v1982_v35 = vsel %vm1751_vm3, %v1976_v28, 0.0 }
 0x605   : > { %v1979_v30 = vadd.f32 %v1978_v51, %v1977_v29  ;;  %v1898_v31 = vadd.f32 %v1897_v27, %v1896_v23 }
 0x607   : > { %v1981_v33 = vadd.f32 %v1980_v32, %v1979_v30  ;;  %v1899_v34 = vrot.slane %v1898_v31, 2 }
 0x609   : > { %v1983_v36 = vadd.f32 %v1982_v35, %v1981_v33  ;;  %v1900_v37 = vadd.f32 %v1899_v34, %v1898_v31 }
 0x60b   : > { %v1901_v38 = vrot.slane %v1900_v37, 1  ;;  %v1984_v39 = vrot.slane %v1983_v36, 4 }
 0x60d   : > { %v1902_v40 = vadd.f32 %v1901_v38, %v1900_v37  ;;  %v1985_v41 = vadd.f32 %v1984_v39, %v1983_v36 }
 0x60f   : > { %v1851_v10 = vpop.permute.xlu0 %1850  ;;  %1904 = vrot.lane.b32.xlu1 %v1902_v40, %s3959_s9  ;;  %v1986_v1 = vrot.slane %v1985_v41, 2 }
 0x610   : > { %v1853_v43 = vsub.f32 %v4760_v44, %v1851_v10  ;;  %v1854_v45 = vsub.f32 %v4758_v42, %v1851_v10  ;;  %v1855_v46 = vsub.f32 %v4764_v47, %v1851_v10  ;;  %v1856_v3 = vsub.f32 %v4802_v61, %v1851_v10  ;;  %v1822_v9 = vpop.permute.xlu1 %1821 }
 0x611   : > { %v1824_v48 = vsub.f32 %v4760_v44, %v1822_v9  ;;  %v1825_v49 = vsub.f32 %v4758_v42, %v1822_v9  ;;  %v1826_v56 = vsub.f32 %v4764_v47, %v1822_v9  ;;  %v1827_v50 = vsub.f32 %v4802_v61, %v1822_v9 }
 0x612   : > { %v1857_v11 = vmul.f32 %v1853_v43, %v1853_v43  ;;  %v1858_v0 = vmul.f32 %v1854_v45, %v1854_v45  ;;  %v1859_v2 = vmul.f32 %v1855_v46, %v1855_v46  ;;  %v1860_v57 = vmul.f32 %v1856_v3, %v1856_v3 }
 0x613   : > { %v1828_v5 = vmul.f32 %v1824_v48, %v1824_v48  ;;  %v1829_v13 = vmul.f32 %v1825_v49, %v1825_v49  ;;  %v1830_v58 = vmul.f32 %v1826_v56, %v1826_v56  ;;  %v1831_v12 = vmul.f32 %v1827_v50, %v1827_v50 }
 0x614   : > { %v1861_v55 = vsel %vm1675_vm10, %v1857_v11, 0.0  ;;  %v1862_v7 = vsel %vm1675_vm10, %v1858_v0, 0.0  ;;  %v1864_v60 = vsel %vm1675_vm10, %v1859_v2, 0.0  ;;  %v1987_v16 = vadd.f32 %v1986_v1, %v1985_v41 }
 0x615   : > { %v1863_v14 = vadd.f32 %v1862_v7, %v1861_v55  ;;  %v1832_v15 = vsel %vm1656_vm1, %v1828_v5, 0.0  ;;  %v1833_v52 = vsel %vm1656_vm1, %v1829_v13, 0.0  ;;  %v1866_v19 = vsel %vm1675_vm10, %v1860_v57, 0.0 }
 0x616   : > { %v1834_v6 = vadd.f32 %v1833_v52, %v1832_v15  ;;  %v1835_v59 = vsel %vm1656_vm1, %v1830_v58, 0.0  ;;  %v1837_v62 = vsel %vm1656_vm1, %v1831_v12, 0.0  ;;  %v1988_v26 = vrot.slane %v1987_v16, 1 }
 0x617   : > { %v1865_v17 = vadd.f32 %v1864_v60, %v1863_v14  ;;  %v1938_v63 = vpop.permute.xlu0 %1937 }
 0x618   : > { %v1836_v18 = vadd.f32 %v1835_v59, %v1834_v6  ;;  %v1940_v20 = vsub.f32 %v4760_v44, %v1938_v63  ;;  %v1941_v21 = vsub.f32 %v4758_v42, %v1938_v63  ;;  %v1942_v22 = vsub.f32 %v4764_v47, %v1938_v63  ;;  %v1909_v23 = vpop.permute.xlu1 %1908 }
 0x619   : > { %v1867_v24 = vadd.f32 %v1866_v19, %v1865_v17  ;;  %v1943_v25 = vsub.f32 %v4802_v61, %v1938_v63  ;;  %v1911_v27 = vsub.f32 %v4760_v44, %v1909_v23  ;;  %v1989_v32 = vadd.f32 %v1988_v26, %v1987_v16 }
 0x61a   : > { %v1838_v28 = vadd.f32 %v1837_v62, %v1836_v18  ;;  %v1944_v29 = vmul.f32 %v1940_v20, %v1940_v20  ;;  %v1945_v51 = vmul.f32 %v1941_v21, %v1941_v21  ;;  %v1946_v30 = vmul.f32 %v1942_v22, %v1942_v22 }
 0x61b   : > { %v1947_v31 = vmul.f32 %v1943_v25, %v1943_v25  ;;  %v1912_v33 = vsub.f32 %v4758_v42, %v1909_v23  ;;  %v1913_v34 = vsub.f32 %v4764_v47, %v1909_v23  ;;  %v1914_v37 = vsub.f32 %v4802_v61, %v1909_v23  ;;  %1991 = vrot.lane.b32.xlu1 %v1989_v32, %s3962_s10 }
 0x61c   : > { %v1948_v35 = vsel %vm1732_vm4, %v1944_v29, 0.0  ;;  %v1949_v36 = vsel %vm1732_vm4, %v1945_v51, 0.0  ;;  %v1951_v39 = vsel %vm1732_vm4, %v1946_v30, 0.0  ;;  %v1915_v40 = vmul.f32 %v1911_v27, %v1911_v27 }
 0x61d   : > { %v1950_v38 = vadd.f32 %v1949_v36, %v1948_v35  ;;  %v1916_v41 = vmul.f32 %v1912_v33, %v1912_v33  ;;  %v1917_v10 = vmul.f32 %v1913_v34, %v1913_v34  ;;  %v1918_v1 = vmul.f32 %v1914_v37, %v1914_v37 }
 0x61e   : > { %v1868_v43 = vrot.slane %v1867_v24, 4  ;;  %v1839_v45 = vrot.slane %v1838_v28, 4  ;;  %v1953_v3 = vsel %vm1732_vm4, %v1947_v31, 0.0  ;;  %v1919_v9 = vsel %vm1713_vm5, %v1915_v40, 0.0 }
 0x61f   : > { %v1952_v46 = vadd.f32 %v1951_v39, %v1950_v38  ;;  %v1920_v48 = vsel %vm1713_vm5, %v1916_v41, 0.0  ;;  %v1922_v56 = vsel %vm1713_vm5, %v1917_v10, 0.0  ;;  %v1924_v50 = vsel %vm1713_vm5, %v1918_v1, 0.0 }
 0x620   : > { %v1921_v49 = vadd.f32 %v1920_v48, %v1919_v9  ;;  %v1996_v11 = vpop.permute.xlu1 %1995  ;;  %v1869_v0 = vadd.f32 %v1868_v43, %v1867_v24  ;;  %v1840_v7 = vadd.f32 %v1839_v45, %v1838_v28  ;;  %v1798_v43 = vsub.f32 %v4760_v44, %v4843_v8 }
 0x621   : > { %v1954_v2 = vadd.f32 %v1953_v3, %v1952_v46  ;;  %v1998_v57 = vsub.f32 %v4760_v44, %v1996_v11  ;;  %v1999_v5 = vsub.f32 %v4758_v42, %v1996_v11  ;;  %v2000_v13 = vsub.f32 %v4764_v47, %v1996_v11 }
 0x622   : > { %v1923_v58 = vadd.f32 %v1922_v56, %v1921_v49  ;;  %v2001_v12 = vsub.f32 %v4802_v61, %v1996_v11  ;;  %v1870_v55 = vrot.slane %v1869_v0, 2  ;;  %v1841_v17 = vrot.slane %v1840_v7, 2 }
 0x623   : > { %v2002_v14 = vmul.f32 %v1998_v57, %v1998_v57  ;;  %v2003_v15 = vmul.f32 %v1999_v5, %v1999_v5  ;;  %v2004_v52 = vmul.f32 %v2000_v13, %v2000_v13  ;;  %v1955_v60 = vrot.slane %v1954_v2, 4 }
 0x624   : > { %v1925_v6 = vadd.f32 %v1924_v50, %v1923_v58  ;;  %v1871_v16 = vadd.f32 %v1870_v55, %v1869_v0  ;;  %v2005_v19 = vmul.f32 %v2001_v12, %v2001_v12  ;;  %v1842_v21 = vadd.f32 %v1841_v17, %v1840_v7 }
 0x625   : > { %v2006_v59 = vsel %vm1770_vm6, %v2002_v14, 0.0  ;;  %v2007_v62 = vsel %vm1770_vm6, %v2003_v15, 0.0  ;;  %v1956_v63 = vadd.f32 %v1955_v60, %v1954_v2  ;;  %v2009_v22 = vsel %vm1770_vm6, %v2004_v52, 0.0 }
 0x626   : > { %v2008_v18 = vadd.f32 %v2007_v62, %v2006_v59  ;;  %v1872_v20 = vrot.slane %v1871_v16, 1  ;;  %v1926_v24 = vrot.slane %v1925_v6, 4  ;;  %v1843_v27 = vrot.slane %v1842_v21, 1 }
 0x627   : > { %v1957_v23 = vrot.slane %v1956_v63, 2  ;;  %v2011_v28 = vsel %vm1770_vm6, %v2005_v19, 0.0  ;;  %v1799_v45 = vsub.f32 %v4758_v42, %v4843_v8  ;;  %v1802_v46 = vmul.f32 %v1798_v43, %v1798_v43 }
 0x628   : > { %v2010_v25 = vadd.f32 %v2009_v22, %v2008_v18  ;;  %v1873_v26 = vadd.f32 %v1872_v20, %v1871_v16  ;;  %v1927_v51 = vadd.f32 %v1926_v24, %v1925_v6  ;;  %v1844_v31 = vadd.f32 %v1843_v27, %v1842_v21 }
 0x629   : > { %v1958_v29 = vadd.f32 %v1957_v23, %v1956_v63  ;;  %v1803_v3 = vmul.f32 %v1799_v45, %v1799_v45  ;;  %v1800_v9 = vsub.f32 %v4764_v47, %v4843_v8  ;;  %v1806_v48 = vsel %vm1612_vm13, %v1802_v46, 0.0  ;;  %v2326_v23 = vld [vmem:[#allocation4 + $0x1] sm:$0xff] }
 0x62a   : > { %v2012_v30 = vadd.f32 %v2011_v28, %v2010_v25  ;;  %1875 = vrot.lane.b32.xlu2 %v1873_v26, %s3956_s16  ;;  %v1928_v33 = vrot.slane %v1927_v51, 2  ;;  %1846 = vrot.lane.b32.xlu0 %v1844_v31, %s3955_s13  ;;  %v1801_v56 = vsub.f32 %v4802_v61, %v4843_v8  ;;  %v2330_v25 = vpack.c.bf16 %v2326_v23, %v2326_v23  ;;  %v2313_v45 = vld [vmem:[#allocation4] sm:$0xff] }
 0x62b   : > { %v1959_v32 = vrot.slane %v1958_v29, 1  ;;  %v1807_v49 = vsel %vm1612_vm13, %v1803_v3, 0.0  ;;  %v1804_v50 = vmul.f32 %v1800_v9, %v1800_v9  ;;  %v2317_v46 = vpack.c.bf16 %v2313_v45, %v2313_v45 }
 0x62c   : > { %v2013_v34 = vrot.slane %v2012_v30, 4  ;;  %v1929_v35 = vadd.f32 %v1928_v33, %v1927_v51  ;;  %v1808_v11 = vadd.f32 %v1807_v49, %v1806_v48  ;;  %v1805_v0 = vmul.f32 %v1801_v56, %v1801_v56  ;;  %2338 = vrot.lane.b32.xlu1 %v2330_v25, %s3962_s10 }
 0x62d   : > { %v1960_v36 = vadd.f32 %v1959_v32, %v1958_v29  ;;  %v1809_v2 = vsel %vm1612_vm13, %v1804_v50, 0.0  ;;  %2322 = vst.msk [vmem:[#allocation5] sm:$0xf] %vm2321_vm8, %v2317_v46 }
 0x62e   : > { %v2014_v37 = vadd.f32 %v2013_v34, %v2012_v30  ;;  %v1930_v38 = vrot.slane %v1929_v35, 1  ;;  %v1810_v57 = vadd.f32 %v1809_v2, %v1808_v11  ;;  %v1811_v5 = vsel %vm1612_vm13, %v1805_v0, 0.0  ;;  %v1640_v30 = vld [vmem:[%s5361_s4] sm:$0x1] }
 0x630   : > { %v2015_v39 = vrot.slane %v2014_v37, 2  ;;  %v1931_v40 = vadd.f32 %v1930_v38, %v1929_v35  ;;  %v1812_v13 = vadd.f32 %v1811_v5, %v1810_v57 }
 0x632   : > { %1962 = vrot.lane.b32.xlu2 %v1960_v36, %s3974_s11  ;;  %v2016_v41 = vadd.f32 %v2015_v39, %v2014_v37  ;;  %1933 = vrot.lane.b32.xlu0 %v1931_v40, %s3975_s14  ;;  %v1813_v58 = vrot.slane %v1812_v13, 4  ;;  %v1641_v36 = vld [vmem:[%s5362_s5] sm:$0x1] }
 0x634   : > { %v2017_v10 = vrot.slane %v2016_v41, 1  ;;  %v1814_v12 = vadd.f32 %v1813_v58, %v1812_v13 }
 0x636   : > { %v2018_v1 = vadd.f32 %v2017_v10, %v2016_v41  ;;  %v1815_v55 = vrot.slane %v1814_v12, 2 }
 0x638   : > { %v1816_v7 = vadd.f32 %v1815_v55, %v1814_v12 }
 0x63a   : > { %2020 = vrot.lane.b32.xlu0 %v2018_v1, %s5391_s12  ;;  %v1817_v14 = vrot.slane %v1816_v7, 1 }
 0x63c   : > { %v1818_v15 = vadd.f32 %v1817_v14, %v1816_v7 }
 0x681   : > { %v1905_v8 = vpop.permute.xlu1 %1904 }
 0x684   : > { %v1876_v52 = vpop.permute.xlu2 %1875 }
 0x68c   : > { %v1963_v62 = vpop.permute.xlu2 %1962 }
 0x68d   : > { %v1992_v18 = vpop.permute.xlu1 %1991 }
 0x69c   : > { %v1847_v60 = vpop.permute.xlu0 %1846 }
 0x69d   : > { %v1849_v6 = vadd.f32 %v1847_v60, %v1818_v15 }
 0x69e   : > { %v2339_v3 = vpop.permute.xlu1 %2338 }
 0x69f   : > { %v1878_v16 = vadd.f32 %v1876_v52, %v1849_v6  ;;  %v2346_v49 = vrot.slane %v2339_v3, 4 }
 0x6a1   : > { %v1907_v17 = vadd.f32 %v1905_v8, %v1878_v16  ;;  %v2351_v56 = vsel %vm1592_vm7, %v2346_v49, %v2339_v3 }
 0x6a2   : > { %2361 = vst.msk [vmem:[#allocation5] sm:$0xff] %vm5047_vm15, %v2351_v56 }
 0x6a4   : > { %v1934_v19 = vpop.permute.xlu0 %1933 }
 0x6a5   : > { %v1936_v59 = vadd.f32 %v1934_v19, %v1907_v17 }
 0x6a7   : > { %v1965_v63 = vadd.f32 %v1963_v62, %v1936_v59 }
 0x6a9   : > { %v1994_v20 = vadd.f32 %v1992_v18, %v1965_v63 }
 0x6ac   : > { %v2021_v21 = vpop.permute.xlu0 %2020 }
 0x6ad   : > { %v2023_v22 = vadd.f32 %v2021_v21, %v1994_v20 }
 0x6af   : > { %v2024_v24 = vmul.f32 %v2023_v22, %v4837_v4 }
 0x6b1   : > { %v2025_v26 = vadd.f32 1e-05, %v2024_v24 }
 0x6b3   : > { %3814 = vrsqrt.f32 %v2025_v26  ;;  %vm2032_vm13 = vweird.f32 %v2025_v26 }
 0x6b9   : > { %v3815_v4 = vpop.eup %3814 }
 0x6ba   : > { %v2027_v27 = vmul.f32 %v3815_v4, %v2025_v26  ;;  %vm2033_vm11 = vweird.f32 %v3815_v4 }
 0x6bb   : > { %vm2034_vm12 = vmor %vm2032_vm13, %vm2033_vm11  ;;  %vm2535_vm13 = vcmask 1044224  }
 0x6bc   : > { %v2028_v28 = vmul.f32 %v3815_v4, %v2027_v27 }
 0x6be   : > { %v2029_v29 = vmul.f32 0.5, %v2028_v28 }
 0x6c0   : > { %v2030_v51 = vsub.f32 1.5, %v2029_v29 }
 0x6c2   : > { %v2031_v31 = vmul.f32 %v3815_v4, %v2030_v51 }
 0x6c4   : > { %v2035_v32 = vsel %vm2034_vm12, %v3815_v4, %v2031_v31  ;;  %vm2536_vm12 = vcmask 392196  }
 0x6c5   : > { %v2036_v33 = vmul.f32 %v2035_v32, %v1640_v30 }
 0x6c7   : > { %v2040_v34 = vperm.slane %v2036_v33, 0  ;;  %v2037_v35 = vmul.f32 %v2036_v33, %v4840_v54 }
 0x6c9   : > { %2176 = vrot.lane.b32.xlu0 %v2040_v34, %s5396_s6  ;;  %2108 = vrot.lane.b32.xlu1 %v2040_v34, %s5393_s29  ;;  %v2038_v37 = vsub.f32 %v1641_v36, %v2037_v35  ;;  %v2042_v54 = vmul.f32 %v2040_v34, %v4760_v44  ;;  %v2043_v39 = vmul.f32 %v2040_v34, %v4758_v42 }
 0x6ca   : > { %2074 = vrot.lane.b32.xlu2 %v2040_v34, %s5394_s19  ;;  %v2044_v40 = vmul.f32 %v2040_v34, %v4764_v47  ;;  %v2045_v1 = vmul.f32 %v2040_v34, %v4802_v61 }
 0x6cb   : > { %v2047_v53 = vperm.slane %v2038_v37, 0 }
 0x6cd   : > { %v2049_v38 = vadd.f32 %v2047_v53, %v2042_v54  ;;  %v2050_v41 = vadd.f32 %v2047_v53, %v2043_v39  ;;  %v2051_v10 = vadd.f32 %v2047_v53, %v2044_v40  ;;  %v2052_v43 = vadd.f32 %v2047_v53, %v2045_v1 }
 0x6d1   : > { %2278 = vrot.lane.b32.xlu0 %v2040_v34, %s3978_s30  ;;  %2210 = vrot.lane.b32.xlu1 %v2040_v34, %s5395_s22 }
 0x6d2   : > { %2142 = vrot.lane.b32.xlu2 %v2040_v34, %s5392_s18 }
 0x6d9   : > { %2115 = vrot.lane.b32.xlu1 %v2047_v53, %s5393_s29  ;;  %2081 = vrot.lane.b32.xlu0 %v2047_v53, %s5394_s19 }
 0x6da   : > { %2244 = vrot.lane.b32.xlu2 %v2040_v34, %s3977_s17 }
 0x6e1   : > { %2217 = vrot.lane.b32.xlu1 %v2047_v53, %s5395_s22  ;;  %2183 = vrot.lane.b32.xlu0 %v2047_v53, %s5396_s6 }
 0x6e2   : > { %2149 = vrot.lane.b32.xlu2 %v2047_v53, %s5392_s18  ;;  %s3714_s18 = sshll.u32 %s4041_s28, 5  ;;  %s3142_s28 = scalar_lea.sflag [#allocation8], %s4115_s23 }
 0x6e3   : > { %s3153_s22 = scalar_lea.hbm %s5364_s7, %s3714_s18 }
 0x6e9   : > { %2285 = vrot.lane.b32.xlu1 %v2047_v53, %s3978_s30  ;;  %2057 = vrot.lane.b32.xlu0 %v2049_v38, %s5394_s19  ;;  %s3156_s30 = sshll.u32 %s3153_s22, 4  ;;  %s3157_s30 = int_to_ptr.hbm [resolvable:$true] %s3156_s30 }
 0x6ea   : > { %2251 = vrot.lane.b32.xlu2 %v2047_v53, %s3977_s17  ;;  %s3890_s13 = sshra.s32 %s3157_s30, 4  ;;  %s3891_s13 = int_to_ptr.hbm [resolvable:$true] %s3890_s13 }
 0x6eb   : > { %s3892_s9 = scalar_lea.hbm %s3891_s13, 32  ;;  %p3897_p11 = scmp.lt.s32.totalorder %s3891_s13, %s5364_s7 }
 0x6ec   : > { %p3893_p1 = scmp.ne.s32.totalorder %s3891_s13, %s3892_s9 }
 0x6ee   : > { %p3894_p4 = pnand %p3893_p1, %p4087_p7 }
 0x6f0   : > { %p3895_p8 = pneg %p3894_p4 }
 0x6f1   : > { %2059 = vrot.lane.b32.xlu1 %v2050_v41, %s5394_s19  ;;  %2061 = vrot.lane.b32.xlu0 %v2051_v10, %s5394_s19 }
 0x6f9   : > { %2063 = vrot.lane.b32.xlu0 %v2052_v43, %s5394_s19 }
 0x724   : > { %v2075_v9 = vpop.permute.xlu2 %2074 }
 0x725   : > { %v2080_v15 = vmul.f32 %v2075_v9, %v4802_v61  ;;  %v2077_v52 = vmul.f32 %v2075_v9, %v4760_v44  ;;  %v2079_v29 = vmul.f32 %v2075_v9, %v4764_v47 }
 0x72c   : > { %v5054_v50 = vpop.permute.xlu2 %2142 }
 0x72d   : > { %v2145_v57 = vmul.f32 %v5054_v50, %v4760_v44  ;;  %v2147_v23 = vmul.f32 %v5054_v50, %v4764_v47  ;;  %v2146_v36 = vmul.f32 %v5054_v50, %v4758_v42  ;;  %v2148_v43 = vmul.f32 %v5054_v50, %v4802_v61 }
 0x734   : > { %v5056_v11 = vpop.permute.xlu2 %2244 }
 0x735   : > { %v2247_v55 = vmul.f32 %v5056_v11, %v4760_v44  ;;  %v2249_v54 = vmul.f32 %v5056_v11, %v4764_v47  ;;  %v2250_v56 = vmul.f32 %v5056_v11, %v4802_v61 }
 0x73b   : > { %v5058_v0 = vpop.permute.xlu0 %2176  ;;  %v5060_v2 = vpop.permute.xlu1 %2108 }
 0x73c   : > { %v5064_v5 = vpop.permute.xlu2 %2149  ;;  %v2111_v60 = vmul.f32 %v5060_v2, %v4760_v44  ;;  %v2112_v6 = vmul.f32 %v5060_v2, %v4758_v42  ;;  %v2182_v63 = vmul.f32 %v5058_v0, %v4802_v61  ;;  %v2179_v18 = vmul.f32 %v5058_v0, %v4760_v44 }
 0x73d   : > { %v2152_v13 = vadd.f32 %v5064_v5, %v2145_v57  ;;  %v2154_v4 = vadd.f32 %v5064_v5, %v2147_v23  ;;  %v2153_v39 = vadd.f32 %v5064_v5, %v2146_v36  ;;  %v2181_v41 = vmul.f32 %v5058_v0, %v4764_v47 }
 0x73e   : > { %v2113_v10 = vmul.f32 %v5060_v2, %v4764_v47  ;;  %v2155_v3 = vadd.f32 %v5064_v5, %v2148_v43  ;;  %v2180_v49 = vmul.f32 %v5058_v0, %v4758_v42 }
 0x73f   : > { %2160 = vrot.lane.b32.xlu0 %v2152_v13, %s5394_s19 }
 0x743   : > { %v5068_v58 = vpop.permute.xlu0 %2278  ;;  %v5070_v12 = vpop.permute.xlu1 %2210 }
 0x744   : > { %v5074_v7 = vpop.permute.xlu2 %2251  ;;  %v2213_v20 = vmul.f32 %v5070_v12, %v4760_v44  ;;  %v2281_v27 = vmul.f32 %v5068_v58, %v4760_v44  ;;  %v2284_v28 = vmul.f32 %v5068_v58, %v4802_v61  ;;  %v2214_v31 = vmul.f32 %v5070_v12, %v4758_v42 }
 0x745   : > { %v2254_v14 = vadd.f32 %v5074_v7, %v2247_v55  ;;  %v2078_v44 = vmul.f32 %v2075_v9, %v4758_v42  ;;  %v2256_v40 = vadd.f32 %v5074_v7, %v2249_v54  ;;  %v2248_v9 = vmul.f32 %v5056_v11, %v4758_v42 }
 0x746   : > { %v2257_v5 = vadd.f32 %v5074_v7, %v2250_v56  ;;  %v2283_v13 = vmul.f32 %v5068_v58, %v4764_v47  ;;  %v2215_v0 = vmul.f32 %v5070_v12, %v4764_v47  ;;  %v2216_v47 = vmul.f32 %v5070_v12, %v4802_v61 }
 0x747   : > { %2262 = vrot.lane.b32.xlu0 %v2254_v14, %s5394_s19  ;;  %v2255_v57 = vadd.f32 %v5074_v7, %v2248_v9  ;;  %v2114_v7 = vmul.f32 %v5060_v2, %v4802_v61  ;;  %v2282_v14 = vmul.f32 %v5068_v58, %v4758_v42  ;;  %v2365_v61 = vld [vmem:[#allocation4 + $0x2] sm:$0xff] }
 0x748   : > { %v2369_v12 = vpack.c.bf16 %v2365_v61, %v2365_v61  ;;  %v3670_v61 = vld [vmem:[#allocation9 + $0x8] sm:$0xff] }
 0x74b   : > { %v5084_v16 = vpop.permute.xlu1 %2115  ;;  %v2082_v8 = vpop.permute.xlu0 %2081 }
 0x74c   : > { %v5086_v17 = vadd.f32 %v2082_v8, %v2080_v15  ;;  %v2084_v19 = vadd.f32 %v2082_v8, %v2077_v52  ;;  %v2118_v59 = vadd.f32 %v5084_v16, %v2111_v60  ;;  %v2119_v62 = vadd.f32 %v5084_v16, %v2112_v6 }
 0x74d   : > { %v2086_v34 = vadd.f32 %v2082_v8, %v2079_v29  ;;  %v2085_v38 = vadd.f32 %v2082_v8, %v2078_v44  ;;  %v2120_v45 = vadd.f32 %v5084_v16, %v2113_v10  ;;  %v2121_v15 = vadd.f32 %v5084_v16, %v2114_v7  ;;  %v3674_v7 = vld [vmem:[#allocation9 + $0x28] sm:$0xff] }
 0x74e   : > { %2092 = vrot.lane.b32.xlu2 %v2084_v19, %s5394_s19  ;;  %2126 = vrot.lane.b32.xlu1 %v2118_v59, %s5394_s19 }
 0x74f   : > { %2128 = vrot.lane.b32.xlu0 %v2119_v62, %s5394_s19 }
 0x753   : > { %v5099_v21 = vpop.permute.xlu1 %2217  ;;  %v2184_v22 = vpop.permute.xlu0 %2183 }
 0x754   : > { %v5103_v24 = vadd.f32 %v2184_v22, %v2182_v63  ;;  %v2186_v25 = vadd.f32 %v2184_v22, %v2179_v18  ;;  %v2220_v26 = vadd.f32 %v5099_v21, %v2213_v20  ;;  %v2221_v35 = vadd.f32 %v5099_v21, %v2214_v31 }
 0x755   : > { %v2188_v46 = vadd.f32 %v2184_v22, %v2181_v41  ;;  %v2187_v50 = vadd.f32 %v2184_v22, %v2180_v49  ;;  %v2222_v55 = vadd.f32 %v5099_v21, %v2215_v0  ;;  %v2223_v60 = vadd.f32 %v5099_v21, %v2216_v47  ;;  %v3676_v0 = vld [vmem:[#allocation9 + $0x38] sm:$0xff] }
 0x756   : > { %2194 = vrot.lane.b32.xlu2 %v2186_v25, %s5394_s19  ;;  %2228 = vrot.lane.b32.xlu1 %v2220_v26, %s5394_s19  ;;  %v3672_v47 = vld [vmem:[#allocation9 + $0x18] sm:$0xff] }
 0x757   : > { %2164 = vrot.lane.b32.xlu0 %v2154_v4, %s5394_s19  ;;  %3019 = vmatpush.bf16.msra.mxu3 %v3676_v0 }
 0x75b   : > { %v2286_v51 = vpop.permute.xlu1 %2285  ;;  %v2058_v30 = vpop.permute.xlu0 %2057 }
 0x75c   : > { %v2288_v32 = vadd.f32 %v2286_v51, %v2281_v27  ;;  %v2291_v33 = vadd.f32 %v2286_v51, %v2284_v28  ;;  %2070 = vst.msk [vmem:[#allocation4 + $0x11] sm:$0xff] %vm1656_vm1, %v2058_v30  ;;  %v2290_v11 = vadd.f32 %v2286_v51, %v2283_v13  ;;  %v2289_v52 = vadd.f32 %v2286_v51, %v2282_v14 }
 0x75e   : > { %2296 = vrot.lane.b32.xlu2 %v2288_v32, %s5394_s19  ;;  %2096 = vrot.lane.b32.xlu1 %v2086_v34, %s5394_s19 }
 0x75f   : > { %2230 = vrot.lane.b32.xlu0 %v2221_v35, %s5394_s19 }
 0x763   : > { %v2060_v37 = vpop.permute.xlu1 %2059  ;;  %v2062_v53 = vpop.permute.xlu0 %2061 }
 0x764   : > { %2071 = vst.msk [vmem:[#allocation4 + $0x21] sm:$0xff] %vm1656_vm1, %v2060_v37 }
 0x765   : > { %2072 = vst.msk [vmem:[#allocation4 + $0x31] sm:$0xff] %vm1656_vm1, %v2062_v53 }
 0x766   : > { %2094 = vrot.lane.b32.xlu2 %v2085_v38, %s5394_s19  ;;  %2162 = vrot.lane.b32.xlu1 %v2153_v39, %s5394_s19  ;;  %v2574_v38 = vld [vmem:[#allocation4 + $0x52] sm:$0xff] }
 0x767   : > { %2266 = vrot.lane.b32.xlu0 %v2256_v40, %s5394_s19 }
 0x76b   : > { %v2064_v1 = vpop.permute.xlu0 %2063 }
 0x76c   : > { %2073 = vst.msk [vmem:[#allocation4 + $0x41] sm:$0xff] %vm1656_vm1, %v2064_v1 }
 0x76e   : > { %2130 = vrot.lane.b32.xlu2 %v2120_v45, %s5394_s19  ;;  %2198 = vrot.lane.b32.xlu1 %v2188_v46, %s5394_s19 }
 0x76f   : > { %2166 = vrot.lane.b32.xlu0 %v2155_v3, %s5394_s19  ;;  %v2578_v3 = vpack.c.bf16 %v2574_v38, %v2574_v38  ;;  %v3706_v38 = vld [vmem:[#allocation9 + $0x128] sm:$0xff] }
 0x771   : > { %2582 = vst.msk [vmem:[#allocation5 + $0x5c] sm:$0xf] %vm2321_vm8, %v2578_v3  ;;  %v3686_v3 = vld [vmem:[#allocation9 + $0x88] sm:$0xff] }
 0x776   : > { %2196 = vrot.lane.b32.xlu2 %v2187_v50, %s5394_s19  ;;  %2264 = vrot.lane.b32.xlu1 %v2255_v57, %s5394_s19 }
 0x777   : > { %2268 = vrot.lane.b32.xlu0 %v2257_v5, %s5394_s19 }
 0x77e   : > { %2232 = vrot.lane.b32.xlu2 %v2222_v55, %s5394_s19  ;;  %2300 = vrot.lane.b32.xlu1 %v2290_v11, %s5394_s19  ;;  %v3684_v55 = vld [vmem:[#allocation9 + $0x78] sm:$0xff]  ;;  %v3675_v11 = vld [vmem:[#allocation9 + $0x30] sm:$0xff] }
 0x77f   : > { %3038 = vmatpush.bf16.msrb.mxu2 %v3684_v55  ;;  %3020 = vmatpush.bf16.msra.mxu3 %v3675_v11  ;;  %v3685_v55 = vld [vmem:[#allocation9 + $0x80] sm:$0xff]  ;;  %v3703_v11 = vld [vmem:[#allocation9 + $0x110] sm:$0xff] }
 0x783   : > { %3021 = vmatpush.bf16.msra.mxu3 %v3674_v7 }
 0x786   : > { %2298 = vrot.lane.b32.xlu2 %v2289_v52, %s5394_s19  ;;  %2132 = vrot.lane.b32.xlu1 %v2121_v15, %s5394_s19  ;;  %v3673_v15 = vld [vmem:[#allocation9 + $0x20] sm:$0xff] }
 0x787   : > { %3022 = vmatpush.bf16.msra.mxu3 %v3673_v15  ;;  %v3702_v15 = vld [vmem:[#allocation9 + $0x108] sm:$0xff] }
 0x78b   : > { %3023 = vmatpush.bf16.msra.mxu3 %v3672_v47 }
 0x78e   : > { %2098 = vrot.lane.b32.xlu2 %v5086_v17, %s5394_s19  ;;  %2234 = vrot.lane.b32.xlu1 %v2223_v60, %s5394_s19  ;;  %v2505_v60 = vld [vmem:[#allocation4 + $0x50] sm:$0xff] }
 0x796   : > { %2200 = vrot.lane.b32.xlu2 %v5103_v24, %s5394_s19  ;;  %2377 = vrot.lane.b32.xlu1 %v2369_v12, %s5396_s6 }
 0x79e   : > { %2302 = vrot.lane.b32.xlu2 %v2291_v33, %s5394_s19 }
 0x7a8   : > { %v2093_v42 = vpop.permute.xlu2 %2092 }
 0x7a9   : > { %2104 = vst.msk [vmem:[#allocation4 + $0x11] sm:$0xff] %vm1675_vm10, %v2093_v42  ;;  %v2509_v42 = vpack.c.bf16 %v2505_v60, %v2505_v60  ;;  %v3693_v60 = vld [vmem:[#allocation9 + $0xc0] sm:$0xff] }
 0x7b0   : > { %v2195_v2 = vpop.permute.xlu2 %2194 }
 0x7b1   : > { %v2161_v58 = vpop.permute.xlu0 %2160 }
 0x7b8   : > { %v2297_v6 = vpop.permute.xlu2 %2296 }
 0x7b9   : > { %v2263_v16 = vpop.permute.xlu0 %2262 }
 0x7c0   : > { %v2095_v8 = vpop.permute.xlu2 %2094  ;;  %v2127_v19 = vpop.permute.xlu1 %2126 }
 0x7c1   : > { %2105 = vst.msk [vmem:[#allocation4 + $0x21] sm:$0xff] %vm1675_vm10, %v2095_v8  ;;  %v2129_v17 = vpop.permute.xlu0 %2128  ;;  %v3681_v8 = vld [vmem:[#allocation9 + $0x60] sm:$0xff] }
 0x7c2   : > { %2138 = vst.msk [vmem:[#allocation4 + $0x11] sm:$0xff] %vm1694_vm9, %v2127_v19 }
 0x7c3   : > { %2172 = vst.msk [vmem:[#allocation4 + $0x11] sm:$0xff] %vm1713_vm5, %v2161_v58  ;;  %v3671_v58 = vld [vmem:[#allocation9 + $0x10] sm:$0xff] }
 0x7c4   : > { %2206 = vst.msk [vmem:[#allocation4 + $0x11] sm:$0xff] %vm1732_vm4, %v2195_v2  ;;  %v3683_v2 = vld [vmem:[#allocation9 + $0x70] sm:$0xff]  ;;  %3024 = vmatpush.bf16.msra.mxu3 %v3671_v58 }
 0x7c5   : > { %2139 = vst.msk [vmem:[#allocation4 + $0x21] sm:$0xff] %vm1694_vm9, %v2129_v17  ;;  %3039 = vmatpush.bf16.msrb.mxu2 %v3683_v2  ;;  %v3669_v17 = vld [vmem:[#allocation9] sm:$0xff] }
 0x7c8   : > { %v2131_v59 = vpop.permute.xlu2 %2130  ;;  %v2229_v62 = vpop.permute.xlu1 %2228  ;;  %3025 = vmatpush.bf16.msra.mxu3 %v3670_v61  ;;  %v3713_v61 = vld [vmem:[#allocation9 + $0x160] sm:$0xff] }
 0x7c9   : > { %2240 = vst.msk [vmem:[#allocation4 + $0x11] sm:$0xff] %vm1751_vm3, %v2229_v62  ;;  %v2165_v63 = vpop.permute.xlu0 %2164  ;;  %v3679_v62 = vld [vmem:[#allocation9 + $0x50] sm:$0xff] }
 0x7ca   : > { %2274 = vst.msk [vmem:[#allocation4 + $0x11] sm:$0xff] %vm1770_vm6, %v2263_v16  ;;  %v3682_v16 = vld [vmem:[#allocation9 + $0x68] sm:$0xff] }
 0x7cb   : > { %2309 = vst.msk [vmem:[#allocation4 + $0x11] sm:$0xff] %vm2308_vm2, %v2297_v6  ;;  %v2545_v6 = vld [vmem:[#allocation4 + $0x51] sm:$0xff]  ;;  %3040 = vmatpush.bf16.msrb.mxu2 %v3682_v16 }
 0x7cc   : > { %v2549_v12 = vpack.c.bf16 %v2545_v6, %v2545_v6  ;;  %3026 = vmatpush.bf16.msra.mxu3 %v3669_v17 }
 0x7cf   : > { %3041 = vmatpush.bf16.msrb.mxu2 %v3681_v8 }
 0x7d0   : > { %v2197_v18 = vpop.permute.xlu2 %2196  ;;  %v2097_v20 = vpop.permute.xlu1 %2096 }
 0x7d1   : > { %2106 = vst.msk [vmem:[#allocation4 + $0x31] sm:$0xff] %vm1675_vm10, %v2097_v20  ;;  %v2231_v25 = vpop.permute.xlu0 %2230  ;;  %v3692_v20 = vld [vmem:[#allocation9 + $0xb8] sm:$0xff] }
 0x7d2   : > { %2140 = vst.msk [vmem:[#allocation4 + $0x31] sm:$0xff] %vm1694_vm9, %v2131_v59  ;;  %v2327_v21 = vld [vmem:[#allocation4 + $0x11] sm:$0xff]  ;;  %3057 = vmatpush.bf16.msrb.mxu0 %v3692_v20 }
 0x7d3   : > { %v2394_v22 = vld [vmem:[#allocation4 + $0x10] sm:$0xff]  ;;  %2174 = vst.msk [vmem:[#allocation4 + $0x31] sm:$0xff] %vm1713_vm5, %v2165_v63  ;;  %v5193_v23 = vpack.c.bf16 %v2327_v21, %v2327_v21  ;;  %v3680_v59 = vld [vmem:[#allocation9 + $0x58] sm:$0xff]  ;;  %v3678_v63 = vld [vmem:[#allocation9 + $0x48] sm:$0xff] }
 0x7d4   : > { %v2398_v24 = vpack.c.bf16 %v2394_v22, %v2394_v22  ;;  %v2366_v29 = vld [vmem:[#allocation4 + $0x12] sm:$0xff]  ;;  %3042 = vmatpush.bf16.msrb.mxu2 %v3680_v59 }
 0x7d5   : > { %2340 = vrot.lane.b32.xlu0 %v5193_v23, %s3962_s10  ;;  %v2370_v30 = vpack.c.bf16 %v2366_v29, %v2366_v29 }
 0x7d6   : > { %2323 = vst.msk [vmem:[#allocation5 + $0x18] sm:$0xf] %vm2321_vm8, %v2398_v24 }
 0x7d8   : > { %v2233_v26 = vpop.permute.xlu2 %2232  ;;  %v2163_v4 = vpop.permute.xlu1 %2162  ;;  %3043 = vmatpush.bf16.msrb.mxu2 %v3679_v62 }
 0x7d9   : > { %2173 = vst.msk [vmem:[#allocation4 + $0x21] sm:$0xff] %vm1713_vm5, %v2163_v4  ;;  %v2267_v51 = vpop.permute.xlu0 %2266  ;;  %v3690_v4 = vld [vmem:[#allocation9 + $0xa8] sm:$0xff] }
 0x7da   : > { %2207 = vst.msk [vmem:[#allocation4 + $0x21] sm:$0xff] %vm1732_vm4, %v2197_v18  ;;  %v3677_v18 = vld [vmem:[#allocation9 + $0x40] sm:$0xff] }
 0x7db   : > { %2241 = vst.msk [vmem:[#allocation4 + $0x21] sm:$0xff] %vm1751_vm3, %v2231_v25  ;;  %v3700_v25 = vld [vmem:[#allocation9 + $0xf8] sm:$0xff] }
 0x7dc   : > { %3044 = vmatpush.bf16.msrb.mxu2 %v3678_v63  ;;  %3076 = vmatpush.bf16.msrb.mxu1 %v3700_v25 }
 0x7dd   : > { %2406 = vrot.lane.b32.xlu0 %v2398_v24, %s3956_s16  ;;  %v3691_v24 = vld [vmem:[#allocation9 + $0xb0] sm:$0xff] }
 0x7de   : > { %3058 = vmatpush.bf16.msrb.mxu0 %v3691_v24  ;;  %v3712_v24 = vld [vmem:[#allocation9 + $0x158] sm:$0xff] }
 0x7e0   : > { %v2299_v27 = vpop.permute.xlu2 %2298  ;;  %v2199_v28 = vpop.permute.xlu1 %2198  ;;  %3045 = vmatpush.bf16.msrb.mxu2 %v3677_v18 }
 0x7e1   : > { %2208 = vst.msk [vmem:[#allocation4 + $0x31] sm:$0xff] %vm1732_vm4, %v2199_v28  ;;  %v2167_v54 = vpop.permute.xlu0 %2166 }
 0x7e2   : > { %2242 = vst.msk [vmem:[#allocation4 + $0x31] sm:$0xff] %vm1751_vm3, %v2233_v26  ;;  %v3708_v26 = vld [vmem:[#allocation9 + $0x138] sm:$0xff]  ;;  %3059 = vmatpush.bf16.msrb.mxu0 %v3690_v4 }
 0x7e3   : > { %2276 = vst.msk [vmem:[#allocation4 + $0x31] sm:$0xff] %vm1770_vm6, %v2267_v51  ;;  %3095 = vmatpush.bf16.msrb.mxu3 %v3708_v26 }
 0x7e4   : > { %3715 = vmatpush.bf16.msra.mxu2 %v3713_v61 }
 0x7e5   : > { %2379 = vrot.lane.b32.xlu0 %v2370_v30, %s5396_s6 }
 0x7e8   : > { %v2099_v31 = vpop.permute.xlu2 %2098  ;;  %v2265_v32 = vpop.permute.xlu1 %2264  ;;  %3716 = vmatpush.bf16.msra.mxu2 %v3712_v24 }
 0x7e9   : > { %2107 = vst.msk [vmem:[#allocation4 + $0x41] sm:$0xff] %vm1675_vm10, %v2099_v31  ;;  %v2269_v49 = vpop.permute.xlu0 %2268  ;;  %vm2426_vm10 = vcmask 523268   ;;  %v3395_v31 = vld [vmem:[#allocation5] sm:$0xf] }
 0x7ea   : > { %2275 = vst.msk [vmem:[#allocation4 + $0x21] sm:$0xff] %vm1770_vm6, %v2265_v32  ;;  %vm5251_vm1 = vmor %vm2426_vm10, %vm1237_vm14  ;;  %v3699_v32 = vld [vmem:[#allocation9 + $0xf0] sm:$0xff] }
 0x7eb   : > { %2310 = vst.msk [vmem:[#allocation4 + $0x21] sm:$0xff] %vm2308_vm2, %v2299_v27  ;;  %3077 = vmatpush.bf16.msrb.mxu1 %v3699_v32 }
 0x7f0   : > { %v2301_v33 = vpop.permute.xlu1 %2300  ;;  %v2201_v39 = vpop.permute.xlu2 %2200 }
 0x7f1   : > { %2311 = vst.msk [vmem:[#allocation4 + $0x31] sm:$0xff] %vm2308_vm2, %v2301_v33 }
 0x7f2   : > { %v2571_v34 = vld [vmem:[#allocation4 + $0x22] sm:$0xff] }
 0x7f3   : > { %v2502_v35 = vld [vmem:[#allocation4 + $0x20] sm:$0xff]  ;;  %v2575_v36 = vpack.c.bf16 %v2571_v34, %v2571_v34 }
 0x7f4   : > { %v2328_v44 = vld [vmem:[#allocation4 + $0x21] sm:$0xff]  ;;  %v2506_v37 = vpack.c.bf16 %v2502_v35, %v2502_v35 }
 0x7f5   : > { %v2332_v53 = vpack.c.bf16 %v2328_v44, %v2328_v44  ;;  %2579 = vst.msk [vmem:[#allocation5 + $0x14] sm:$0xf] %vm2321_vm8, %v2575_v36  ;;  %v3689_v44 = vld [vmem:[#allocation9 + $0xa0] sm:$0xff] }
 0x7f6   : > { %2514 = vrot.lane.b32.xlu0 %v2506_v37, %s3975_s14  ;;  %2324 = vst.msk [vmem:[#allocation5 + $0x30] sm:$0xf] %vm2321_vm8, %v2506_v37  ;;  %3060 = vmatpush.bf16.msrb.mxu0 %v3689_v44  ;;  %v3709_v44 = vld [vmem:[#allocation9 + $0x140] sm:$0xff] }
 0x7f7   : > { %2342 = vrot.lane.b32.xlu2 %v2332_v53, %s3962_s10 }
 0x7f8   : > { %v2572_v40 = vld [vmem:[#allocation4 + $0x32] sm:$0xff]  ;;  %v2133_v41 = vpop.permute.xlu1 %2132  ;;  %v2303_v56 = vpop.permute.xlu2 %2302 }
 0x7f9   : > { %v2329_v10 = vld [vmem:[#allocation4 + $0x31] sm:$0xff]  ;;  %v2576_v43 = vpack.c.bf16 %v2572_v40, %v2572_v40  ;;  %2141 = vst.msk [vmem:[#allocation4 + $0x41] sm:$0xff] %vm1694_vm9, %v2133_v41  ;;  %vm2389_vm9 = vcmask 912640  }
 0x7fa   : > { %v2503_v1 = vld [vmem:[#allocation4 + $0x30] sm:$0xff]  ;;  %v2333_v45 = vpack.c.bf16 %v2329_v10, %v2329_v10  ;;  %2175 = vst.msk [vmem:[#allocation4 + $0x41] sm:$0xff] %vm1713_vm5, %v2167_v54  ;;  %v3688_v54 = vld [vmem:[#allocation9 + $0x98] sm:$0xff]  ;;  %vm2466_vm5 = vcmask 130052  }
 0x7fb   : > { %v2507_v46 = vpack.c.bf16 %v2503_v1, %v2503_v1  ;;  %2580 = vst.msk [vmem:[#allocation5 + $0x2c] sm:$0xf] %vm2321_vm8, %v2576_v43  ;;  %3061 = vmatpush.bf16.msrb.mxu0 %v3688_v54  ;;  %v3697_v1 = vld [vmem:[#allocation9 + $0xe0] sm:$0xff] }
 0x7fc   : > { %2344 = vrot.lane.b32.xlu1 %v2333_v45, %s3962_s10  ;;  %2209 = vst.msk [vmem:[#allocation4 + $0x41] sm:$0xff] %vm1732_vm4, %v2201_v39  ;;  %s5399_s10 = smov 64   ;;  %vm2465_vm4 = vcmask 1043968  }
 0x7fd   : > { %2325 = vst.msk [vmem:[#allocation5 + $0x48] sm:$0xf] %vm2321_vm8, %v2507_v46  ;;  %vm5265_vm11 = vmor %vm2466_vm5, %vm2465_vm4 }
 0x7fe   : > { %2486 = vrot.lane.b32.xlu0 %v2575_v36, %s5393_s29 }
 0x7ff   : > { %2408 = vrot.lane.b32.xlu2 %v2506_v37, %s3956_s16 }
 0x800   : > { %v2235_v9 = vpop.permute.xlu1 %2234 }
 0x801   : > { %2243 = vst.msk [vmem:[#allocation4 + $0x41] sm:$0xff] %vm1751_vm3, %v2235_v9  ;;  %vm5402_vm3 = vcmask 916480   ;;  %v3704_v9 = vld [vmem:[#allocation9 + $0x118] sm:$0xff] }
 0x802   : > { %2277 = vst.msk [vmem:[#allocation4 + $0x41] sm:$0xff] %vm1770_vm6, %v2269_v49  ;;  %vm5403_vm14 = vmmov %vm5402_vm3  ;;  %vm2456_vm6 = vcmask 523264  }
 0x803   : > { %2312 = vst.msk [vmem:[#allocation4 + $0x41] sm:$0xff] %vm2308_vm2, %v2303_v56  ;;  %vm5278_vm2 = vmor %vm2536_vm12, %vm2535_vm13 }
 0x804   : > { %2446 = vrot.lane.b32.xlu1 %v2332_v53, %s5399_s10  ;;  %vm5408_vm10 = vmmov %vm5402_vm3 }
 0x806   : > { %2554 = vrot.lane.b32.xlu0 %v2332_v53, %s3977_s17  ;;  %v3698_v53 = vld [vmem:[#allocation9 + $0xe8] sm:$0xff] }
 0x807   : > { %2444 = vrot.lane.b32.xlu2 %v5193_v23, %s5399_s10  ;;  %3078 = vmatpush.bf16.msrb.mxu1 %v3698_v53 }
 0x808   : > { %v2378_v19 = vpop.permute.xlu1 %2377 }
 0x809   : > { %2390 = vst.msk [vmem:[#allocation5 + $0x4] sm:$0xf] %vm2389_vm9, %v2378_v19 }
 0x80a   : > { %v2573_v50 = vld [vmem:[#allocation4 + $0x42] sm:$0xff] }
 0x80b   : > { %v2577_v57 = vpack.c.bf16 %v2573_v50, %v2573_v50  ;;  %v2397_v5 = vld [vmem:[#allocation4 + $0x40] sm:$0xff]  ;;  %3079 = vmatpush.bf16.msrb.mxu1 %v3697_v1 }
 0x80c   : > { %2484 = vrot.lane.b32.xlu1 %v2370_v30, %s5393_s29  ;;  %v2401_v13 = vpack.c.bf16 %v2397_v5, %v2397_v5  ;;  %v2435_v14 = vld [vmem:[#allocation4 + $0x41] sm:$0xff] }
 0x80d   : > { %2581 = vst.msk [vmem:[#allocation5 + $0x44] sm:$0xf] %vm2321_vm8, %v2577_v57  ;;  %v2439_v52 = vpack.c.bf16 %v2435_v14, %v2435_v14  ;;  %v3694_v14 = vld [vmem:[#allocation9 + $0xc8] sm:$0xff]  ;;  %vm2526_vm8 = vcmask 785408  }
 0x80e   : > { %2383 = vrot.lane.b32.xlu0 %v2576_v43, %s5396_s6 }
 0x80f   : > { %2516 = vrot.lane.b32.xlu2 %v2507_v46, %s3975_s14 }
 0x814   : > { %2412 = vrot.lane.b32.xlu1 %v2401_v13, %s3956_s16 }
 0x816   : > { %2518 = vrot.lane.b32.xlu0 %v2401_v13, %s3975_s14 }
 0x817   : > { %2410 = vrot.lane.b32.xlu2 %v2507_v46, %s3956_s16  ;;  %v3696_v46 = vld [vmem:[#allocation9 + $0xd8] sm:$0xff]  ;;  %s3250_s16 = sshll.u32 %s4115_s23, 5 }
 0x818   : > { %3080 = vmatpush.bf16.msrb.mxu1 %v3696_v46 }
 0x81c   : > { %2381 = vrot.lane.b32.xlu1 %v2575_v36, %s5396_s6  ;;  %v3707_v36 = vld [vmem:[#allocation9 + $0x130] sm:$0xff] }
 0x81d   : > { %3096 = vmatpush.bf16.msrb.mxu3 %v3707_v36 }
 0x81e   : > { %2490 = vrot.lane.b32.xlu0 %v2577_v57, %s5393_s29  ;;  %v3695_v57 = vld [vmem:[#allocation9 + $0xd0] sm:$0xff] }
 0x81f   : > { %2556 = vrot.lane.b32.xlu2 %v2333_v45, %s3977_s17  ;;  %3081 = vmatpush.bf16.msrb.mxu1 %v3695_v57 }
 0x821   : > { %3097 = vmatpush.bf16.msrb.mxu3 %v3706_v38 }
 0x823   : > { %3082 = vmatpush.bf16.msrb.mxu1 %v3694_v14 }
 0x824   : > { %2450 = vrot.lane.b32.xlu1 %v2439_v52, %s5399_s10 }
 0x827   : > { %2448 = vrot.lane.b32.xlu2 %v2333_v45, %s5399_s10  ;;  %v3705_v45 = vld [vmem:[#allocation9 + $0x120] sm:$0xff]  ;;  %3083 = vmatpush.bf16.msrb.mxu1 %v3693_v60  ;;  %s3896_s10 = scalar_lea.hbm %s5364_s7, 64 }
 0x828   : > { %3098 = vmatpush.bf16.msrb.mxu3 %v3705_v45  ;;  %v3665_v60 = vld [vmem:[#allocation5 + $0x44] sm:$0xf]  ;;  %p3898_p9 = scmp.lt.s32.totalorder %s3896_s10, %s3892_s9 }
 0x82a   : > { %p3899_p2 = por %p3898_p9, %p3897_p11 }
 0x82c   : > { %2488 = vrot.lane.b32.xlu1 %v2576_v43, %s5393_s29  ;;  %v3687_v43 = vld [vmem:[#allocation9 + $0x90] sm:$0xff]  ;;  %3099 = vmatpush.bf16.msrb.mxu3 %v3704_v9  ;;  %p3900_p10 = pnand %p3899_p2, %p3895_p8 }
 0x82d   : > { %3062 = vmatpush.bf16.msrb.mxu0 %v3687_v43 }
 0x82f   : > { %2520 = vrot.lane.b32.xlu2 %v2509_v42, %s3975_s14  ;;  %v3701_v42 = vld [vmem:[#allocation9 + $0x100] sm:$0xff]  ;;  %s315_s14 = scalar_lea.vmem [#allocation11], %s3250_s16 }
 0x830   : > { %3100 = vmatpush.bf16.msrb.mxu3 %v3703_v11  ;;  %s3154_s6 = sshll.u32 %s315_s14, 4  ;;  %s3155_s6 = int_to_ptr.vmem [resolvable:$true] %s3154_s6 }
 0x831   : > { %3063 = vmatpush.bf16.msrb.mxu0 %v3686_v3 }
 0x834   : > { %2560 = vrot.lane.b32.xlu1 %v2549_v12, %s3977_s17  ;;  %3101 = vmatpush.bf16.msrb.mxu3 %v3702_v15 }
 0x835   : > { %3064 = vmatpush.bf16.msrb.mxu0 %v3685_v55 }
 0x837   : > { %2558 = vrot.lane.b32.xlu2 %v2439_v52, %s3977_s17 }
 0x838   : > { %3102 = vmatpush.bf16.msrb.mxu3 %v3701_v42  ;;  %v3437_v42 = vld [vmem:[#allocation5 + $0x58] sm:$0xf0] }
 0x839   : > { %3117 = vmatpush.bf16.msra.mxu0 %v3713_v61 }
 0x83d   : > { %3118 = vmatpush.bf16.msra.mxu0 %v3712_v24 }
 0x847   : > { %v2341_v21 = vpop.permute.xlu0 %2340 }
 0x848   : > { %v2347_v22 = vrot.slane %v2341_v21, 4 }
 0x84a   : > { %v2352_v23 = vsel %vm1592_vm7, %v2347_v22, %v2341_v21 }
 0x84b   : > { %2362 = vst.msk [vmem:[#allocation5 + $0x18] sm:$0xff] %vm5047_vm15, %v2352_v23 }
 0x84f   : > { %v2407_v28 = vpop.permute.xlu0 %2406 }
 0x850   : > { %v2414_v51 = vrot.slane %v2407_v28, 4 }
 0x851   : > { %v2343_v27 = vpop.permute.xlu2 %2342 }
 0x852   : > { %v2348_v29 = vrot.slane %v2343_v27, 4  ;;  %v2418_v34 = vsel %vm5402_vm3, %v2414_v51, %v2407_v28  ;;  %v3660_v35 = vld [vmem:[#allocation5 + $0x14] sm:$0xf0] }
 0x853   : > { %v3396_v37 = vor.u32 %v3660_v35, %v3395_v31  ;;  %2428 = vst.msk [vmem:[#allocation5 + $0x4] sm:$0xff] %vm5251_vm1, %v2418_v34  ;;  %v3710_v31 = vld [vmem:[#allocation9 + $0x148] sm:$0xff] }
 0x854   : > { %v2353_v33 = vsel %vm1592_vm7, %v2348_v29, %v2343_v27  ;;  %v3711_v29 = vld [vmem:[#allocation9 + $0x150] sm:$0xff] }
 0x855   : > { %2363 = vst.msk [vmem:[#allocation5 + $0x30] sm:$0xff] %vm5047_vm15, %v2353_v33  ;;  %3027 = vmatmul.bf16.vlgmr.msra.gmra.mxu3 %v3396_v37  ;;  %3717 = vmatpush.bf16.msra.mxu2 %v3711_v29 }
 0x856   : > { %3119 = vmatpush.bf16.msra.mxu0 %v3711_v29 }
 0x857   : > { %v2380_v40 = vpop.permute.xlu0 %2379 }
 0x858   : > { %2391 = vst.msk [vmem:[#allocation5 + $0x1c] sm:$0xf] %vm2389_vm9, %v2380_v40 }
 0x859   : > { %v2409_v39 = vpop.permute.xlu2 %2408  ;;  %3718 = vmatpush.bf16.msra.mxu2 %v3710_v31 }
 0x85a   : > { %v2415_v41 = vrot.slane %v2409_v39, 4  ;;  %v3657_v5 = vld [vmem:[#allocation5 + $0x4] sm:$0xf]  ;;  %3120 = vmatpush.bf16.msra.mxu0 %v3710_v31 }
 0x85c   : > { %v2419_v10 = vsel %vm5403_vm14, %v2415_v41, %v2409_v39  ;;  %v3419_v48 = vld [vmem:[#allocation5 + $0x30] sm:$0xf] }
 0x85d   : > { %2429 = vst.msk [vmem:[#allocation5 + $0x1c] sm:$0xff] %vm5251_vm1, %v2419_v10  ;;  %3719 = vmatpush.bf16.msra.mxu2 %v3709_v44 }
 0x85e   : > { %3121 = vmatpush.bf16.msra.mxu0 %v3709_v44 }
 0x861   : > { %v2445_v49 = vpop.permute.xlu2 %2444 }
 0x862   : > { %v2452_v50 = vrot.slane %v2445_v49, 4 }
 0x864   : > { %v2457_v13 = vsel %vm2456_vm6, %v2452_v50, %v2445_v49  ;;  %v3397_v0 = vld [vmem:[#allocation5 + $0x18] sm:$0xf0] }
 0x865   : > { %2468 = vst.msk [vmem:[#allocation5 + $0x8] sm:$0xff] %vm5265_vm11, %v2457_v13  ;;  %v3400_v7 = vor.u32 %v3657_v5, %v3397_v0 }
 0x867   : > { %3046 = vmatmul.bf16.vlgmr.msrb.gmra.mxu2 %v3400_v7 }
 0x868   : > { %v2515_v47 = vpop.permute.xlu0 %2514 }
 0x869   : > { %v2517_v52 = vpop.permute.xlu2 %2516  ;;  %v2522_v22 = vrot.slane %v2515_v47, 4 }
 0x86a   : > { %v2523_v19 = vrot.slane %v2517_v52, 4 }
 0x86b   : > { %v2527_v26 = vsel %vm2526_vm8, %v2522_v22, %v2515_v47 }
 0x86c   : > { %v2528_v21 = vsel %vm2526_vm8, %v2523_v19, %v2517_v52  ;;  %v3403_v27 = vld [vmem:[#allocation5 + $0x8] sm:$0xf]  ;;  %v3413_v19 = vld [vmem:[#allocation5 + $0x28] sm:$0xf0] }
 0x86e   : > { %v2345_v2 = vpop.permute.xlu1 %2344 }
 0x86f   : > { %v2349_v58 = vrot.slane %v2345_v2, 4 }
 0x870   : > { %v2487_v6 = vpop.permute.xlu0 %2486 }
 0x871   : > { %v2354_v16 = vsel %vm1592_vm7, %v2349_v58, %v2345_v2  ;;  %v5275_v12 = vpop.permute.xlu2 %2410 }
 0x872   : > { %2364 = vst.msk [vmem:[#allocation5 + $0x48] sm:$0xff] %vm5047_vm15, %v2354_v16  ;;  %vm2566_vm15 = vcmask 1043840   ;;  %v2416_v40 = vrot.slane %v5275_v12, 4  ;;  %v3440_v16 = vor.u32 %v3665_v60, %v3437_v42 }
 0x874   : > { %v2420_v1 = vsel %vm5402_vm3, %v2416_v40, %v5275_v12 }
 0x876   : > { %v2447_v8 = vpop.permute.xlu1 %2446 }
 0x877   : > { %v2453_v17 = vrot.slane %v2447_v8, 4 }
 0x878   : > { %v2555_v59 = vpop.permute.xlu0 %2554 }
 0x879   : > { %v2458_v62 = vsel %vm2456_vm6, %v2453_v17, %v2447_v8  ;;  %v3666_v18 = vld [vmem:[#allocation5 + $0x44] sm:$0xf0]  ;;  %v2557_v23 = vpop.permute.xlu2 %2556  ;;  %v3659_v17 = vld [vmem:[#allocation5 + $0x14] sm:$0xf] }
 0x87a   : > { %2469 = vst.msk [vmem:[#allocation5 + $0x20] sm:$0xff] %vm5265_vm11, %v2458_v62  ;;  %v3420_v20 = vor.u32 %v3666_v18, %v3419_v48 }
 0x87b   : > { %2498 = vst.msk [vmem:[#allocation5 + $0x24] sm:$0xf] %vm2496_vm0, %v2487_v6 }
 0x87c   : > { %2539 = vst.msk [vmem:[#allocation5 + $0x24] sm:$0xff] %vm5278_vm2, %v2528_v21  ;;  %3032 = vmatmul.bf16.gmra.mxu3 %v3420_v20 }
 0x87d   : > { %2568 = vst.msk [vmem:[#allocation5 + $0x28] sm:$0xf] %vm2566_vm15, %v2557_v23 }
 0x87e   : > { %v2485_v25 = vpop.permute.xlu1 %2484 }
 0x87f   : > { %2497 = vst.msk [vmem:[#allocation5 + $0xc] sm:$0xf] %vm2496_vm0, %v2485_v25 }
 0x880   : > { %2538 = vst.msk [vmem:[#allocation5 + $0xc] sm:$0xff] %vm5278_vm2, %v2527_v26  ;;  %v2384_v4 = vpop.permute.xlu0 %2383 }
 0x881   : > { %2567 = vst.msk [vmem:[#allocation5 + $0x10] sm:$0xf] %vm2566_vm15, %v2555_v59  ;;  %v3661_v28 = vld [vmem:[#allocation5 + $0x1c] sm:$0xf0]  ;;  %v2449_v54 = vpop.permute.xlu2 %2448  ;;  %v3416_v59 = vor.u32 %v3659_v17, %v3413_v19 }
 0x882   : > { %2393 = vst.msk [vmem:[#allocation5 + $0x4c] sm:$0xf] %vm2389_vm9, %v2384_v4  ;;  %v3404_v51 = vor.u32 %v3661_v28, %v3403_v27  ;;  %v2454_v41 = vrot.slane %v2449_v54, 4 }
 0x883   : > { %v3405_v35 = vld [vmem:[#allocation5 + $0x20] sm:$0xf0] }
 0x884   : > { %3065 = vmatmul.bf16.vlgmr.msrb.gmra.mxu0 %v3404_v51  ;;  %v3662_v53 = vld [vmem:[#allocation5 + $0x24] sm:$0xf0]  ;;  %v2459_v43 = vsel %vm2456_vm6, %v2454_v41, %v2449_v54 }
 0x886   : > { %v2413_v32 = vpop.permute.xlu1 %2412 }
 0x887   : > { %v2417_v33 = vrot.slane %v2413_v32, 4  ;;  %v3658_v34 = vld [vmem:[#allocation5 + $0xc] sm:$0xf] }
 0x888   : > { %v3408_v36 = vor.u32 %v3658_v34, %v3405_v35  ;;  %v3411_v37 = vld [vmem:[#allocation5 + $0x10] sm:$0xf]  ;;  %v2519_v45 = vpop.permute.xlu0 %2518 }
 0x889   : > { %v2421_v38 = vsel %vm5408_vm10, %v2417_v33, %v2413_v32  ;;  %v3412_v39 = vor.u32 %v3662_v53, %v3411_v37  ;;  %v2521_v46 = vpop.permute.xlu2 %2520  ;;  %v2524_v30 = vrot.slane %v2519_v45, 4 }
 0x88a   : > { %2431 = vst.msk [vmem:[#allocation5 + $0x4c] sm:$0xff] %vm5251_vm1, %v2421_v38  ;;  %3084 = vmatmul.bf16.vlgmr.msrb.gmra.mxu1 %v3408_v36  ;;  %v2525_v3 = vrot.slane %v2521_v46, 4 }
 0x88b   : > { %v2529_v7 = vsel %vm2526_vm8, %v2524_v30, %v2519_v45 }
 0x88c   : > { %3103 = vmatmul.bf16.vlgmr.msrb.gmra.mxu3 %v3412_v39  ;;  %v2530_v13 = vsel %vm2526_vm8, %v2525_v3, %v2521_v46 }
 0x88e   : > { %v2382_v10 = vpop.permute.xlu1 %2381 }
 0x88f   : > { %2392 = vst.msk [vmem:[#allocation5 + $0x34] sm:$0xf] %vm2389_vm9, %v2382_v10 }
 0x890   : > { %2430 = vst.msk [vmem:[#allocation5 + $0x34] sm:$0xff] %vm5251_vm1, %v2420_v1  ;;  %v2491_v55 = vpop.permute.xlu0 %2490 }
 0x891   : > { %2470 = vst.msk [vmem:[#allocation5 + $0x38] sm:$0xff] %vm5265_vm11, %v2459_v43  ;;  %v3421_v57 = vld [vmem:[#allocation5 + $0x48] sm:$0xf0]  ;;  %v2559_v14 = vpop.permute.xlu2 %2558 }
 0x896   : > { %v2451_v9 = vpop.permute.xlu1 %2450 }
 0x897   : > { %v2455_v49 = vrot.slane %v2451_v9, 4  ;;  %v3663_v50 = vld [vmem:[#allocation5 + $0x34] sm:$0xf] }
 0x898   : > { %v3424_v5 = vor.u32 %v3663_v50, %v3421_v57  ;;  %v3427_v56 = vld [vmem:[#allocation5 + $0x38] sm:$0xf] }
 0x899   : > { %v2460_v0 = vsel %vm2456_vm6, %v2455_v49, %v2451_v9 }
 0x89a   : > { %2471 = vst.msk [vmem:[#allocation5 + $0x50] sm:$0xff] %vm5265_vm11, %v2460_v0  ;;  %3051 = vmatmul.bf16.gmra.mxu2 %v3424_v5 }
 0x89b   : > { %2500 = vst.msk [vmem:[#allocation5 + $0x54] sm:$0xf] %vm2496_vm0, %v2491_v55 }
 0x89c   : > { %2541 = vst.msk [vmem:[#allocation5 + $0x54] sm:$0xff] %vm5278_vm2, %v2530_v13 }
 0x89e   : > { %v2489_v11 = vpop.permute.xlu1 %2488 }
 0x89f   : > { %2499 = vst.msk [vmem:[#allocation5 + $0x3c] sm:$0xf] %vm2496_vm0, %v2489_v11 }
 0x8a0   : > { %2540 = vst.msk [vmem:[#allocation5 + $0x3c] sm:$0xff] %vm5278_vm2, %v2529_v7 }
 0x8a1   : > { %2569 = vst.msk [vmem:[#allocation5 + $0x40] sm:$0xf] %vm2566_vm15, %v2559_v14  ;;  %v3667_v15 = vld [vmem:[#allocation5 + $0x4c] sm:$0xf0] }
 0x8a2   : > { %v3428_v52 = vor.u32 %v3667_v15, %v3427_v56 }
 0x8a3   : > { %v3429_v47 = vld [vmem:[#allocation5 + $0x50] sm:$0xf0] }
 0x8a4   : > { %3070 = vmatmul.bf16.gmra.mxu0 %v3428_v52 }
 0x8a6   : > { %v2561_v2 = vpop.permute.xlu1 %2560 }
 0x8a7   : > { %2570 = vst.msk [vmem:[#allocation5 + $0x58] sm:$0xf] %vm2566_vm15, %v2561_v2  ;;  %v3664_v58 = vld [vmem:[#allocation5 + $0x3c] sm:$0xf] }
 0x8a8   : > { %v3432_v6 = vor.u32 %v3664_v58, %v3429_v47  ;;  %v3435_v61 = vld [vmem:[#allocation5 + $0x40] sm:$0xf] }
 0x8aa   : > { %3089 = vmatmul.bf16.gmra.mxu1 %v3432_v6  ;;  %3622 = vmatmul.msk.bf16.vlgmr.msra.gmra.mxu2 %vm1592_vm7, %v3440_v16 }
 0x8ae   : > { %v3668_v12 = vld [vmem:[#allocation5 + $0x54] sm:$0xf0] }
 0x8af   : > { %v3436_v8 = vor.u32 %v3668_v12, %v3435_v61 }
 0x8b1   : > { %3108 = vmatmul.bf16.gmra.mxu3 %v3436_v8 }
 0x8b4   : > { %3621 = vmatmul.msk.bf16.vlgmr.msra.gmra.mxu0 %vm1592_vm7, %v3416_v59 }
 0x8d8   : > { %v3028_v62 = vpop.f32.mrf.mxu3 }
 0x8e0   : > { %v3030_v63 = vpop.f32.mrf.mxu3 }
 0x8ea   : > { %v3047_v48 = vpop.f32.mrf.mxu2 }
 0x8eb   : > { %v3048_v29 = vadd.f32 %v3047_v48, %v3028_v62 }
 0x8f2   : > { %v3049_v21 = vpop.f32.mrf.mxu2 }
 0x8f3   : > { %v3050_v53 = vadd.f32 %v3049_v21, %v3030_v63 }
 0x8ff   : > { %v3033_v18 = vpop.f32.mrf.mxu3 }
 0x901   : > { %v3066_v20 = vpop.f32.mrf.mxu0 }
 0x902   : > { %v3067_v31 = vadd.f32 %v3066_v20, %v3048_v29 }
 0x907   : > { %v3035_v22 = vpop.f32.mrf.mxu3  ;;  %v3085_v24 = vpop.f32.mrf.mxu1 }
 0x908   : > { %v3086_v33 = vadd.f32 %v3085_v24, %v3067_v31 }
 0x909   : > { %v3068_v23 = vpop.f32.mrf.mxu0 }
 0x90a   : > { %v3069_v39 = vadd.f32 %v3068_v23, %v3050_v53 }
 0x90f   : > { %v3104_v4 = vpop.f32.mrf.mxu3  ;;  %v3087_v27 = vpop.f32.mrf.mxu1 }
 0x910   : > { %v3105_v44 = vadd.f32 %v3104_v4, %v3086_v33  ;;  %v3088_v43 = vadd.f32 %v3087_v27, %v3069_v39 }
 0x917   : > { %v3106_v32 = vpop.f32.mrf.mxu3 }
 0x918   : > { %v3107_v3 = vadd.f32 %v3106_v32, %v3088_v43 }
 0x91d   : > { %v3052_v25 = vpop.f32.mrf.mxu2 }
 0x91e   : > { %v3053_v35 = vadd.f32 %v3052_v25, %v3033_v18 }
 0x921   : > { %v3071_v26 = vpop.f32.mrf.mxu0 }
 0x922   : > { %v3072_v36 = vadd.f32 %v3071_v26, %v3053_v35 }
 0x925   : > { %v3054_v51 = vpop.f32.mrf.mxu2 }
 0x926   : > { %v3055_v45 = vadd.f32 %v3054_v51, %v3035_v22 }
 0x927   : > { %v3090_v34 = vpop.f32.mrf.mxu1 }
 0x928   : > { %v3091_v38 = vadd.f32 %v3090_v34, %v3072_v36 }
 0x929   : > { %v3073_v28 = vpop.f32.mrf.mxu0 }
 0x92a   : > { %v3074_v49 = vadd.f32 %v3073_v28, %v3055_v45 }
 0x92d   : > { %v3128_v40 = vpop.f32.mrf.mxu2 }
 0x92f   : > { %v3092_v9 = vpop.f32.mrf.mxu1 }
 0x930   : > { %v3093_v13 = vadd.f32 %v3092_v9, %v3074_v49 }
 0x931   : > { %v3123_v37 = vpop.f32.mrf.mxu0 }
 0x932   : > { %v3124_v54 = vadd.f32 %v3123_v37, %v3105_v44 }
 0x934   : > { %v3133_v41 = vmax.f32 %v3124_v54, 0.0  ;;  %v3109_v10 = vpop.f32.mrf.mxu3 }
 0x935   : > { %v3110_v1 = vadd.f32 %v3109_v10, %v3091_v38  ;;  %v3130_v11 = vpop.f32.mrf.mxu2 }
 0x936   : > { %3137 = vst [vmem:[%s315_s14] sm:$0xff] %v3133_v41 }
 0x937   : > { %v3129_v46 = vadd.f32 %v3128_v40, %v3110_v1 }
 0x939   : > { %v3135_v50 = vmax.f32 %v3129_v46, 0.0  ;;  %v3125_v57 = vpop.f32.mrf.mxu0 }
 0x93a   : > { %v3126_v5 = vadd.f32 %v3125_v57, %v3107_v3 }
 0x93b   : > { %3139 = vst [vmem:[%s315_s14 + $0x10] sm:$0xff] %v3135_v50 }
 0x93c   : > { %v3134_v0 = vmax.f32 %v3126_v5, 0.0  ;;  %v3111_v55 = vpop.f32.mrf.mxu3 }
 0x93d   : > { %v3112_v30 = vadd.f32 %v3111_v55, %v3093_v13 }
 0x93e   : > { %3138 = vst [vmem:[%s315_s14 + $0x8] sm:$0xff] %v3134_v0 }
 0x93f   : > { %v3131_v7 = vadd.f32 %v3130_v11, %v3112_v30 }
 0x941   : > { %v3136_v14 = vmax.f32 %v3131_v7, 0.0 }
 0x943   : > { %3140 = vst [vmem:[%s315_s14 + $0x18] sm:$0xff] %v3136_v14 }
 0x944   : > { %3903 = shalt.err (!%p3900_p10)
}
 0x945   : > { %s3979_s23 = smov 128  }
 0x946   : > { %3726 = dma.vmem_to_hbm [thread:$0]  (%p4087_p7), %s3155_s6, 512, %s3157_s30, %s3142_s28, %s3979_s23, %s3979_s23, %s5394_s19  }
 0x947 PF: > { %s3171_s14 = sand.u32 1, %s3934_s24   ;;  %p5409_p12 = scmp.ge.s32.totalorder %s3946_s27, 2 }
 0x948   : > { %s3172_s29 = scalar_lea.sflag [#allocation8], %s3171_s14 }
 0x949   : > { %p3737_p13 = pnand %p5409_p12, %p4055_p6 }
 0x94b   : > { %p3738_p0 = pneg %p3737_p13 }
 0x94d   : > { %3929 = dma.done.wait (%p3738_p0), %s3172_s29, 512  }
 0x94e   : > { %3931 = vsyncadd (%p3738_p0), %s3172_s29, 4294966784  ;;  %p21_p3 = scmp.ge.s32.totalorder %s4073_s15, 4   ;;  %s5410_s24 = smov %s3938_s25 }
 0x94f   : > { %s5411_s25 = smov %s3942_s26  ;;  %s5412_s26 = smov %s4083_s20 }
 0x950   : > { %s5413_s27 = smov %s4073_s15  ;;  %23 = sbr.rel (!%p21_p3) target bundleno = 8 (0x8), region = 110 }
 0x955   :  { %3178 = vsyncpa [#allocation7], 1 }
 0x956   :  { %3180 = vsyncpa [#allocation7 + $0x1], 1 }
 0x957   :  { %3181 = vsyncpa [#allocation10], 1 }
 0x958   :  { %3182 = vsyncpa [#allocation8], 1 }
 0x959   :  { %3184 = vsyncpa [#allocation8 + $0x1], 1 }

</bundles_post_ra>
